<compile_context>
chip_gen: v7x
topology: tpu7x:2x2x1
jax: 0.10.0
libtpu: 0.0.40
codegen_flags: <defaults>
</compile_context>

<pallas_src>
import functools

import jax
import jax.numpy as jnp
from jax.experimental import pallas as pl
from jax.experimental.pallas import tpu as pltpu

C = 40                    # channels (in == out)
KH = KW = 5
H = W = 6
PH = PW = 8               # spatially padded input (6 + 2*1)
OH = OW = 4               # conv output spatial size
NPOS = OH * OW            # 16 output spatial positions
INFEAT = C * PH * PW      # 2560 flattened padded-input features per sample
FEAT = C * NPOS           # 640 conv output features (torch flatten order)
HID = 640
NUM_CLASSES = 2
OUT_PAD = 128             # lane-dense padded output width (sliced to 2 in the wrapper)
BN_EPS = 1e-5


def _round_up(n, m):
    return (n + m - 1) // m * m


# ----------------- fused (conv+BN)+ReLU + fc6+ReLU + fc7 kernel -----------------
def fused_kernel(x_ref, wf_ref, shift_ref, w6_ref, b6_ref, w7_ref, b7_ref, out_ref):
    # x_ref:     (BT, 2560) bf16   zero-padded input, flattened c_in*64 + ih*8 + iw
    # wf_ref:    (2560, 640) bf16  folded conv weight * BN scale; columns c_out*16 + oh*4 + ow
    # shift_ref: (1, 640)   f32    folded conv-bias + BN shift, repeated per spatial position
    # w6_ref:    (640, 640) bf16   fc6_w.T
    # b6_ref:    (1, 640)   f32
    # w7_ref:    (640, 128) bf16   fc7_w.T zero-padded to 128 output lanes
    # b7_ref:    (1, 128)   f32
    # out_ref:   (BT, 128)  f32
    z = jnp.dot(x_ref[...], wf_ref[...], preferred_element_type=jnp.float32)   # conv+BN scale
    z = jnp.maximum(z + shift_ref[...], 0.0).astype(jnp.bfloat16)              # +shift, ReLU

    h = jnp.dot(z, w6_ref[...], preferred_element_type=jnp.float32) + b6_ref[...]
    h = jnp.maximum(h, 0.0).astype(jnp.bfloat16)                               # fc6 + ReLU

    out_ref[...] = jnp.dot(h, w7_ref[...], preferred_element_type=jnp.float32) + b7_ref[...]


# ----------------- one-time weight repack (outside jit) -----------------
def prepare_params(params):
    """Repack PyTorch-layout parameters into the kernel layout (call once, outside jit)."""
    s = params["bn_gamma"] / jnp.sqrt(params["bn_var"] + BN_EPS)                # (Cout,)
    shift_c = params["bn_beta"] + (params["conv_b"] - params["bn_mean"]) * s    # (Cout,)
    # column index in the 640-wide conv output is c_out*16 + p  ->  repeat per channel
    shift = jnp.repeat(shift_c, NPOS).reshape(1, FEAT).astype(jnp.float32)

    # Folded conv weight: wf[c_in*64 + ih*8 + iw, c_out*16 + oh*4 + ow]
    #   = conv_w[c_out, c_in, 0, ih-oh, iw-ow] * s[c_out]   (0 outside the 5x5 window)
    w_t = jnp.transpose(params["conv_w"][:, :, 0], (1, 2, 3, 0)) * s            # (Cin,KH,KW,Cout)
    wf = jnp.zeros((C, PH, PW, C, OH, OW), jnp.float32)
    for oh in range(OH):
        for ow in range(OW):
            wf = wf.at[:, oh:oh + KH, ow:ow + KW, :, oh, ow].set(w_t)
    wf = wf.reshape(INFEAT, FEAT).astype(jnp.bfloat16)

    w6 = params["fc6_w"].T.astype(jnp.bfloat16)                                 # (640, 640)
    b6 = params["fc6_b"].reshape(1, HID).astype(jnp.float32)
    w7 = jnp.zeros((HID, OUT_PAD), jnp.float32).at[:, :NUM_CLASSES].set(
        params["fc7_w"].T).astype(jnp.bfloat16)
    b7 = jnp.zeros((1, OUT_PAD), jnp.float32).at[:, :NUM_CLASSES].set(params["fc7_b"])
    return {"wf": wf, "shift": shift, "w6": w6, "b6": b6, "w7": w7, "b7": b7}


# ----------------- wrapper -----------------
@functools.partial(jax.jit, static_argnames=("block_b",))
def phase_classification_forward(x, prep, block_b=256):
    """x: (B, 40, 1, 6, 6) float32 (NCDHW, like the PyTorch module). Returns (B, 2) float32."""
    B = x.shape[0]
    bt = min(block_b, _round_up(B, 16))          # samples per grid step (bf16 sublane pack)
    if B > 16:
        # keep >= 2 grid steps so the "parallel" axis can split across v7x's two TensorCores
        bt = min(bt, _round_up(pl.cdiv(B, 2), 16))
    bp = _round_up(B, bt)                        # padded batch
    nbt = bp // bt

    # XLA side: only pad + flatten + bf16 cast (~5 KB/sample); no im2col materialization.
    x2d = x[:, :, 0]                                                     # (B, 40, 6, 6)
    x2d = jnp.pad(x2d, ((0, bp - B), (0, 0), (1, 1), (1, 1)))            # (Bp, 40, 8, 8)
    xin = x2d.reshape(bp, INFEAT).astype(jnp.bfloat16)                   # (Bp, 2560)

    out = pl.pallas_call(
        fused_kernel,
        out_shape=jax.ShapeDtypeStruct((bp, OUT_PAD), jnp.float32),
        grid=(nbt,),
        in_specs=[
            pl.BlockSpec((bt, INFEAT), lambda i: (i, 0)),        # input tile (batch-tiled)
            pl.BlockSpec((INFEAT, FEAT), lambda i: (0, 0)),      # folded conv+BN weight
            pl.BlockSpec((1, FEAT), lambda i: (0, 0)),           # BN shift (640-wide)
            pl.BlockSpec((FEAT, HID), lambda i: (0, 0)),         # fc6 weight
            pl.BlockSpec((1, HID), lambda i: (0, 0)),            # fc6 bias
            pl.BlockSpec((HID, OUT_PAD), lambda i: (0, 0)),      # fc7 weight (padded)
            pl.BlockSpec((1, OUT_PAD), lambda i: (0, 0)),        # fc7 bias (padded)
        ],
        out_specs=pl.BlockSpec((bt, OUT_PAD), lambda i: (i, 0)),
        compiler_params=pltpu.CompilerParams(
            dimension_semantics=("parallel",)),
    )(xin, prep["wf"], prep["shift"], prep["w6"], prep["b6"], prep["w7"], prep["b7"])

    return out[:B, :NUM_CLASSES]


# ----------------- pure-JAX reference -----------------
def reference_forward(x, params):
    hp = jax.lax.Precision.HIGHEST
    conv = jax.lax.conv_general_dilated(
        x[:, :, 0], params["conv_w"][:, :, 0],
        window_strides=(1, 1), padding=((1, 1), (1, 1)),
        dimension_numbers=("NCHW", "OIHW", "NCHW"), precision=hp)
    conv = conv + params["conv_b"].reshape(1, C, 1, 1)
    bn = (conv - params["bn_mean"].reshape(1, C, 1, 1)) * (
        params["bn_gamma"].reshape(1, C, 1, 1) /
        jnp.sqrt(params["bn_var"].reshape(1, C, 1, 1) + BN_EPS)
    ) + params["bn_beta"].reshape(1, C, 1, 1)
    r = jnp.maximum(bn, 0.0)
    flat = r.reshape(x.shape[0], -1)
    h = jnp.maximum(jnp.dot(flat, params["fc6_w"].T, precision=hp) + params["fc6_b"], 0.0)
    return jnp.dot(h, params["fc7_w"].T, precision=hp) + params["fc7_b"]


def init_params(key):
    ks = jax.random.split(key, 10)
    return {
        "conv_w": 0.05 * jax.random.normal(ks[0], (C, C, 1, KH, KW), jnp.float32),
        "conv_b": 0.05 * jax.random.normal(ks[1], (C,), jnp.float32),
        "bn_gamma": jax.random.uniform(ks[2], (C,), jnp.float32, 0.5, 1.5),
        "bn_beta": 0.1 * jax.random.normal(ks[3], (C,), jnp.float32),
        "bn_mean": 0.1 * jax.random.normal(ks[4], (C,), jnp.float32),
        "bn_var": jax.random.uniform(ks[5], (C,), jnp.float32, 0.5, 1.5),
        "fc6_w": 0.04 * jax.random.normal(ks[6], (HID, FEAT), jnp.float32),
        "fc6_b": 0.04 * jax.random.normal(ks[7], (HID,), jnp.float32),
        "fc7_w": 0.04 * jax.random.normal(ks[8], (NUM_CLASSES, HID), jnp.float32),
        "fc7_b": 0.04 * jax.random.normal(ks[9], (NUM_CLASSES,), jnp.float32),
    }


if __name__ == "__main__":
    key = jax.random.PRNGKey(0)
    kx, kp = jax.random.split(key)
    B = 2
    x = jax.random.normal(kx, (B, C, 1, H, W), jnp.float32)   # (2, 40, 1, 6, 6)
    params = init_params(kp)
    prep = prepare_params(params)                             # one-time repack, outside jit

    out = jax.block_until_ready(phase_classification_forward(x, prep))
    ref = jax.block_until_ready(reference_forward(x, params))

    assert out.shape == (B, NUM_CLASSES), out.shape
    # bf16 matmul operands (f32 MXU accumulation) vs full-f32 HIGHEST reference:
    # input/weight rounding accumulated over K=2560/640 -> errors O(1e-2) absolute.
    assert jnp.allclose(out, ref, rtol=3e-2, atol=3e-2), (out, ref)

    print("KERNEL_OK")
</pallas_src>

<mosaic_0001>
module attributes {stable_mosaic.version = 11 : i64} {
  func.func @fused_kernel(%arg0: i32, %arg1: memref<16x2560xbf16, #tpu.memory_space<vmem>>, %arg2: memref<2560x640xbf16, #tpu.memory_space<vmem>>, %arg3: memref<1x640xf32, #tpu.memory_space<vmem>>, %arg4: memref<640x640xbf16, #tpu.memory_space<vmem>>, %arg5: memref<1x640xf32, #tpu.memory_space<vmem>>, %arg6: memref<640x128xbf16, #tpu.memory_space<vmem>>, %arg7: memref<1x128xf32, #tpu.memory_space<vmem>>, %arg8: memref<16x128xf32, #tpu.memory_space<vmem>>) attributes {dimension_semantics = [#tpu.dimension_semantics<parallel>], iteration_bounds = array<i64: 1>, scalar_prefetch = 0 : i64, scratch_operands = 0 : i64, tpu.core_type = #tpu.core_type<tc>, window_params = [{transform_indices = @transform_0, window_bounds = array<i64: 16, 2560>}, {pipeline_mode = #tpu.pipeline_mode<synchronous>, transform_indices = @transform_1, window_bounds = array<i64: 2560, 640>}, {pipeline_mode = #tpu.pipeline_mode<synchronous>, transform_indices = @transform_2, window_bounds = array<i64: 1, 640>}, {pipeline_mode = #tpu.pipeline_mode<synchronous>, transform_indices = @transform_3, window_bounds = array<i64: 640, 640>}, {pipeline_mode = #tpu.pipeline_mode<synchronous>, transform_indices = @transform_4, window_bounds = array<i64: 1, 640>}, {pipeline_mode = #tpu.pipeline_mode<synchronous>, transform_indices = @transform_5, window_bounds = array<i64: 640, 128>}, {pipeline_mode = #tpu.pipeline_mode<synchronous>, transform_indices = @transform_6, window_bounds = array<i64: 1, 128>}, {transform_indices = @transform_7, window_bounds = array<i64: 16, 128>}]} {
    %c0 = arith.constant 0 : index
    %c0_0 = arith.constant 0 : index
    %0 = vector.load %arg1[%c0, %c0_0] : memref<16x2560xbf16, #tpu.memory_space<vmem>>, vector<16x2560xbf16>
    %c0_1 = arith.constant 0 : index
    %c0_2 = arith.constant 0 : index
    %1 = vector.load %arg2[%c0_1, %c0_2] : memref<2560x640xbf16, #tpu.memory_space<vmem>>, vector<2560x640xbf16>
    %cst = arith.constant dense<0.000000e+00> : vector<16x640xf32>
    %2 = tpu.matmul %0, %1, %cst {dimension_numbers = #tpu.dot_dimension_numbers<[1], [0], [0], [1], [0, 0, 1, 1], [], []>} : vector<16x2560xbf16>, vector<2560x640xbf16>, vector<16x640xf32> -> vector<16x640xf32>
    %c0_3 = arith.constant 0 : index
    %c0_4 = arith.constant 0 : index
    %3 = vector.load %arg3[%c0_3, %c0_4] : memref<1x640xf32, #tpu.memory_space<vmem>>, vector<1x640xf32>
    %4 = vector.broadcast %3 : vector<1x640xf32> to vector<16x640xf32>
    %5 = arith.addf %2, %4 : vector<16x640xf32>
    %cst_5 = arith.constant 0.000000e+00 : f32
    %6 = vector.broadcast %cst_5 : f32 to vector<16x640xf32>
    %7 = arith.maximumf %5, %6 : vector<16x640xf32>
    %8 = arith.truncf %7 : vector<16x640xf32> to vector<16x640xbf16>
    %c0_6 = arith.constant 0 : index
    %c0_7 = arith.constant 0 : index
    %9 = vector.load %arg4[%c0_6, %c0_7] : memref<640x640xbf16, #tpu.memory_space<vmem>>, vector<640x640xbf16>
    %cst_8 = arith.constant dense<0.000000e+00> : vector<16x640xf32>
    %10 = tpu.matmul %8, %9, %cst_8 {dimension_numbers = #tpu.dot_dimension_numbers<[1], [0], [0], [1], [0, 0, 1, 1], [], []>} : vector<16x640xbf16>, vector<640x640xbf16>, vector<16x640xf32> -> vector<16x640xf32>
    %c0_9 = arith.constant 0 : index
    %c0_10 = arith.constant 0 : index
    %11 = vector.load %arg5[%c0_9, %c0_10] : memref<1x640xf32, #tpu.memory_space<vmem>>, vector<1x640xf32>
    %12 = vector.broadcast %11 : vector<1x640xf32> to vector<16x640xf32>
    %13 = arith.addf %10, %12 : vector<16x640xf32>
    %cst_11 = arith.constant 0.000000e+00 : f32
    %14 = vector.broadcast %cst_11 : f32 to vector<16x640xf32>
    %15 = arith.maximumf %13, %14 : vector<16x640xf32>
    %16 = arith.truncf %15 : vector<16x640xf32> to vector<16x640xbf16>
    %c0_12 = arith.constant 0 : index
    %c0_13 = arith.constant 0 : index
    %17 = vector.load %arg6[%c0_12, %c0_13] : memref<640x128xbf16, #tpu.memory_space<vmem>>, vector<640x128xbf16>
    %cst_14 = arith.constant dense<0.000000e+00> : vector<16x128xf32>
    %18 = tpu.matmul %16, %17, %cst_14 {dimension_numbers = #tpu.dot_dimension_numbers<[1], [0], [0], [1], [0, 0, 1, 1], [], []>} : vector<16x640xbf16>, vector<640x128xbf16>, vector<16x128xf32> -> vector<16x128xf32>
    %c0_15 = arith.constant 0 : index
    %c0_16 = arith.constant 0 : index
    %19 = vector.load %arg7[%c0_15, %c0_16] : memref<1x128xf32, #tpu.memory_space<vmem>>, vector<1x128xf32>
    %20 = vector.broadcast %19 : vector<1x128xf32> to vector<16x128xf32>
    %21 = arith.addf %18, %20 : vector<16x128xf32>
    %c0_17 = arith.constant 0 : index
    %c0_18 = arith.constant 0 : index
    %22 = vector.load %arg8[%c0_17, %c0_18] : memref<16x128xf32, #tpu.memory_space<vmem>>, vector<16x128xf32>
    tpu.vector_store %arg8[%c0_17, %c0_18], %21 {strides = array<i32>} : memref<16x128xf32, #tpu.memory_space<vmem>>, vector<16x128xf32>,
    return
  }
  func.func @transform_0(%arg0: i32) -> (i32, i32) {
    %c0_i32 = arith.constant 0 : i32
    %c0_i32_0 = arith.constant 0 : i32
    return %arg0, %c0_i32 : i32, i32
  }
  func.func @transform_1(%arg0: i32) -> (i32, i32) {
    %c0_i32 = arith.constant 0 : i32
    %c0_i32_0 = arith.constant 0 : i32
    %c0_i32_1 = arith.constant 0 : i32
    return %c0_i32, %c0_i32_0 : i32, i32
  }
  func.func @transform_2(%arg0: i32) -> (i32, i32) {
    %c0_i32 = arith.constant 0 : i32
    %c0_i32_0 = arith.constant 0 : i32
    %c0_i32_1 = arith.constant 0 : i32
    return %c0_i32, %c0_i32_0 : i32, i32
  }
  func.func @transform_3(%arg0: i32) -> (i32, i32) {
    %c0_i32 = arith.constant 0 : i32
    %c0_i32_0 = arith.constant 0 : i32
    %c0_i32_1 = arith.constant 0 : i32
    return %c0_i32, %c0_i32_0 : i32, i32
  }
  func.func @transform_4(%arg0: i32) -> (i32, i32) {
    %c0_i32 = arith.constant 0 : i32
    %c0_i32_0 = arith.constant 0 : i32
    %c0_i32_1 = arith.constant 0 : i32
    return %c0_i32, %c0_i32_0 : i32, i32
  }
  func.func @transform_5(%arg0: i32) -> (i32, i32) {
    %c0_i32 = arith.constant 0 : i32
    %c0_i32_0 = arith.constant 0 : i32
    %c0_i32_1 = arith.constant 0 : i32
    return %c0_i32, %c0_i32_0 : i32, i32
  }
  func.func @transform_6(%arg0: i32) -> (i32, i32) {
    %c0_i32 = arith.constant 0 : i32
    %c0_i32_0 = arith.constant 0 : i32
    %c0_i32_1 = arith.constant 0 : i32
    return %c0_i32, %c0_i32_0 : i32, i32
  }
  func.func @transform_7(%arg0: i32) -> (i32, i32) {
    %c0_i32 = arith.constant 0 : i32
    %c0_i32_0 = arith.constant 0 : i32
    return %arg0, %c0_i32 : i32, i32
  }
}

</mosaic_0001>

<bundles_post_ra>
// kernel: phase_classification_forward.1
= control target key start
LH: loop header
LB: loop body
LE: loop exit
PB: predicated region body
PF: predicated region fallthrough
CT: control target
= control target key end

     0   :  { %12 = vsyncpa [#allocation3], 0  ;;  %s12334_s0 = inlined_call_operand.vmem [shape: bf16[16,2560], index: 0, kind: input, shape index: {}]   ;;  %s12335_s1 = inlined_call_operand.hbm [shape: bf16[2560,640], index: 1, kind: input, shape index: {}]   ;;  %s12336_s2 = inlined_call_operand.hbm [shape: f32[1,640], index: 2, kind: input, shape index: {}]   ;;  %s12337_s3 = inlined_call_operand.hbm [shape: bf16[640,640], index: 3, kind: input, shape index: {}]   ;;  %s12338_s4 = inlined_call_operand.hbm [shape: f32[1,640], index: 4, kind: input, shape index: {}]   ;;  %s12339_s5 = inlined_call_operand.hbm [shape: bf16[640,128], index: 5, kind: input, shape index: {}]   ;;  %s12340_s6 = inlined_call_operand.hbm [shape: f32[1,128], index: 6, kind: input, shape index: {}]   ;;  %s12341_s7 = inlined_call_operand.vmem [shape: f32[16,128], index: 7, kind: output, shape index: {}]  }
   0x1   :  { %13 = vsyncpa [#allocation5], 0 }
   0x2   :  { %14 = vsyncpa [#allocation8], 0 }
   0x3   :  { %15 = vsyncpa [#allocation11], 0  ;;  %s11992_s24 = smov [#allocation4]   ;;  %s11993_s26 = smov [#allocation7]  }
   0x4   :  { %s36_s25 = sshll.u32 %s11992_s24, 4  ;;  %s58_s27 = sshll.u32 %s11993_s26, 4  ;;  %s37_s25 = int_to_ptr.vmem [resolvable:$true] %s36_s25  ;;  %s59_s27 = int_to_ptr.vmem [resolvable:$true] %s58_s27 }
   0x5   :  { %s11852_s30 = scalar_lea.hbm %s12336_s2, 80 }
   0x6   :  { %p11853_p0 = scmp.ne.s32.totalorder %s12336_s2, %s11852_s30  ;;  %p11856_p1 = scmp.lt.u32.totalorder %s11852_s30, %s12336_s2 }
   0x8   :  { %p11858_p2 = pnand %p11856_p1, %p11853_p0 }
   0xa   :  { %11861 = shalt.err (!%p11858_p2)
}
   0xb   :  { %s11862_s12 = scalar_lea.vmem %s37_s25, 80  ;;  %s11866_s13 = scalar_lea.vmem %s37_s25, 96 }
   0xc   :  { %p11863_p3 = scmp.ne.s32.totalorder %s37_s25, %s11862_s12  ;;  %p11867_p4 = scmp.lt.s32.totalorder %s37_s25, %s37_s25 }
   0xd   :  { %p11868_p5 = scmp.lt.s32.totalorder %s11866_s13, %s11862_s12 }
   0xf   :  { %p11869_p6 = por %p11868_p5, %p11867_p4 }
  0x11   :  { %p11870_p7 = pnand %p11869_p6, %p11863_p3 }
  0x13   :  { %11873 = shalt.err (!%p11870_p7)
}
  0x14   :  { %39 = dma.hbm_to_vmem [thread:$0]  %s12336_s2, 80, %s37_s25, [#allocation5]  }
  0x15   :  { %s11874_s18 = scalar_lea.hbm %s12338_s4, 80 }
  0x16   :  { %p11875_p8 = scmp.ne.s32.totalorder %s12338_s4, %s11874_s18  ;;  %p11878_p9 = scmp.lt.u32.totalorder %s11874_s18, %s12338_s4 }
  0x18   :  { %p11880_p10 = pnand %p11878_p9, %p11875_p8 }
  0x1a   :  { %11883 = shalt.err (!%p11880_p10)
}
  0x1b   :  { %s11884_s23 = scalar_lea.vmem %s59_s27, 80  ;;  %s11888_s24 = scalar_lea.vmem %s59_s27, 96 }
  0x1c   :  { %p11885_p11 = scmp.ne.s32.totalorder %s59_s27, %s11884_s23  ;;  %p11889_p12 = scmp.lt.s32.totalorder %s59_s27, %s59_s27 }
  0x1d   :  { %p11890_p13 = scmp.lt.s32.totalorder %s11888_s24, %s11884_s23 }
  0x1f   :  { %p11891_p0 = por %p11890_p13, %p11889_p12 }
  0x21   :  { %p11892_p1 = pnand %p11891_p0, %p11885_p11 }
  0x23   :  { %11895 = shalt.err (!%p11892_p1)
}
  0x24   :  { %61 = dma.hbm_to_vmem [thread:$0]  %s12338_s4, 80, %s59_s27, [#allocation8]  }
  0x25   :  { %s11994_s26 = smov [#allocation2]   ;;  %s11896_s8 = scalar_lea.hbm %s12335_s1, 102400 }
  0x26   :  { %s23_s28 = sshll.u32 %s11994_s26, 4  ;;  %p11897_p2 = scmp.ne.s32.totalorder %s12335_s1, %s11896_s8  ;;  %s24_s28 = int_to_ptr.vmem [resolvable:$true] %s23_s28 }
  0x27   :  { %p11900_p3 = scmp.lt.u32.totalorder %s11896_s8, %s12335_s1 }
  0x29   :  { %p11902_p4 = pnand %p11900_p3, %p11897_p2 }
  0x2b   :  { %11905 = shalt.err (!%p11902_p4)
}
  0x2c   :  { %s11906_s13 = scalar_lea.vmem %s24_s28, 102400  ;;  %p11911_p6 = scmp.lt.s32.totalorder %s24_s28, %s24_s28 }
  0x2d   :  { %p11907_p5 = scmp.ne.s32.totalorder %s24_s28, %s11906_s13  ;;  %p11912_p7 = scmp.lt.s32.totalorder %s11906_s13, %s11906_s13 }
  0x2f   :  { %p11913_p8 = por %p11912_p7, %p11911_p6 }
  0x31   :  { %p11914_p9 = pnand %p11913_p8, %p11907_p5 }
  0x33   :  { %11917 = shalt.err (!%p11914_p9)
}
  0x34   :  { %s11995_s4 = smov 320   ;;  %s11996_s27 = smov 20  }
  0x35   :  { %29 = dma.hbm_to_vmem [thread:$0]  %s12335_s1, 102400, %s24_s28, [#allocation3], %s11995_s4, %s11995_s4, %s11996_s27  }
  0x36   :  { %s11997_s16 = smov [#allocation6]   ;;  %s11998_s18 = smov [#allocation9]  }
  0x37   :  { %s45_s17 = sshll.u32 %s11997_s16, 4  ;;  %s67_s19 = sshll.u32 %s11998_s18, 4  ;;  %s46_s17 = int_to_ptr.vmem [resolvable:$true] %s45_s17  ;;  %s68_s19 = int_to_ptr.vmem [resolvable:$true] %s67_s19 }
  0x38   :  { %s11918_s22 = scalar_lea.hbm %s12337_s3, 25600 }
  0x39   :  { %p11919_p10 = scmp.ne.s32.totalorder %s12337_s3, %s11918_s22  ;;  %p11922_p11 = scmp.lt.u32.totalorder %s11918_s22, %s12337_s3 }
  0x3b   :  { %p11924_p12 = pnand %p11922_p11, %p11919_p10 }
  0x3d   :  { %11927 = shalt.err (!%p11924_p12)
}
  0x3e   :  { %s11928_s1 = scalar_lea.vmem %s46_s17, 25600  ;;  %p11933_p0 = scmp.lt.s32.totalorder %s46_s17, %s46_s17 }
  0x3f   :  { %p11929_p13 = scmp.ne.s32.totalorder %s46_s17, %s11928_s1  ;;  %p11934_p1 = scmp.lt.s32.totalorder %s11928_s1, %s11928_s1 }
  0x41   :  { %p11935_p2 = por %p11934_p1, %p11933_p0 }
  0x43   :  { %p11936_p3 = pnand %p11935_p2, %p11929_p13 }
  0x45   :  { %11939 = shalt.err (!%p11936_p3)
}
  0x46   :  { %51 = dma.hbm_to_vmem [thread:$0]  %s12337_s3, 25600, %s46_s17, [#allocation5], %s11995_s4, %s11995_s4, %s11996_s27  }
  0x47   :  { %s11940_s8 = scalar_lea.hbm %s12339_s5, 5120 }
  0x48   :  { %p11941_p4 = scmp.ne.s32.totalorder %s12339_s5, %s11940_s8  ;;  %p11944_p5 = scmp.lt.u32.totalorder %s11940_s8, %s12339_s5 }
  0x4a   :  { %p11946_p6 = pnand %p11944_p5, %p11941_p4 }
  0x4c   :  { %11949 = shalt.err (!%p11946_p6)
}
  0x4d   :  { %s11950_s13 = scalar_lea.vmem %s68_s19, 5120  ;;  %p11955_p8 = scmp.lt.s32.totalorder %s68_s19, %s68_s19 }
  0x4e   :  { %p11951_p7 = scmp.ne.s32.totalorder %s68_s19, %s11950_s13  ;;  %p11956_p9 = scmp.lt.s32.totalorder %s11950_s13, %s11950_s13 }
  0x50   :  { %p11957_p10 = por %p11956_p9, %p11955_p8 }
  0x52   :  { %p11958_p11 = pnand %p11957_p10, %p11951_p7 }
  0x54   :  { %11961 = shalt.err (!%p11958_p11)
}
  0x55   :  { %s11999_s3 = smov 64   ;;  %s12000_s4 = smov 4  }
  0x56   :  { %73 = dma.hbm_to_vmem [thread:$0]  %s12339_s5, 5120, %s68_s19, [#allocation8], %s11999_s3, %s11999_s3, %s12000_s4  }
  0x57   :  { %s12001_s15 = smov [#allocation10]   ;;  %s11962_s20 = scalar_lea.hbm %s12340_s6, 16 }
  0x58   :  { %s80_s16 = sshll.u32 %s12001_s15, 4  ;;  %p11963_p12 = scmp.ne.s32.totalorder %s12340_s6, %s11962_s20  ;;  %s81_s16 = int_to_ptr.vmem [resolvable:$true] %s80_s16 }
  0x59   :  { %p11966_p13 = scmp.lt.u32.totalorder %s11962_s20, %s12340_s6 }
  0x5b   :  { %p11968_p0 = pnand %p11966_p13, %p11963_p12 }
  0x5d   :  { %11971 = shalt.err (!%p11968_p0)
}
  0x5e   :  { %s11972_s2 = scalar_lea.vmem %s81_s16, 16  ;;  %s11976_s5 = scalar_lea.vmem %s81_s16, 32 }
  0x5f   :  { %p11973_p1 = scmp.ne.s32.totalorder %s81_s16, %s11972_s2  ;;  %p11977_p2 = scmp.lt.s32.totalorder %s81_s16, %s81_s16 }
  0x60   :  { %p11978_p3 = scmp.lt.s32.totalorder %s11976_s5, %s11972_s2 }
  0x62   :  { %p11979_p4 = por %p11978_p3, %p11977_p2 }
  0x64   :  { %p11980_p5 = pnand %p11979_p4, %p11973_p1 }
  0x66   :  { %11983 = shalt.err (!%p11980_p5)
}
  0x67   :  { %83 = dma.hbm_to_vmem [thread:$0]  %s12340_s6, 16, %s81_s16, [#allocation11]  }
  0x68   :  { %11984 = dma.done.wait [#allocation3], 102400  }
  0x69   :  { %11985 = vsyncadd [#allocation3], 4294864896 }
  0x6a   :  { %11986 = dma.done.wait [#allocation5], 25680  }
  0x6b   :  { %11987 = vsyncadd [#allocation5], 4294941616 }
  0x6c   :  { %11988 = dma.done.wait [#allocation8], 5200  }
  0x6d   :  { %11989 = vsyncadd [#allocation8], 4294962096 }
  0x6e   :  { %11990 = dma.done.wait [#allocation11], 16  }
  0x6f   :  { %11991 = vsyncadd [#allocation11], 4294967280  ;;  %v10362_v0 = vld [vmem:[#allocation2 + $0x4] ss:$20 sps:$4 sm:$0xff]   ;;  %v10364_v1 = vld [vmem:[#allocation2 + $0xc] ss:$20 sps:$4 sm:$0xff]  }
  0x70   :  { %5370 = vmatprep.subr.bf16.mxu0 %v10362_v0  ;;  %v10366_v2 = vld [vmem:[#allocation2] ss:$20 sps:$4 sm:$0xff]   ;;  %v10367_v3 = vld [vmem:[#allocation2 + $0x8] ss:$20 sps:$4 sm:$0xff]   ;;  %5800 = vmatprep.subr.bf16.mxu1 %v10364_v1  ;;  %v10373_v7 = vld [vmem:[#allocation2 + $0x30] ss:$20 sps:$4 sm:$0xff]  }
  0x71   :  { %v10368_v4 = vld [vmem:[#allocation2 + $0x2c] ss:$20 sps:$4 sm:$0xff]   ;;  %5371 = vmatpush1.bf16.msra.mxu0 %v10366_v2  ;;  %5801 = vmatpush1.bf16.msra.mxu1 %v10367_v3  ;;  %v10370_v5 = vld [vmem:[#allocation2 + $0x34] ss:$20 sps:$4 sm:$0xff]   ;;  %v10376_v9 = vld [vmem:[#allocation2 + $0x5c] ss:$20 sps:$4 sm:$0xff]  }
  0x72   :  { %v10372_v6 = vld [vmem:[#allocation2 + $0x28] ss:$20 sps:$4 sm:$0xff]   ;;  %5372 = vmatprep.subr.bf16.mxu0 %v10368_v4  ;;  %5802 = vmatprep.subr.bf16.mxu1 %v10370_v5  ;;  %v10378_v10 = vld [vmem:[#allocation2 + $0x50] ss:$20 sps:$4 sm:$0xff]   ;;  %v10379_v11 = vld [vmem:[#allocation2 + $0x58] ss:$20 sps:$4 sm:$0xff]  }
  0x73   :  { %v10374_v8 = vld [vmem:[#allocation2 + $0x54] ss:$20 sps:$4 sm:$0xff]   ;;  %v10380_v12 = vld [vmem:[#allocation2 + $0x7c] ss:$20 sps:$4 sm:$0xff]   ;;  %v10382_v13 = vld [vmem:[#allocation2 + $0x84] ss:$20 sps:$4 sm:$0xff]  }
  0x74   :  { %v10384_v14 = vld [vmem:[#allocation2 + $0x78] ss:$20 sps:$4 sm:$0xff]   ;;  %v10385_v15 = vld [vmem:[#allocation2 + $0x80] ss:$20 sps:$4 sm:$0xff]   ;;  %v10391_v19 = vld [vmem:[#allocation2 + $0xa8] ss:$20 sps:$4 sm:$0xff]  }
  0x75   :  { %5373 = vmatpush1.bf16.msra.mxu0 %v10372_v6  ;;  %5803 = vmatpush1.bf16.msra.mxu1 %v10373_v7  ;;  %v10386_v16 = vld [vmem:[#allocation2 + $0xa4] ss:$20 sps:$4 sm:$0xff]   ;;  %v10388_v17 = vld [vmem:[#allocation2 + $0xac] ss:$20 sps:$4 sm:$0xff]   ;;  %v10394_v21 = vld [vmem:[#allocation2 + $0xd4] ss:$20 sps:$4 sm:$0xff]  }
  0x76   :  { %5374 = vmatprep.subr.bf16.mxu0 %v10374_v8  ;;  %5804 = vmatprep.subr.bf16.mxu1 %v10376_v9  ;;  %v10390_v18 = vld [vmem:[#allocation2 + $0xa0] ss:$20 sps:$4 sm:$0xff]   ;;  %v10396_v22 = vld [vmem:[#allocation2 + $0xc8] ss:$20 sps:$4 sm:$0xff]   ;;  %v10397_v23 = vld [vmem:[#allocation2 + $0xd0] ss:$20 sps:$4 sm:$0xff]  }
  0x77   :  { %v10392_v20 = vld [vmem:[#allocation2 + $0xcc] ss:$20 sps:$4 sm:$0xff]   ;;  %v10398_v24 = vld [vmem:[#allocation2 + $0xf4] ss:$20 sps:$4 sm:$0xff]   ;;  %v10400_v25 = vld [vmem:[#allocation2 + $0xfc] ss:$20 sps:$4 sm:$0xff]  }
  0x78   :  { %v10402_v26 = vld [vmem:[#allocation2 + $0xf0] ss:$20 sps:$4 sm:$0xff]   ;;  %v10403_v27 = vld [vmem:[#allocation2 + $0xf8] ss:$20 sps:$4 sm:$0xff]   ;;  %v10409_v31 = vld [vmem:[#allocation2 + $0x120] ss:$20 sps:$4 sm:$0xff]  }
  0x79   :  { %5375 = vmatpush1.bf16.msra.mxu0 %v10378_v10  ;;  %5805 = vmatpush1.bf16.msra.mxu1 %v10379_v11  ;;  %v10404_v28 = vld [vmem:[#allocation2 + $0x11c] ss:$20 sps:$4 sm:$0xff]   ;;  %v10406_v29 = vld [vmem:[#allocation2 + $0x124] ss:$20 sps:$4 sm:$0xff]   ;;  %v10412_v33 = vld [vmem:[#allocation2 + $0x14c] ss:$20 sps:$4 sm:$0xff]  }
  0x7a   :  { %5376 = vmatprep.subr.bf16.mxu0 %v10380_v12  ;;  %5806 = vmatprep.subr.bf16.mxu1 %v10382_v13  ;;  %v10408_v30 = vld [vmem:[#allocation2 + $0x118] ss:$20 sps:$4 sm:$0xff]   ;;  %v10414_v34 = vld [vmem:[#allocation2 + $0x140] ss:$20 sps:$4 sm:$0xff]   ;;  %v10415_v35 = vld [vmem:[#allocation2 + $0x148] ss:$20 sps:$4 sm:$0xff]  }
  0x7b   :  { %v10410_v32 = vld [vmem:[#allocation2 + $0x144] ss:$20 sps:$4 sm:$0xff]   ;;  %v10416_v36 = vld [vmem:[#allocation2 + $0x16c] ss:$20 sps:$4 sm:$0xff]   ;;  %v10418_v37 = vld [vmem:[#allocation2 + $0x174] ss:$20 sps:$4 sm:$0xff]  }
  0x7c   :  { %v10420_v38 = vld [vmem:[#allocation2 + $0x168] ss:$20 sps:$4 sm:$0xff]   ;;  %v10421_v39 = vld [vmem:[#allocation2 + $0x170] ss:$20 sps:$4 sm:$0xff]   ;;  %v10427_v43 = vld [vmem:[#allocation2 + $0x198] ss:$20 sps:$4 sm:$0xff]  }
  0x7d   :  { %5377 = vmatpush1.bf16.msra.mxu0 %v10384_v14  ;;  %5807 = vmatpush1.bf16.msra.mxu1 %v10385_v15  ;;  %v10422_v40 = vld [vmem:[#allocation2 + $0x194] ss:$20 sps:$4 sm:$0xff]   ;;  %v10424_v41 = vld [vmem:[#allocation2 + $0x19c] ss:$20 sps:$4 sm:$0xff]   ;;  %v10430_v45 = vld [vmem:[#allocation2 + $0x1c4] ss:$20 sps:$4 sm:$0xff]  }
  0x7e   :  { %5378 = vmatprep.subr.bf16.mxu0 %v10386_v16  ;;  %5808 = vmatprep.subr.bf16.mxu1 %v10388_v17  ;;  %v10426_v42 = vld [vmem:[#allocation2 + $0x190] ss:$20 sps:$4 sm:$0xff]   ;;  %v10432_v46 = vld [vmem:[#allocation2 + $0x1b8] ss:$20 sps:$4 sm:$0xff]   ;;  %v10433_v48 = vld [vmem:[#allocation2 + $0x1c0] ss:$20 sps:$4 sm:$0xff]  }
  0x7f   :  { %v10428_v44 = vld [vmem:[#allocation2 + $0x1bc] ss:$20 sps:$4 sm:$0xff]   ;;  %v10458_v47 = vld [vmem:[%s12334_s0 + $0x4] ss:$80 sps:$4 sm:$0xff]   ;;  %v10436_v50 = vld [vmem:[#allocation2 + $0x1ec] ss:$20 sps:$4 sm:$0xff]  }
  0x80   :  { %v10434_v49 = vld [vmem:[#allocation2 + $0x1e4] ss:$20 sps:$4 sm:$0xff]   ;;  %5402 = vmatprep.mubr.bf16.mxu0 %v10458_v47  ;;  %5832 = vmatprep.mubr.bf16.mxu1 %v10458_v47  ;;  %v10438_v51 = vld [vmem:[#allocation2 + $0x1e0] ss:$20 sps:$4 sm:$0xff]   ;;  %v10439_v52 = vld [vmem:[#allocation2 + $0x1e8] ss:$20 sps:$4 sm:$0xff]  }
  0x81   :  { %5379 = vmatpush1.bf16.msra.mxu0 %v10390_v18  ;;  %5809 = vmatpush1.bf16.msra.mxu1 %v10391_v19  ;;  %v10440_v53 = vld [vmem:[#allocation2 + $0x20c] ss:$20 sps:$4 sm:$0xff]   ;;  %v10442_v54 = vld [vmem:[#allocation2 + $0x214] ss:$20 sps:$4 sm:$0xff]   ;;  %v10445_v56 = vld [vmem:[#allocation2 + $0x210] ss:$20 sps:$4 sm:$0xff]  }
  0x82   :  { %5380 = vmatprep.subr.bf16.mxu0 %v10392_v20  ;;  %5810 = vmatprep.subr.bf16.mxu1 %v10394_v21  ;;  %v10444_v55 = vld [vmem:[#allocation2 + $0x208] ss:$20 sps:$4 sm:$0xff]   ;;  %v10450_v59 = vld [vmem:[#allocation2 + $0x230] ss:$20 sps:$4 sm:$0xff]   ;;  %v10451_v60 = vld [vmem:[#allocation2 + $0x238] ss:$20 sps:$4 sm:$0xff]  }
  0x83   :  { %v10446_v57 = vld [vmem:[#allocation2 + $0x234] ss:$20 sps:$4 sm:$0xff]   ;;  %v10448_v58 = vld [vmem:[#allocation2 + $0x23c] ss:$20 sps:$4 sm:$0xff]   ;;  %v10454_v62 = vld [vmem:[#allocation2 + $0x264] ss:$20 sps:$4 sm:$0xff]  }
  0x84   :  { %v10452_v61 = vld [vmem:[#allocation2 + $0x25c] ss:$20 sps:$4 sm:$0xff]   ;;  %v10456_v63 = vld [vmem:[#allocation2 + $0x258] ss:$20 sps:$4 sm:$0xff]   ;;  %v10457_v0 = vld [vmem:[#allocation2 + $0x260] ss:$20 sps:$4 sm:$0xff]  }
  0x85   :  { %5381 = vmatpush1.bf16.msra.mxu0 %v10396_v22  ;;  %5811 = vmatpush1.bf16.msra.mxu1 %v10397_v23  ;;  %v10462_v1 = vld [vmem:[#allocation2 + $0x284] ss:$20 sps:$4 sm:$0xff]   ;;  %v10465_v2 = vld [vmem:[#allocation2 + $0x28c] ss:$20 sps:$4 sm:$0xff]   ;;  %v10463_v4 = vld [vmem:[#allocation2 + $0x288] ss:$20 sps:$4 sm:$0xff]  }
  0x86   :  { %5382 = vmatprep.subr.bf16.mxu0 %v10398_v24  ;;  %5812 = vmatprep.subr.bf16.mxu1 %v10400_v25  ;;  %v10460_v3 = vld [vmem:[#allocation2 + $0x280] ss:$20 sps:$4 sm:$0xff]   ;;  %v10467_v8 = vld [vmem:[#allocation2 + $0x2a8] ss:$20 sps:$4 sm:$0xff]   ;;  %v10470_v9 = vld [vmem:[#allocation2 + $0x2b0] ss:$20 sps:$4 sm:$0xff]  }
  0x87   :  { %v10466_v5 = vld [vmem:[%s12334_s0] ss:$80 sps:$4 sm:$0xff]   ;;  %v10472_v7 = vld [vmem:[#allocation2 + $0x2b4] ss:$20 sps:$4 sm:$0xff]   ;;  %v10476_v13 = vld [vmem:[#allocation2 + $0x2d8] ss:$20 sps:$4 sm:$0xff]  }
  0x88   :  { %v10469_v6 = vld [vmem:[#allocation2 + $0x2ac] ss:$20 sps:$4 sm:$0xff]   ;;  %v10475_v10 = vld [vmem:[#allocation2 + $0x2d4] ss:$20 sps:$4 sm:$0xff]   ;;  %v10478_v11 = vld [vmem:[#allocation2 + $0x2dc] ss:$20 sps:$4 sm:$0xff]  }
  0x89   :  { %5383 = vmatpush1.bf16.msra.mxu0 %v10402_v26  ;;  %5813 = vmatpush1.bf16.msra.mxu1 %v10403_v27  ;;  %v10473_v12 = vld [vmem:[#allocation2 + $0x2d0] ss:$20 sps:$4 sm:$0xff]   ;;  %v10479_v16 = vld [vmem:[#allocation2 + $0x2f8] ss:$20 sps:$4 sm:$0xff]   ;;  %v10482_v17 = vld [vmem:[#allocation2 + $0x300] ss:$20 sps:$4 sm:$0xff]  }
  0x8a   :  { %5384 = vmatprep.subr.bf16.mxu0 %v10404_v28  ;;  %5814 = vmatprep.subr.bf16.mxu1 %v10406_v29  ;;  %v10481_v14 = vld [vmem:[#allocation2 + $0x2fc] ss:$20 sps:$4 sm:$0xff]   ;;  %v10484_v15 = vld [vmem:[#allocation2 + $0x304] ss:$20 sps:$4 sm:$0xff]   ;;  %v10490_v19 = vld [vmem:[#allocation2 + $0x32c] ss:$20 sps:$4 sm:$0xff]  }
  0x8b   :  { %v10487_v18 = vld [vmem:[#allocation2 + $0x324] ss:$20 sps:$4 sm:$0xff]   ;;  %v10485_v20 = vld [vmem:[#allocation2 + $0x320] ss:$20 sps:$4 sm:$0xff]   ;;  %v10488_v21 = vld [vmem:[#allocation2 + $0x328] ss:$20 sps:$4 sm:$0xff]  }
  0x8c   :  { %v10493_v22 = vld [vmem:[#allocation2 + $0x34c] ss:$20 sps:$4 sm:$0xff]   ;;  %v10496_v23 = vld [vmem:[#allocation2 + $0x354] ss:$20 sps:$4 sm:$0xff]   ;;  %v10494_v25 = vld [vmem:[#allocation2 + $0x350] ss:$20 sps:$4 sm:$0xff]  }
  0x8d   :  { %5385 = vmatpush1.bf16.msra.mxu0 %v10408_v30  ;;  %5815 = vmatpush1.bf16.msra.mxu1 %v10409_v31  ;;  %v10491_v24 = vld [vmem:[#allocation2 + $0x348] ss:$20 sps:$4 sm:$0xff]   ;;  %v10497_v28 = vld [vmem:[#allocation2 + $0x370] ss:$20 sps:$4 sm:$0xff]   ;;  %v10500_v29 = vld [vmem:[#allocation2 + $0x378] ss:$20 sps:$4 sm:$0xff]  }
  0x8e   :  { %5386 = vmatprep.subr.bf16.mxu0 %v10410_v32  ;;  %5816 = vmatprep.subr.bf16.mxu1 %v10412_v33  ;;  %v10499_v26 = vld [vmem:[#allocation2 + $0x374] ss:$20 sps:$4 sm:$0xff]   ;;  %v10502_v27 = vld [vmem:[#allocation2 + $0x37c] ss:$20 sps:$4 sm:$0xff]   ;;  %v10508_v32 = vld [vmem:[#allocation2 + $0x3a4] ss:$20 sps:$4 sm:$0xff]  }
  0x8f   :  { %v10559_v30 = vld [vmem:[%s12334_s0 + $0xc] ss:$80 sps:$4 sm:$0xff]   ;;  %vm12004_vm0 = vmmov 0  }
  0x90   :  { %v10505_v31 = vld [vmem:[#allocation2 + $0x39c] ss:$20 sps:$4 sm:$0xff]   ;;  %v10503_v33 = vld [vmem:[#allocation2 + $0x398] ss:$20 sps:$4 sm:$0xff]  }
  0x91   :  { %5387 = vmatpush1.bf16.msra.mxu0 %v10414_v34  ;;  %5817 = vmatpush1.bf16.msra.mxu1 %v10415_v35  ;;  %v10506_v34 = vld [vmem:[#allocation2 + $0x3a0] ss:$20 sps:$4 sm:$0xff]   ;;  %v10511_v35 = vld [vmem:[#allocation2 + $0x3c4] ss:$20 sps:$4 sm:$0xff]   ;;  %v10529_v47 = vld [vmem:[#allocation2 + $0x43c] ss:$20 sps:$4 sm:$0xff]  }
  0x92   :  { %5388 = vmatprep.subr.bf16.mxu0 %v10416_v36  ;;  %5818 = vmatprep.subr.bf16.mxu1 %v10418_v37  ;;  %v10514_v36 = vld [vmem:[#allocation2 + $0x3cc] ss:$20 sps:$4 sm:$0xff]  }
  0x93   :  { %v10509_v37 = vld [vmem:[#allocation2 + $0x3c0] ss:$20 sps:$4 sm:$0xff]  }
  0x95   :  { %5389 = vmatpush1.bf16.msra.mxu0 %v10420_v38  ;;  %5819 = vmatpush1.bf16.msra.mxu1 %v10421_v39  ;;  %v10512_v38 = vld [vmem:[#allocation2 + $0x3c8] ss:$20 sps:$4 sm:$0xff]   ;;  %v10517_v39 = vld [vmem:[#allocation2 + $0x3ec] ss:$20 sps:$4 sm:$0xff]  }
  0x96   :  { %5390 = vmatprep.subr.bf16.mxu0 %v10422_v40  ;;  %5820 = vmatprep.subr.bf16.mxu1 %v10424_v41  ;;  %v10520_v40 = vld [vmem:[#allocation2 + $0x3f4] ss:$20 sps:$4 sm:$0xff]  }
  0x97   :  { %v10515_v41 = vld [vmem:[#allocation2 + $0x3e8] ss:$20 sps:$4 sm:$0xff]  }
  0x99   :  { %5391 = vmatpush1.bf16.msra.mxu0 %v10426_v42  ;;  %5821 = vmatpush1.bf16.msra.mxu1 %v10427_v43  ;;  %v10518_v42 = vld [vmem:[#allocation2 + $0x3f0] ss:$20 sps:$4 sm:$0xff]   ;;  %v10523_v43 = vld [vmem:[#allocation2 + $0x414] ss:$20 sps:$4 sm:$0xff]  }
  0x9a   :  { %5392 = vmatprep.subr.bf16.mxu0 %v10428_v44  ;;  %5822 = vmatprep.subr.bf16.mxu1 %v10430_v45  ;;  %v10526_v44 = vld [vmem:[#allocation2 + $0x41c] ss:$20 sps:$4 sm:$0xff]  }
  0x9b   :  { %v10521_v45 = vld [vmem:[#allocation2 + $0x410] ss:$20 sps:$4 sm:$0xff]  }
  0x9d   :  { %5393 = vmatpush1.bf16.msra.mxu0 %v10432_v46  ;;  %5823 = vmatpush1.bf16.msra.mxu1 %v10433_v48  ;;  %v10524_v46 = vld [vmem:[#allocation2 + $0x418] ss:$20 sps:$4 sm:$0xff]  }
  0x9e   :  { %5394 = vmatprep.subr.bf16.mxu0 %v10434_v49  ;;  %5824 = vmatprep.subr.bf16.mxu1 %v10436_v50  ;;  %v10532_v48 = vld [vmem:[#allocation2 + $0x444] ss:$20 sps:$4 sm:$0xff]   ;;  %v10530_v50 = vld [vmem:[#allocation2 + $0x440] ss:$20 sps:$4 sm:$0xff]  }
  0x9f   :  { %v10527_v49 = vld [vmem:[#allocation2 + $0x438] ss:$20 sps:$4 sm:$0xff]  }
  0xa1   :  { %5395 = vmatpush1.bf16.msra.mxu0 %v10438_v51  ;;  %5825 = vmatpush1.bf16.msra.mxu1 %v10439_v52  ;;  %v10535_v51 = vld [vmem:[#allocation2 + $0x464] ss:$20 sps:$4 sm:$0xff]   ;;  %v10538_v52 = vld [vmem:[#allocation2 + $0x46c] ss:$20 sps:$4 sm:$0xff]  }
  0xa2   :  { %5396 = vmatprep.subr.bf16.mxu0 %v10440_v53  ;;  %5826 = vmatprep.subr.bf16.mxu1 %v10442_v54  ;;  %v10533_v53 = vld [vmem:[#allocation2 + $0x460] ss:$20 sps:$4 sm:$0xff]   ;;  %v10536_v54 = vld [vmem:[#allocation2 + $0x468] ss:$20 sps:$4 sm:$0xff]  }
  0xa5   :  { %5397 = vmatpush1.bf16.msra.mxu0 %v10444_v55  ;;  %5827 = vmatpush1.bf16.msra.mxu1 %v10445_v56  ;;  %v10541_v55 = vld [vmem:[#allocation2 + $0x48c] ss:$20 sps:$4 sm:$0xff]   ;;  %v10544_v56 = vld [vmem:[#allocation2 + $0x494] ss:$20 sps:$4 sm:$0xff]  }
  0xa6   :  { %5398 = vmatprep.subr.bf16.mxu0 %v10446_v57  ;;  %5828 = vmatprep.subr.bf16.mxu1 %v10448_v58  ;;  %v10539_v57 = vld [vmem:[#allocation2 + $0x488] ss:$20 sps:$4 sm:$0xff]   ;;  %v10542_v58 = vld [vmem:[#allocation2 + $0x490] ss:$20 sps:$4 sm:$0xff]  }
  0xa9   :  { %5399 = vmatpush1.bf16.msra.mxu0 %v10450_v59  ;;  %5829 = vmatpush1.bf16.msra.mxu1 %v10451_v60  ;;  %v10547_v59 = vld [vmem:[#allocation2 + $0x4b4] ss:$20 sps:$4 sm:$0xff]   ;;  %v10550_v60 = vld [vmem:[#allocation2 + $0x4bc] ss:$20 sps:$4 sm:$0xff]  }
  0xaa   :  { %5400 = vmatprep.subr.bf16.mxu0 %v10452_v61  ;;  %5830 = vmatprep.subr.bf16.mxu1 %v10454_v62  ;;  %v10545_v61 = vld [vmem:[#allocation2 + $0x4b0] ss:$20 sps:$4 sm:$0xff]   ;;  %v10548_v62 = vld [vmem:[#allocation2 + $0x4b8] ss:$20 sps:$4 sm:$0xff]  }
  0xad   :  { %5401 = vmatpush1.bf16.msra.mxu0 %v10456_v63  ;;  %5831 = vmatpush1.bf16.msra.mxu1 %v10457_v0  ;;  %v10553_v63 = vld [vmem:[#allocation2 + $0x4dc] ss:$20 sps:$4 sm:$0xff]   ;;  %v10556_v0 = vld [vmem:[#allocation2 + $0x4e4] ss:$20 sps:$4 sm:$0xff]  }
  0xae   :  { %5413 = vmatprep.subr.bf16.mxu0 %v10462_v1  ;;  %5843 = vmatprep.subr.bf16.mxu1 %v10465_v2  ;;  %v10551_v1 = vld [vmem:[#allocation2 + $0x4d8] ss:$20 sps:$4 sm:$0xff]   ;;  %v10554_v2 = vld [vmem:[#allocation2 + $0x4e0] ss:$20 sps:$4 sm:$0xff]  }
  0xb0   :  { %5403 = vmatmul.mubr.bf16.vlgmr.msra.gmra.mrb[0].mxu0 %v10466_v5  ;;  %5833 = vmatmul.mubr.bf16.vlgmr.msra.gmra.mrb[0].mxu1 %v10466_v5  ;;  %v10557_v5 = vld [vmem:[%s12334_s0 + $0x8] ss:$80 sps:$4 sm:$0xff]  }
  0xb1   :  { %5414 = vmatpush1.bf16.msra.mxu0 %v10460_v3  ;;  %5844 = vmatpush1.bf16.msra.mxu1 %v10463_v4  ;;  %v10562_v3 = vld [vmem:[#allocation2 + $0x504] ss:$20 sps:$4 sm:$0xff]   ;;  %v10565_v4 = vld [vmem:[#allocation2 + $0x50c] ss:$20 sps:$4 sm:$0xff]  }
  0xb2   :  { %5415 = vmatprep.subr.bf16.mxu0 %v10469_v6  ;;  %5845 = vmatprep.subr.bf16.mxu1 %v10472_v7  ;;  %v10560_v6 = vld [vmem:[#allocation2 + $0x500] ss:$20 sps:$4 sm:$0xff]   ;;  %v10563_v7 = vld [vmem:[#allocation2 + $0x508] ss:$20 sps:$4 sm:$0xff]  }
  0xb3   :  { %5445 = vmatprep.mubr.bf16.mxu0 %v10559_v30  ;;  %5875 = vmatprep.mubr.bf16.mxu1 %v10559_v30  ;;  %v10601_v30 = vld [vmem:[#allocation2 + $0x5fc] ss:$20 sps:$4 sm:$0xff]  }
  0xb5   :  { %5416 = vmatpush1.bf16.msra.mxu0 %v10467_v8  ;;  %5846 = vmatpush1.bf16.msra.mxu1 %v10470_v9  ;;  %v10568_v8 = vld [vmem:[#allocation2 + $0x52c] ss:$20 sps:$4 sm:$0xff]   ;;  %v10571_v9 = vld [vmem:[#allocation2 + $0x534] ss:$20 sps:$4 sm:$0xff]  }
  0xb6   :  { %5417 = vmatprep.subr.bf16.mxu0 %v10475_v10  ;;  %5847 = vmatprep.subr.bf16.mxu1 %v10478_v11  ;;  %v10566_v10 = vld [vmem:[#allocation2 + $0x528] ss:$20 sps:$4 sm:$0xff]   ;;  %v10569_v11 = vld [vmem:[#allocation2 + $0x530] ss:$20 sps:$4 sm:$0xff]  }
  0xb9   :  { %5418 = vmatpush1.bf16.msra.mxu0 %v10473_v12  ;;  %5848 = vmatpush1.bf16.msra.mxu1 %v10476_v13  ;;  %v10658_v12 = vld [vmem:[%s12334_s0 + $0x14] ss:$80 sps:$4 sm:$0xff]  }
  0xba   :  { %5419 = vmatprep.subr.bf16.mxu0 %v10481_v14  ;;  %5849 = vmatprep.subr.bf16.mxu1 %v10484_v15  ;;  %v10574_v13 = vld [vmem:[#allocation2 + $0x554] ss:$20 sps:$4 sm:$0xff]   ;;  %v10577_v14 = vld [vmem:[#allocation2 + $0x55c] ss:$20 sps:$4 sm:$0xff]  }
  0xbb   :  { %v10572_v15 = vld [vmem:[#allocation2 + $0x550] ss:$20 sps:$4 sm:$0xff]  }
  0xbd   :  { %5420 = vmatpush1.bf16.msra.mxu0 %v10479_v16  ;;  %5850 = vmatpush1.bf16.msra.mxu1 %v10482_v17  ;;  %v10575_v16 = vld [vmem:[#allocation2 + $0x558] ss:$20 sps:$4 sm:$0xff]   ;;  %v10580_v17 = vld [vmem:[#allocation2 + $0x57c] ss:$20 sps:$4 sm:$0xff]  }
  0xbe   :  { %5421 = vmatprep.subr.bf16.mxu0 %v10487_v18  ;;  %5851 = vmatprep.subr.bf16.mxu1 %v10490_v19  ;;  %v10583_v18 = vld [vmem:[#allocation2 + $0x584] ss:$20 sps:$4 sm:$0xff]  }
  0xbf   :  { %v10578_v19 = vld [vmem:[#allocation2 + $0x578] ss:$20 sps:$4 sm:$0xff]  }
  0xc1   :  { %5422 = vmatpush1.bf16.msra.mxu0 %v10485_v20  ;;  %5852 = vmatpush1.bf16.msra.mxu1 %v10488_v21  ;;  %v10581_v20 = vld [vmem:[#allocation2 + $0x580] ss:$20 sps:$4 sm:$0xff]   ;;  %v10586_v21 = vld [vmem:[#allocation2 + $0x5a4] ss:$20 sps:$4 sm:$0xff]  }
  0xc2   :  { %5423 = vmatprep.subr.bf16.mxu0 %v10493_v22  ;;  %5853 = vmatprep.subr.bf16.mxu1 %v10496_v23  ;;  %v10589_v22 = vld [vmem:[#allocation2 + $0x5ac] ss:$20 sps:$4 sm:$0xff]  }
  0xc3   :  { %v10584_v23 = vld [vmem:[#allocation2 + $0x5a0] ss:$20 sps:$4 sm:$0xff]  }
  0xc5   :  { %5424 = vmatpush1.bf16.msra.mxu0 %v10491_v24  ;;  %5854 = vmatpush1.bf16.msra.mxu1 %v10494_v25  ;;  %v10587_v24 = vld [vmem:[#allocation2 + $0x5a8] ss:$20 sps:$4 sm:$0xff]   ;;  %v10592_v25 = vld [vmem:[#allocation2 + $0x5cc] ss:$20 sps:$4 sm:$0xff]  }
  0xc6   :  { %5425 = vmatprep.subr.bf16.mxu0 %v10499_v26  ;;  %5855 = vmatprep.subr.bf16.mxu1 %v10502_v27  ;;  %v10595_v26 = vld [vmem:[#allocation2 + $0x5d4] ss:$20 sps:$4 sm:$0xff]  }
  0xc7   :  { %v10590_v27 = vld [vmem:[#allocation2 + $0x5c8] ss:$20 sps:$4 sm:$0xff]  }
  0xc9   :  { %5426 = vmatpush1.bf16.msra.mxu0 %v10497_v28  ;;  %5856 = vmatpush1.bf16.msra.mxu1 %v10500_v29  ;;  %v10593_v28 = vld [vmem:[#allocation2 + $0x5d0] ss:$20 sps:$4 sm:$0xff]   ;;  %v10598_v29 = vld [vmem:[#allocation2 + $0x5f4] ss:$20 sps:$4 sm:$0xff]  }
  0xca   :  { %5427 = vmatprep.subr.bf16.mxu0 %v10505_v31  ;;  %5857 = vmatprep.subr.bf16.mxu1 %v10508_v32  ;;  %v10596_v31 = vld [vmem:[#allocation2 + $0x5f0] ss:$20 sps:$4 sm:$0xff]   ;;  %v10599_v32 = vld [vmem:[#allocation2 + $0x5f8] ss:$20 sps:$4 sm:$0xff]  }
  0xcd   :  { %5428 = vmatpush1.bf16.msra.mxu0 %v10503_v33  ;;  %5858 = vmatpush1.bf16.msra.mxu1 %v10506_v34  ;;  %v10604_v33 = vld [vmem:[#allocation2 + $0x61c] ss:$20 sps:$4 sm:$0xff]   ;;  %v10607_v34 = vld [vmem:[#allocation2 + $0x624] ss:$20 sps:$4 sm:$0xff]  }
  0xce   :  { %5429 = vmatprep.subr.bf16.mxu0 %v10511_v35  ;;  %5859 = vmatprep.subr.bf16.mxu1 %v10514_v36  ;;  %v10602_v35 = vld [vmem:[#allocation2 + $0x618] ss:$20 sps:$4 sm:$0xff]   ;;  %v10605_v36 = vld [vmem:[#allocation2 + $0x620] ss:$20 sps:$4 sm:$0xff]  }
  0xd1   :  { %5430 = vmatpush1.bf16.msra.mxu0 %v10509_v37  ;;  %5860 = vmatpush1.bf16.msra.mxu1 %v10512_v38  ;;  %v10610_v37 = vld [vmem:[#allocation2 + $0x644] ss:$20 sps:$4 sm:$0xff]   ;;  %v10613_v38 = vld [vmem:[#allocation2 + $0x64c] ss:$20 sps:$4 sm:$0xff]  }
  0xd2   :  { %5431 = vmatprep.subr.bf16.mxu0 %v10517_v39  ;;  %5861 = vmatprep.subr.bf16.mxu1 %v10520_v40  ;;  %v10608_v39 = vld [vmem:[#allocation2 + $0x640] ss:$20 sps:$4 sm:$0xff]   ;;  %v10611_v40 = vld [vmem:[#allocation2 + $0x648] ss:$20 sps:$4 sm:$0xff]  }
  0xd5   :  { %5432 = vmatpush1.bf16.msra.mxu0 %v10515_v41  ;;  %5862 = vmatpush1.bf16.msra.mxu1 %v10518_v42  ;;  %v10616_v41 = vld [vmem:[#allocation2 + $0x66c] ss:$20 sps:$4 sm:$0xff]   ;;  %v10619_v42 = vld [vmem:[#allocation2 + $0x674] ss:$20 sps:$4 sm:$0xff]  }
  0xd6   :  { %5433 = vmatprep.subr.bf16.mxu0 %v10523_v43  ;;  %5863 = vmatprep.subr.bf16.mxu1 %v10526_v44  ;;  %v10614_v43 = vld [vmem:[#allocation2 + $0x668] ss:$20 sps:$4 sm:$0xff]   ;;  %v10617_v44 = vld [vmem:[#allocation2 + $0x670] ss:$20 sps:$4 sm:$0xff]  }
  0xd9   :  { %5434 = vmatpush1.bf16.msra.mxu0 %v10521_v45  ;;  %5864 = vmatpush1.bf16.msra.mxu1 %v10524_v46  ;;  %v10622_v45 = vld [vmem:[#allocation2 + $0x694] ss:$20 sps:$4 sm:$0xff]   ;;  %v10625_v46 = vld [vmem:[#allocation2 + $0x69c] ss:$20 sps:$4 sm:$0xff]  }
  0xda   :  { %5435 = vmatprep.subr.bf16.mxu0 %v10529_v47  ;;  %5865 = vmatprep.subr.bf16.mxu1 %v10532_v48  ;;  %v10620_v47 = vld [vmem:[#allocation2 + $0x690] ss:$20 sps:$4 sm:$0xff]   ;;  %v10623_v48 = vld [vmem:[#allocation2 + $0x698] ss:$20 sps:$4 sm:$0xff]  }
  0xdd   :  { %5436 = vmatpush1.bf16.msra.mxu0 %v10527_v49  ;;  %5866 = vmatpush1.bf16.msra.mxu1 %v10530_v50  ;;  %v10628_v49 = vld [vmem:[#allocation2 + $0x6bc] ss:$20 sps:$4 sm:$0xff]   ;;  %v10631_v50 = vld [vmem:[#allocation2 + $0x6c4] ss:$20 sps:$4 sm:$0xff]  }
  0xde   :  { %5437 = vmatprep.subr.bf16.mxu0 %v10535_v51  ;;  %5867 = vmatprep.subr.bf16.mxu1 %v10538_v52  ;;  %v10626_v51 = vld [vmem:[#allocation2 + $0x6b8] ss:$20 sps:$4 sm:$0xff]   ;;  %v10629_v52 = vld [vmem:[#allocation2 + $0x6c0] ss:$20 sps:$4 sm:$0xff]  }
  0xe1   :  { %5438 = vmatpush1.bf16.msra.mxu0 %v10533_v53  ;;  %5868 = vmatpush1.bf16.msra.mxu1 %v10536_v54  ;;  %v10634_v53 = vld [vmem:[#allocation2 + $0x6e4] ss:$20 sps:$4 sm:$0xff]   ;;  %v10637_v54 = vld [vmem:[#allocation2 + $0x6ec] ss:$20 sps:$4 sm:$0xff]  }
  0xe2   :  { %5439 = vmatprep.subr.bf16.mxu0 %v10541_v55  ;;  %5869 = vmatprep.subr.bf16.mxu1 %v10544_v56  ;;  %v10632_v55 = vld [vmem:[#allocation2 + $0x6e0] ss:$20 sps:$4 sm:$0xff]   ;;  %v10635_v56 = vld [vmem:[#allocation2 + $0x6e8] ss:$20 sps:$4 sm:$0xff]  }
  0xe5   :  { %5440 = vmatpush1.bf16.msra.mxu0 %v10539_v57  ;;  %5870 = vmatpush1.bf16.msra.mxu1 %v10542_v58  ;;  %v10640_v57 = vld [vmem:[#allocation2 + $0x70c] ss:$20 sps:$4 sm:$0xff]   ;;  %v10643_v58 = vld [vmem:[#allocation2 + $0x714] ss:$20 sps:$4 sm:$0xff]  }
  0xe6   :  { %5441 = vmatprep.subr.bf16.mxu0 %v10547_v59  ;;  %5871 = vmatprep.subr.bf16.mxu1 %v10550_v60  ;;  %v10638_v59 = vld [vmem:[#allocation2 + $0x708] ss:$20 sps:$4 sm:$0xff]   ;;  %v10641_v60 = vld [vmem:[#allocation2 + $0x710] ss:$20 sps:$4 sm:$0xff]  }
  0xe9   :  { %5442 = vmatpush1.bf16.msra.mxu0 %v10545_v61  ;;  %5872 = vmatpush1.bf16.msra.mxu1 %v10548_v62  ;;  %v10646_v61 = vld [vmem:[#allocation2 + $0x734] ss:$20 sps:$4 sm:$0xff]   ;;  %v10649_v62 = vld [vmem:[#allocation2 + $0x73c] ss:$20 sps:$4 sm:$0xff]  }
  0xea   :  { %5443 = vmatprep.subr.bf16.mxu0 %v10553_v63  ;;  %5873 = vmatprep.subr.bf16.mxu1 %v10556_v0  ;;  %v10644_v63 = vld [vmem:[#allocation2 + $0x730] ss:$20 sps:$4 sm:$0xff]   ;;  %v10647_v0 = vld [vmem:[#allocation2 + $0x738] ss:$20 sps:$4 sm:$0xff]  }
  0xed   :  { %5444 = vmatpush1.bf16.msra.mxu0 %v10551_v1  ;;  %5874 = vmatpush1.bf16.msra.mxu1 %v10554_v2  ;;  %v10652_v1 = vld [vmem:[#allocation2 + $0x75c] ss:$20 sps:$4 sm:$0xff]   ;;  %v10655_v2 = vld [vmem:[#allocation2 + $0x764] ss:$20 sps:$4 sm:$0xff]  }
  0xee   :  { %5456 = vmatprep.subr.bf16.mxu0 %v10562_v3  ;;  %5886 = vmatprep.subr.bf16.mxu1 %v10565_v4  ;;  %v10650_v3 = vld [vmem:[#allocation2 + $0x758] ss:$20 sps:$4 sm:$0xff]   ;;  %v10653_v4 = vld [vmem:[#allocation2 + $0x760] ss:$20 sps:$4 sm:$0xff]  }
  0xf0   :  { %5446 = vmatmul.mubr.bf16.vlgmr.msra.gmra.mrb[0].mxu0 %v10557_v5  ;;  %5876 = vmatmul.mubr.bf16.vlgmr.msra.gmra.mrb[0].mxu1 %v10557_v5  ;;  %v10661_v5 = vld [vmem:[#allocation2 + $0x784] ss:$20 sps:$4 sm:$0xff]  }
  0xf1   :  { %5457 = vmatpush1.bf16.msra.mxu0 %v10560_v6  ;;  %5887 = vmatpush1.bf16.msra.mxu1 %v10563_v7  ;;  %v10664_v6 = vld [vmem:[#allocation2 + $0x78c] ss:$20 sps:$4 sm:$0xff]  }
  0xf2   :  { %5458 = vmatprep.subr.bf16.mxu0 %v10568_v8  ;;  %5888 = vmatprep.subr.bf16.mxu1 %v10571_v9  ;;  %v10656_v7 = vld [vmem:[%s12334_s0 + $0x10] ss:$80 sps:$4 sm:$0xff]   ;;  %v10662_v9 = vld [vmem:[#allocation2 + $0x788] ss:$20 sps:$4 sm:$0xff]  }
  0xf3   :  { %5488 = vmatprep.mubr.bf16.mxu0 %v10658_v12  ;;  %5918 = vmatprep.mubr.bf16.mxu1 %v10658_v12  ;;  %v10659_v8 = vld [vmem:[#allocation2 + $0x780] ss:$20 sps:$4 sm:$0xff]   ;;  %v10757_v12 = vld [vmem:[%s12334_s0 + $0x1c] ss:$80 sps:$4 sm:$0xff]  }
  0xf5   :  { %5459 = vmatpush1.bf16.msra.mxu0 %v10566_v10  ;;  %5889 = vmatpush1.bf16.msra.mxu1 %v10569_v11  ;;  %v10667_v10 = vld [vmem:[#allocation2 + $0x7ac] ss:$20 sps:$4 sm:$0xff]   ;;  %v10670_v11 = vld [vmem:[#allocation2 + $0x7b4] ss:$20 sps:$4 sm:$0xff]  }
  0xf6   :  { %5460 = vmatprep.subr.bf16.mxu0 %v10574_v13  ;;  %5890 = vmatprep.subr.bf16.mxu1 %v10577_v14  ;;  %v10665_v13 = vld [vmem:[#allocation2 + $0x7a8] ss:$20 sps:$4 sm:$0xff]   ;;  %v10668_v14 = vld [vmem:[#allocation2 + $0x7b0] ss:$20 sps:$4 sm:$0xff]  }
  0xf9   :  { %5461 = vmatpush1.bf16.msra.mxu0 %v10572_v15  ;;  %5891 = vmatpush1.bf16.msra.mxu1 %v10575_v16  ;;  %v10673_v15 = vld [vmem:[#allocation2 + $0x7d4] ss:$20 sps:$4 sm:$0xff]   ;;  %v10676_v16 = vld [vmem:[#allocation2 + $0x7dc] ss:$20 sps:$4 sm:$0xff]  }
  0xfa   :  { %5462 = vmatprep.subr.bf16.mxu0 %v10580_v17  ;;  %5892 = vmatprep.subr.bf16.mxu1 %v10583_v18  ;;  %v10671_v17 = vld [vmem:[#allocation2 + $0x7d0] ss:$20 sps:$4 sm:$0xff]   ;;  %v10674_v18 = vld [vmem:[#allocation2 + $0x7d8] ss:$20 sps:$4 sm:$0xff]  }
  0xfd   :  { %5463 = vmatpush1.bf16.msra.mxu0 %v10578_v19  ;;  %5893 = vmatpush1.bf16.msra.mxu1 %v10581_v20  ;;  %v10679_v19 = vld [vmem:[#allocation2 + $0x7fc] ss:$20 sps:$4 sm:$0xff]   ;;  %v10682_v20 = vld [vmem:[#allocation2 + $0x804] ss:$20 sps:$4 sm:$0xff]  }
  0xfe   :  { %5464 = vmatprep.subr.bf16.mxu0 %v10586_v21  ;;  %5894 = vmatprep.subr.bf16.mxu1 %v10589_v22  ;;  %v10677_v21 = vld [vmem:[#allocation2 + $0x7f8] ss:$20 sps:$4 sm:$0xff]   ;;  %v10680_v22 = vld [vmem:[#allocation2 + $0x800] ss:$20 sps:$4 sm:$0xff]  }
 0x101   :  { %5465 = vmatpush1.bf16.msra.mxu0 %v10584_v23  ;;  %5895 = vmatpush1.bf16.msra.mxu1 %v10587_v24  ;;  %v10685_v23 = vld [vmem:[#allocation2 + $0x824] ss:$20 sps:$4 sm:$0xff]   ;;  %v10688_v24 = vld [vmem:[#allocation2 + $0x82c] ss:$20 sps:$4 sm:$0xff]  }
 0x102   :  { %5466 = vmatprep.subr.bf16.mxu0 %v10592_v25  ;;  %5896 = vmatprep.subr.bf16.mxu1 %v10595_v26  ;;  %v10683_v25 = vld [vmem:[#allocation2 + $0x820] ss:$20 sps:$4 sm:$0xff]   ;;  %v10686_v26 = vld [vmem:[#allocation2 + $0x828] ss:$20 sps:$4 sm:$0xff]  }
 0x105   :  { %5467 = vmatpush1.bf16.msra.mxu0 %v10590_v27  ;;  %5897 = vmatpush1.bf16.msra.mxu1 %v10593_v28  ;;  %v10691_v27 = vld [vmem:[#allocation2 + $0x84c] ss:$20 sps:$4 sm:$0xff]   ;;  %v10694_v28 = vld [vmem:[#allocation2 + $0x854] ss:$20 sps:$4 sm:$0xff]  }
 0x106   :  { %5468 = vmatprep.subr.bf16.mxu0 %v10598_v29  ;;  %5898 = vmatprep.subr.bf16.mxu1 %v10601_v30  ;;  %v10689_v29 = vld [vmem:[#allocation2 + $0x848] ss:$20 sps:$4 sm:$0xff]   ;;  %v10692_v30 = vld [vmem:[#allocation2 + $0x850] ss:$20 sps:$4 sm:$0xff]  }
 0x109   :  { %5469 = vmatpush1.bf16.msra.mxu0 %v10596_v31  ;;  %5899 = vmatpush1.bf16.msra.mxu1 %v10599_v32  ;;  %v10697_v31 = vld [vmem:[#allocation2 + $0x874] ss:$20 sps:$4 sm:$0xff]   ;;  %v10700_v32 = vld [vmem:[#allocation2 + $0x87c] ss:$20 sps:$4 sm:$0xff]  }
 0x10a   :  { %5470 = vmatprep.subr.bf16.mxu0 %v10604_v33  ;;  %5900 = vmatprep.subr.bf16.mxu1 %v10607_v34  ;;  %v10695_v33 = vld [vmem:[#allocation2 + $0x870] ss:$20 sps:$4 sm:$0xff]   ;;  %v10698_v34 = vld [vmem:[#allocation2 + $0x878] ss:$20 sps:$4 sm:$0xff]  }
 0x10d   :  { %5471 = vmatpush1.bf16.msra.mxu0 %v10602_v35  ;;  %5901 = vmatpush1.bf16.msra.mxu1 %v10605_v36  ;;  %v10703_v35 = vld [vmem:[#allocation2 + $0x89c] ss:$20 sps:$4 sm:$0xff]   ;;  %v10706_v36 = vld [vmem:[#allocation2 + $0x8a4] ss:$20 sps:$4 sm:$0xff]  }
 0x10e   :  { %5472 = vmatprep.subr.bf16.mxu0 %v10610_v37  ;;  %5902 = vmatprep.subr.bf16.mxu1 %v10613_v38  ;;  %v10701_v37 = vld [vmem:[#allocation2 + $0x898] ss:$20 sps:$4 sm:$0xff]   ;;  %v10704_v38 = vld [vmem:[#allocation2 + $0x8a0] ss:$20 sps:$4 sm:$0xff]  }
 0x111   :  { %5473 = vmatpush1.bf16.msra.mxu0 %v10608_v39  ;;  %5903 = vmatpush1.bf16.msra.mxu1 %v10611_v40  ;;  %v10709_v39 = vld [vmem:[#allocation2 + $0x8c4] ss:$20 sps:$4 sm:$0xff]   ;;  %v10712_v40 = vld [vmem:[#allocation2 + $0x8cc] ss:$20 sps:$4 sm:$0xff]  }
 0x112   :  { %5474 = vmatprep.subr.bf16.mxu0 %v10616_v41  ;;  %5904 = vmatprep.subr.bf16.mxu1 %v10619_v42  ;;  %v10707_v41 = vld [vmem:[#allocation2 + $0x8c0] ss:$20 sps:$4 sm:$0xff]   ;;  %v10710_v42 = vld [vmem:[#allocation2 + $0x8c8] ss:$20 sps:$4 sm:$0xff]  }
 0x115   :  { %5475 = vmatpush1.bf16.msra.mxu0 %v10614_v43  ;;  %5905 = vmatpush1.bf16.msra.mxu1 %v10617_v44  ;;  %v10715_v43 = vld [vmem:[#allocation2 + $0x8ec] ss:$20 sps:$4 sm:$0xff]   ;;  %v10718_v44 = vld [vmem:[#allocation2 + $0x8f4] ss:$20 sps:$4 sm:$0xff]  }
 0x116   :  { %5476 = vmatprep.subr.bf16.mxu0 %v10622_v45  ;;  %5906 = vmatprep.subr.bf16.mxu1 %v10625_v46  ;;  %v10713_v45 = vld [vmem:[#allocation2 + $0x8e8] ss:$20 sps:$4 sm:$0xff]   ;;  %v10716_v46 = vld [vmem:[#allocation2 + $0x8f0] ss:$20 sps:$4 sm:$0xff]  }
 0x119   :  { %5477 = vmatpush1.bf16.msra.mxu0 %v10620_v47  ;;  %5907 = vmatpush1.bf16.msra.mxu1 %v10623_v48  ;;  %v10721_v47 = vld [vmem:[#allocation2 + $0x914] ss:$20 sps:$4 sm:$0xff]   ;;  %v10724_v48 = vld [vmem:[#allocation2 + $0x91c] ss:$20 sps:$4 sm:$0xff]  }
 0x11a   :  { %5478 = vmatprep.subr.bf16.mxu0 %v10628_v49  ;;  %5908 = vmatprep.subr.bf16.mxu1 %v10631_v50  ;;  %v10719_v49 = vld [vmem:[#allocation2 + $0x910] ss:$20 sps:$4 sm:$0xff]   ;;  %v10722_v50 = vld [vmem:[#allocation2 + $0x918] ss:$20 sps:$4 sm:$0xff]  }
 0x11d   :  { %5479 = vmatpush1.bf16.msra.mxu0 %v10626_v51  ;;  %5909 = vmatpush1.bf16.msra.mxu1 %v10629_v52  ;;  %v10727_v51 = vld [vmem:[#allocation2 + $0x93c] ss:$20 sps:$4 sm:$0xff]   ;;  %v10730_v52 = vld [vmem:[#allocation2 + $0x944] ss:$20 sps:$4 sm:$0xff]  }
 0x11e   :  { %5480 = vmatprep.subr.bf16.mxu0 %v10634_v53  ;;  %5910 = vmatprep.subr.bf16.mxu1 %v10637_v54  ;;  %v10725_v53 = vld [vmem:[#allocation2 + $0x938] ss:$20 sps:$4 sm:$0xff]   ;;  %v10728_v54 = vld [vmem:[#allocation2 + $0x940] ss:$20 sps:$4 sm:$0xff]  }
 0x121   :  { %5481 = vmatpush1.bf16.msra.mxu0 %v10632_v55  ;;  %5911 = vmatpush1.bf16.msra.mxu1 %v10635_v56  ;;  %v10733_v55 = vld [vmem:[#allocation2 + $0x964] ss:$20 sps:$4 sm:$0xff]   ;;  %v10736_v56 = vld [vmem:[#allocation2 + $0x96c] ss:$20 sps:$4 sm:$0xff]  }
 0x122   :  { %5482 = vmatprep.subr.bf16.mxu0 %v10640_v57  ;;  %5912 = vmatprep.subr.bf16.mxu1 %v10643_v58  ;;  %v10731_v57 = vld [vmem:[#allocation2 + $0x960] ss:$20 sps:$4 sm:$0xff]   ;;  %v10734_v58 = vld [vmem:[#allocation2 + $0x968] ss:$20 sps:$4 sm:$0xff]  }
 0x125   :  { %5483 = vmatpush1.bf16.msra.mxu0 %v10638_v59  ;;  %5913 = vmatpush1.bf16.msra.mxu1 %v10641_v60  ;;  %v10739_v59 = vld [vmem:[#allocation2 + $0x98c] ss:$20 sps:$4 sm:$0xff]   ;;  %v10742_v60 = vld [vmem:[#allocation2 + $0x994] ss:$20 sps:$4 sm:$0xff]  }
 0x126   :  { %5484 = vmatprep.subr.bf16.mxu0 %v10646_v61  ;;  %5914 = vmatprep.subr.bf16.mxu1 %v10649_v62  ;;  %v10737_v61 = vld [vmem:[#allocation2 + $0x988] ss:$20 sps:$4 sm:$0xff]   ;;  %v10740_v62 = vld [vmem:[#allocation2 + $0x990] ss:$20 sps:$4 sm:$0xff]  }
 0x129   :  { %5485 = vmatpush1.bf16.msra.mxu0 %v10644_v63  ;;  %5915 = vmatpush1.bf16.msra.mxu1 %v10647_v0  ;;  %v10745_v63 = vld [vmem:[#allocation2 + $0x9b4] ss:$20 sps:$4 sm:$0xff]   ;;  %v10748_v0 = vld [vmem:[#allocation2 + $0x9bc] ss:$20 sps:$4 sm:$0xff]  }
 0x12a   :  { %5486 = vmatprep.subr.bf16.mxu0 %v10652_v1  ;;  %5916 = vmatprep.subr.bf16.mxu1 %v10655_v2  ;;  %v10743_v1 = vld [vmem:[#allocation2 + $0x9b0] ss:$20 sps:$4 sm:$0xff]   ;;  %v10746_v2 = vld [vmem:[#allocation2 + $0x9b8] ss:$20 sps:$4 sm:$0xff]  }
 0x12d   :  { %5487 = vmatpush1.bf16.msra.mxu0 %v10650_v3  ;;  %5917 = vmatpush1.bf16.msra.mxu1 %v10653_v4  ;;  %v10751_v3 = vld [vmem:[#allocation2 + $0x9dc] ss:$20 sps:$4 sm:$0xff]   ;;  %v10754_v4 = vld [vmem:[#allocation2 + $0x9e4] ss:$20 sps:$4 sm:$0xff]  }
 0x12e   :  { %5499 = vmatprep.subr.bf16.mxu0 %v10661_v5  ;;  %5929 = vmatprep.subr.bf16.mxu1 %v10664_v6  ;;  %v10749_v5 = vld [vmem:[#allocation2 + $0x9d8] ss:$20 sps:$4 sm:$0xff]   ;;  %v10752_v6 = vld [vmem:[#allocation2 + $0x9e0] ss:$20 sps:$4 sm:$0xff]  }
 0x130   :  { %5489 = vmatmul.mubr.bf16.vlgmr.msra.gmra.mrb[0].mxu0 %v10656_v7  ;;  %5919 = vmatmul.mubr.bf16.vlgmr.msra.gmra.mrb[0].mxu1 %v10656_v7  ;;  %v10760_v7 = vld [vmem:[#allocation2 + $0xa04] ss:$20 sps:$4 sm:$0xff]  }
 0x131   :  { %5500 = vmatpush1.bf16.msra.mxu0 %v10659_v8  ;;  %5930 = vmatpush1.bf16.msra.mxu1 %v10662_v9  ;;  %v10763_v8 = vld [vmem:[#allocation2 + $0xa0c] ss:$20 sps:$4 sm:$0xff]   ;;  %v10755_v9 = vld [vmem:[%s12334_s0 + $0x18] ss:$80 sps:$4 sm:$0xff]  }
 0x132   :  { %5501 = vmatprep.subr.bf16.mxu0 %v10667_v10  ;;  %5931 = vmatprep.subr.bf16.mxu1 %v10670_v11  ;;  %v10758_v10 = vld [vmem:[#allocation2 + $0xa00] ss:$20 sps:$4 sm:$0xff]   ;;  %v10761_v11 = vld [vmem:[#allocation2 + $0xa08] ss:$20 sps:$4 sm:$0xff]  }
 0x133   :  { %5531 = vmatprep.mubr.bf16.mxu0 %v10757_v12  ;;  %5961 = vmatprep.mubr.bf16.mxu1 %v10757_v12  ;;  %v10766_v12 = vld [vmem:[#allocation2 + $0xa2c] ss:$20 sps:$4 sm:$0xff]  }
 0x135   :  { %5502 = vmatpush1.bf16.msra.mxu0 %v10665_v13  ;;  %5932 = vmatpush1.bf16.msra.mxu1 %v10668_v14  ;;  %v10769_v13 = vld [vmem:[#allocation2 + $0xa34] ss:$20 sps:$4 sm:$0xff]  }
 0x136   :  { %5503 = vmatprep.subr.bf16.mxu0 %v10673_v15  ;;  %5933 = vmatprep.subr.bf16.mxu1 %v10676_v16  ;;  %v10856_v14 = vld [vmem:[%s12334_s0 + $0x24] ss:$80 sps:$4 sm:$0xff]   ;;  %v10764_v15 = vld [vmem:[#allocation2 + $0xa28] ss:$20 sps:$4 sm:$0xff]  }
 0x137   :  { %v10767_v16 = vld [vmem:[#allocation2 + $0xa30] ss:$20 sps:$4 sm:$0xff]  }
 0x139   :  { %5504 = vmatpush1.bf16.msra.mxu0 %v10671_v17  ;;  %5934 = vmatpush1.bf16.msra.mxu1 %v10674_v18  ;;  %v10772_v17 = vld [vmem:[#allocation2 + $0xa54] ss:$20 sps:$4 sm:$0xff]   ;;  %v10775_v18 = vld [vmem:[#allocation2 + $0xa5c] ss:$20 sps:$4 sm:$0xff]  }
 0x13a   :  { %5505 = vmatprep.subr.bf16.mxu0 %v10679_v19  ;;  %5935 = vmatprep.subr.bf16.mxu1 %v10682_v20  ;;  %v10770_v19 = vld [vmem:[#allocation2 + $0xa50] ss:$20 sps:$4 sm:$0xff]   ;;  %v10773_v20 = vld [vmem:[#allocation2 + $0xa58] ss:$20 sps:$4 sm:$0xff]  }
 0x13d   :  { %5506 = vmatpush1.bf16.msra.mxu0 %v10677_v21  ;;  %5936 = vmatpush1.bf16.msra.mxu1 %v10680_v22  ;;  %v10778_v21 = vld [vmem:[#allocation2 + $0xa7c] ss:$20 sps:$4 sm:$0xff]   ;;  %v10781_v22 = vld [vmem:[#allocation2 + $0xa84] ss:$20 sps:$4 sm:$0xff]  }
 0x13e   :  { %5507 = vmatprep.subr.bf16.mxu0 %v10685_v23  ;;  %5937 = vmatprep.subr.bf16.mxu1 %v10688_v24  ;;  %v10776_v23 = vld [vmem:[#allocation2 + $0xa78] ss:$20 sps:$4 sm:$0xff]   ;;  %v10779_v24 = vld [vmem:[#allocation2 + $0xa80] ss:$20 sps:$4 sm:$0xff]  }
 0x141   :  { %5508 = vmatpush1.bf16.msra.mxu0 %v10683_v25  ;;  %5938 = vmatpush1.bf16.msra.mxu1 %v10686_v26  ;;  %v10784_v25 = vld [vmem:[#allocation2 + $0xaa4] ss:$20 sps:$4 sm:$0xff]   ;;  %v10787_v26 = vld [vmem:[#allocation2 + $0xaac] ss:$20 sps:$4 sm:$0xff]  }
 0x142   :  { %5509 = vmatprep.subr.bf16.mxu0 %v10691_v27  ;;  %5939 = vmatprep.subr.bf16.mxu1 %v10694_v28  ;;  %v10782_v27 = vld [vmem:[#allocation2 + $0xaa0] ss:$20 sps:$4 sm:$0xff]   ;;  %v10785_v28 = vld [vmem:[#allocation2 + $0xaa8] ss:$20 sps:$4 sm:$0xff]  }
 0x145   :  { %5510 = vmatpush1.bf16.msra.mxu0 %v10689_v29  ;;  %5940 = vmatpush1.bf16.msra.mxu1 %v10692_v30  ;;  %v10790_v29 = vld [vmem:[#allocation2 + $0xacc] ss:$20 sps:$4 sm:$0xff]   ;;  %v10793_v30 = vld [vmem:[#allocation2 + $0xad4] ss:$20 sps:$4 sm:$0xff]  }
 0x146   :  { %5511 = vmatprep.subr.bf16.mxu0 %v10697_v31  ;;  %5941 = vmatprep.subr.bf16.mxu1 %v10700_v32  ;;  %v10788_v31 = vld [vmem:[#allocation2 + $0xac8] ss:$20 sps:$4 sm:$0xff]   ;;  %v10791_v32 = vld [vmem:[#allocation2 + $0xad0] ss:$20 sps:$4 sm:$0xff]  }
 0x149   :  { %5512 = vmatpush1.bf16.msra.mxu0 %v10695_v33  ;;  %5942 = vmatpush1.bf16.msra.mxu1 %v10698_v34  ;;  %v10796_v33 = vld [vmem:[#allocation2 + $0xaf4] ss:$20 sps:$4 sm:$0xff]   ;;  %v10799_v34 = vld [vmem:[#allocation2 + $0xafc] ss:$20 sps:$4 sm:$0xff]  }
 0x14a   :  { %5513 = vmatprep.subr.bf16.mxu0 %v10703_v35  ;;  %5943 = vmatprep.subr.bf16.mxu1 %v10706_v36  ;;  %v10794_v35 = vld [vmem:[#allocation2 + $0xaf0] ss:$20 sps:$4 sm:$0xff]   ;;  %v10797_v36 = vld [vmem:[#allocation2 + $0xaf8] ss:$20 sps:$4 sm:$0xff]  }
 0x14d   :  { %5514 = vmatpush1.bf16.msra.mxu0 %v10701_v37  ;;  %5944 = vmatpush1.bf16.msra.mxu1 %v10704_v38  ;;  %v10802_v37 = vld [vmem:[#allocation2 + $0xb1c] ss:$20 sps:$4 sm:$0xff]   ;;  %v10805_v38 = vld [vmem:[#allocation2 + $0xb24] ss:$20 sps:$4 sm:$0xff]  }
 0x14e   :  { %5515 = vmatprep.subr.bf16.mxu0 %v10709_v39  ;;  %5945 = vmatprep.subr.bf16.mxu1 %v10712_v40  ;;  %v10800_v39 = vld [vmem:[#allocation2 + $0xb18] ss:$20 sps:$4 sm:$0xff]   ;;  %v10803_v40 = vld [vmem:[#allocation2 + $0xb20] ss:$20 sps:$4 sm:$0xff]  }
 0x151   :  { %5516 = vmatpush1.bf16.msra.mxu0 %v10707_v41  ;;  %5946 = vmatpush1.bf16.msra.mxu1 %v10710_v42  ;;  %v10808_v41 = vld [vmem:[#allocation2 + $0xb44] ss:$20 sps:$4 sm:$0xff]   ;;  %v10811_v42 = vld [vmem:[#allocation2 + $0xb4c] ss:$20 sps:$4 sm:$0xff]  }
 0x152   :  { %5517 = vmatprep.subr.bf16.mxu0 %v10715_v43  ;;  %5947 = vmatprep.subr.bf16.mxu1 %v10718_v44  ;;  %v10806_v43 = vld [vmem:[#allocation2 + $0xb40] ss:$20 sps:$4 sm:$0xff]   ;;  %v10809_v44 = vld [vmem:[#allocation2 + $0xb48] ss:$20 sps:$4 sm:$0xff]  }
 0x155   :  { %5518 = vmatpush1.bf16.msra.mxu0 %v10713_v45  ;;  %5948 = vmatpush1.bf16.msra.mxu1 %v10716_v46  ;;  %v10814_v45 = vld [vmem:[#allocation2 + $0xb6c] ss:$20 sps:$4 sm:$0xff]   ;;  %v10817_v46 = vld [vmem:[#allocation2 + $0xb74] ss:$20 sps:$4 sm:$0xff]  }
 0x156   :  { %5519 = vmatprep.subr.bf16.mxu0 %v10721_v47  ;;  %5949 = vmatprep.subr.bf16.mxu1 %v10724_v48  ;;  %v10812_v47 = vld [vmem:[#allocation2 + $0xb68] ss:$20 sps:$4 sm:$0xff]   ;;  %v10815_v48 = vld [vmem:[#allocation2 + $0xb70] ss:$20 sps:$4 sm:$0xff]  }
 0x159   :  { %5520 = vmatpush1.bf16.msra.mxu0 %v10719_v49  ;;  %5950 = vmatpush1.bf16.msra.mxu1 %v10722_v50  ;;  %v10820_v49 = vld [vmem:[#allocation2 + $0xb94] ss:$20 sps:$4 sm:$0xff]   ;;  %v10823_v50 = vld [vmem:[#allocation2 + $0xb9c] ss:$20 sps:$4 sm:$0xff]  }
 0x15a   :  { %5521 = vmatprep.subr.bf16.mxu0 %v10727_v51  ;;  %5951 = vmatprep.subr.bf16.mxu1 %v10730_v52  ;;  %v10818_v51 = vld [vmem:[#allocation2 + $0xb90] ss:$20 sps:$4 sm:$0xff]   ;;  %v10821_v52 = vld [vmem:[#allocation2 + $0xb98] ss:$20 sps:$4 sm:$0xff]  }
 0x15d   :  { %5522 = vmatpush1.bf16.msra.mxu0 %v10725_v53  ;;  %5952 = vmatpush1.bf16.msra.mxu1 %v10728_v54  ;;  %v10826_v53 = vld [vmem:[#allocation2 + $0xbbc] ss:$20 sps:$4 sm:$0xff]   ;;  %v10829_v54 = vld [vmem:[#allocation2 + $0xbc4] ss:$20 sps:$4 sm:$0xff]  }
 0x15e   :  { %5523 = vmatprep.subr.bf16.mxu0 %v10733_v55  ;;  %5953 = vmatprep.subr.bf16.mxu1 %v10736_v56  ;;  %v10824_v55 = vld [vmem:[#allocation2 + $0xbb8] ss:$20 sps:$4 sm:$0xff]   ;;  %v10827_v56 = vld [vmem:[#allocation2 + $0xbc0] ss:$20 sps:$4 sm:$0xff]  }
 0x161   :  { %5524 = vmatpush1.bf16.msra.mxu0 %v10731_v57  ;;  %5954 = vmatpush1.bf16.msra.mxu1 %v10734_v58  ;;  %v10832_v57 = vld [vmem:[#allocation2 + $0xbe4] ss:$20 sps:$4 sm:$0xff]   ;;  %v10835_v58 = vld [vmem:[#allocation2 + $0xbec] ss:$20 sps:$4 sm:$0xff]  }
 0x162   :  { %5525 = vmatprep.subr.bf16.mxu0 %v10739_v59  ;;  %5955 = vmatprep.subr.bf16.mxu1 %v10742_v60  ;;  %v10830_v59 = vld [vmem:[#allocation2 + $0xbe0] ss:$20 sps:$4 sm:$0xff]   ;;  %v10833_v60 = vld [vmem:[#allocation2 + $0xbe8] ss:$20 sps:$4 sm:$0xff]  }
 0x165   :  { %5526 = vmatpush1.bf16.msra.mxu0 %v10737_v61  ;;  %5956 = vmatpush1.bf16.msra.mxu1 %v10740_v62  ;;  %v10838_v61 = vld [vmem:[#allocation2 + $0xc0c] ss:$20 sps:$4 sm:$0xff]   ;;  %v10841_v62 = vld [vmem:[#allocation2 + $0xc14] ss:$20 sps:$4 sm:$0xff]  }
 0x166   :  { %5527 = vmatprep.subr.bf16.mxu0 %v10745_v63  ;;  %5957 = vmatprep.subr.bf16.mxu1 %v10748_v0  ;;  %v10836_v63 = vld [vmem:[#allocation2 + $0xc08] ss:$20 sps:$4 sm:$0xff]   ;;  %v10839_v0 = vld [vmem:[#allocation2 + $0xc10] ss:$20 sps:$4 sm:$0xff]  }
 0x169   :  { %5528 = vmatpush1.bf16.msra.mxu0 %v10743_v1  ;;  %5958 = vmatpush1.bf16.msra.mxu1 %v10746_v2  ;;  %v10844_v1 = vld [vmem:[#allocation2 + $0xc34] ss:$20 sps:$4 sm:$0xff]   ;;  %v10847_v2 = vld [vmem:[#allocation2 + $0xc3c] ss:$20 sps:$4 sm:$0xff]  }
 0x16a   :  { %5529 = vmatprep.subr.bf16.mxu0 %v10751_v3  ;;  %5959 = vmatprep.subr.bf16.mxu1 %v10754_v4  ;;  %v10842_v3 = vld [vmem:[#allocation2 + $0xc30] ss:$20 sps:$4 sm:$0xff]   ;;  %v10845_v4 = vld [vmem:[#allocation2 + $0xc38] ss:$20 sps:$4 sm:$0xff]  }
 0x16d   :  { %5530 = vmatpush1.bf16.msra.mxu0 %v10749_v5  ;;  %5960 = vmatpush1.bf16.msra.mxu1 %v10752_v6  ;;  %v10850_v5 = vld [vmem:[#allocation2 + $0xc5c] ss:$20 sps:$4 sm:$0xff]   ;;  %v10853_v6 = vld [vmem:[#allocation2 + $0xc64] ss:$20 sps:$4 sm:$0xff]  }
 0x16e   :  { %5542 = vmatprep.subr.bf16.mxu0 %v10760_v7  ;;  %5972 = vmatprep.subr.bf16.mxu1 %v10763_v8  ;;  %v10848_v7 = vld [vmem:[#allocation2 + $0xc58] ss:$20 sps:$4 sm:$0xff]   ;;  %v10851_v8 = vld [vmem:[#allocation2 + $0xc60] ss:$20 sps:$4 sm:$0xff]  }
 0x170   :  { %5532 = vmatmul.mubr.bf16.vlgmr.msra.gmra.mrb[0].mxu0 %v10755_v9  ;;  %5962 = vmatmul.mubr.bf16.vlgmr.msra.gmra.mrb[0].mxu1 %v10755_v9  ;;  %v10854_v9 = vld [vmem:[%s12334_s0 + $0x20] ss:$80 sps:$4 sm:$0xff]  }
 0x171   :  { %5543 = vmatpush1.bf16.msra.mxu0 %v10758_v10  ;;  %5973 = vmatpush1.bf16.msra.mxu1 %v10761_v11  ;;  %v10859_v10 = vld [vmem:[#allocation2 + $0xc84] ss:$20 sps:$4 sm:$0xff]   ;;  %v10862_v11 = vld [vmem:[#allocation2 + $0xc8c] ss:$20 sps:$4 sm:$0xff]  }
 0x172   :  { %5544 = vmatprep.subr.bf16.mxu0 %v10766_v12  ;;  %5974 = vmatprep.subr.bf16.mxu1 %v10769_v13  ;;  %v10857_v12 = vld [vmem:[#allocation2 + $0xc80] ss:$20 sps:$4 sm:$0xff]   ;;  %v10860_v13 = vld [vmem:[#allocation2 + $0xc88] ss:$20 sps:$4 sm:$0xff]  }
 0x173   :  { %5574 = vmatprep.mubr.bf16.mxu0 %v10856_v14  ;;  %6004 = vmatprep.mubr.bf16.mxu1 %v10856_v14  ;;  %v10865_v14 = vld [vmem:[#allocation2 + $0xcac] ss:$20 sps:$4 sm:$0xff]  }
 0x175   :  { %5545 = vmatpush1.bf16.msra.mxu0 %v10764_v15  ;;  %5975 = vmatpush1.bf16.msra.mxu1 %v10767_v16  ;;  %v10868_v15 = vld [vmem:[#allocation2 + $0xcb4] ss:$20 sps:$4 sm:$0xff]   ;;  %v10955_v16 = vld [vmem:[%s12334_s0 + $0x2c] ss:$80 sps:$4 sm:$0xff]  }
 0x176   :  { %5546 = vmatprep.subr.bf16.mxu0 %v10772_v17  ;;  %5976 = vmatprep.subr.bf16.mxu1 %v10775_v18  ;;  %v10863_v17 = vld [vmem:[#allocation2 + $0xca8] ss:$20 sps:$4 sm:$0xff]   ;;  %v10866_v18 = vld [vmem:[#allocation2 + $0xcb0] ss:$20 sps:$4 sm:$0xff]  }
 0x179   :  { %5547 = vmatpush1.bf16.msra.mxu0 %v10770_v19  ;;  %5977 = vmatpush1.bf16.msra.mxu1 %v10773_v20  ;;  %v10871_v19 = vld [vmem:[#allocation2 + $0xcd4] ss:$20 sps:$4 sm:$0xff]   ;;  %v10874_v20 = vld [vmem:[#allocation2 + $0xcdc] ss:$20 sps:$4 sm:$0xff]  }
 0x17a   :  { %5548 = vmatprep.subr.bf16.mxu0 %v10778_v21  ;;  %5978 = vmatprep.subr.bf16.mxu1 %v10781_v22  ;;  %v10869_v21 = vld [vmem:[#allocation2 + $0xcd0] ss:$20 sps:$4 sm:$0xff]   ;;  %v10872_v22 = vld [vmem:[#allocation2 + $0xcd8] ss:$20 sps:$4 sm:$0xff]  }
 0x17d   :  { %5549 = vmatpush1.bf16.msra.mxu0 %v10776_v23  ;;  %5979 = vmatpush1.bf16.msra.mxu1 %v10779_v24  ;;  %v10877_v23 = vld [vmem:[#allocation2 + $0xcfc] ss:$20 sps:$4 sm:$0xff]   ;;  %v10880_v24 = vld [vmem:[#allocation2 + $0xd04] ss:$20 sps:$4 sm:$0xff]  }
 0x17e   :  { %5550 = vmatprep.subr.bf16.mxu0 %v10784_v25  ;;  %5980 = vmatprep.subr.bf16.mxu1 %v10787_v26  ;;  %v10875_v25 = vld [vmem:[#allocation2 + $0xcf8] ss:$20 sps:$4 sm:$0xff]   ;;  %v10878_v26 = vld [vmem:[#allocation2 + $0xd00] ss:$20 sps:$4 sm:$0xff]  }
 0x181   :  { %5551 = vmatpush1.bf16.msra.mxu0 %v10782_v27  ;;  %5981 = vmatpush1.bf16.msra.mxu1 %v10785_v28  ;;  %v10883_v27 = vld [vmem:[#allocation2 + $0xd24] ss:$20 sps:$4 sm:$0xff]   ;;  %v10886_v28 = vld [vmem:[#allocation2 + $0xd2c] ss:$20 sps:$4 sm:$0xff]  }
 0x182   :  { %5552 = vmatprep.subr.bf16.mxu0 %v10790_v29  ;;  %5982 = vmatprep.subr.bf16.mxu1 %v10793_v30  ;;  %v10881_v29 = vld [vmem:[#allocation2 + $0xd20] ss:$20 sps:$4 sm:$0xff]   ;;  %v10884_v30 = vld [vmem:[#allocation2 + $0xd28] ss:$20 sps:$4 sm:$0xff]  }
 0x185   :  { %5553 = vmatpush1.bf16.msra.mxu0 %v10788_v31  ;;  %5983 = vmatpush1.bf16.msra.mxu1 %v10791_v32  ;;  %v10889_v31 = vld [vmem:[#allocation2 + $0xd4c] ss:$20 sps:$4 sm:$0xff]   ;;  %v10892_v32 = vld [vmem:[#allocation2 + $0xd54] ss:$20 sps:$4 sm:$0xff]  }
 0x186   :  { %5554 = vmatprep.subr.bf16.mxu0 %v10796_v33  ;;  %5984 = vmatprep.subr.bf16.mxu1 %v10799_v34  ;;  %v10887_v33 = vld [vmem:[#allocation2 + $0xd48] ss:$20 sps:$4 sm:$0xff]   ;;  %v10890_v34 = vld [vmem:[#allocation2 + $0xd50] ss:$20 sps:$4 sm:$0xff]  }
 0x189   :  { %5555 = vmatpush1.bf16.msra.mxu0 %v10794_v35  ;;  %5985 = vmatpush1.bf16.msra.mxu1 %v10797_v36  ;;  %v10895_v35 = vld [vmem:[#allocation2 + $0xd74] ss:$20 sps:$4 sm:$0xff]   ;;  %v10898_v36 = vld [vmem:[#allocation2 + $0xd7c] ss:$20 sps:$4 sm:$0xff]  }
 0x18a   :  { %5556 = vmatprep.subr.bf16.mxu0 %v10802_v37  ;;  %5986 = vmatprep.subr.bf16.mxu1 %v10805_v38  ;;  %v10893_v37 = vld [vmem:[#allocation2 + $0xd70] ss:$20 sps:$4 sm:$0xff]   ;;  %v10896_v38 = vld [vmem:[#allocation2 + $0xd78] ss:$20 sps:$4 sm:$0xff]  }
 0x18d   :  { %5557 = vmatpush1.bf16.msra.mxu0 %v10800_v39  ;;  %5987 = vmatpush1.bf16.msra.mxu1 %v10803_v40  ;;  %v10901_v39 = vld [vmem:[#allocation2 + $0xd9c] ss:$20 sps:$4 sm:$0xff]   ;;  %v10904_v40 = vld [vmem:[#allocation2 + $0xda4] ss:$20 sps:$4 sm:$0xff]  }
 0x18e   :  { %5558 = vmatprep.subr.bf16.mxu0 %v10808_v41  ;;  %5988 = vmatprep.subr.bf16.mxu1 %v10811_v42  ;;  %v10899_v41 = vld [vmem:[#allocation2 + $0xd98] ss:$20 sps:$4 sm:$0xff]   ;;  %v10902_v42 = vld [vmem:[#allocation2 + $0xda0] ss:$20 sps:$4 sm:$0xff]  }
 0x191   :  { %5559 = vmatpush1.bf16.msra.mxu0 %v10806_v43  ;;  %5989 = vmatpush1.bf16.msra.mxu1 %v10809_v44  ;;  %v10907_v43 = vld [vmem:[#allocation2 + $0xdc4] ss:$20 sps:$4 sm:$0xff]   ;;  %v10910_v44 = vld [vmem:[#allocation2 + $0xdcc] ss:$20 sps:$4 sm:$0xff]  }
 0x192   :  { %5560 = vmatprep.subr.bf16.mxu0 %v10814_v45  ;;  %5990 = vmatprep.subr.bf16.mxu1 %v10817_v46  ;;  %v10905_v45 = vld [vmem:[#allocation2 + $0xdc0] ss:$20 sps:$4 sm:$0xff]   ;;  %v10908_v46 = vld [vmem:[#allocation2 + $0xdc8] ss:$20 sps:$4 sm:$0xff]  }
 0x195   :  { %5561 = vmatpush1.bf16.msra.mxu0 %v10812_v47  ;;  %5991 = vmatpush1.bf16.msra.mxu1 %v10815_v48  ;;  %v10913_v47 = vld [vmem:[#allocation2 + $0xdec] ss:$20 sps:$4 sm:$0xff]   ;;  %v10916_v48 = vld [vmem:[#allocation2 + $0xdf4] ss:$20 sps:$4 sm:$0xff]  }
 0x196   :  { %5562 = vmatprep.subr.bf16.mxu0 %v10820_v49  ;;  %5992 = vmatprep.subr.bf16.mxu1 %v10823_v50  ;;  %v10911_v49 = vld [vmem:[#allocation2 + $0xde8] ss:$20 sps:$4 sm:$0xff]   ;;  %v10914_v50 = vld [vmem:[#allocation2 + $0xdf0] ss:$20 sps:$4 sm:$0xff]  }
 0x199   :  { %5563 = vmatpush1.bf16.msra.mxu0 %v10818_v51  ;;  %5993 = vmatpush1.bf16.msra.mxu1 %v10821_v52  ;;  %v10919_v51 = vld [vmem:[#allocation2 + $0xe14] ss:$20 sps:$4 sm:$0xff]   ;;  %v10922_v52 = vld [vmem:[#allocation2 + $0xe1c] ss:$20 sps:$4 sm:$0xff]  }
 0x19a   :  { %5564 = vmatprep.subr.bf16.mxu0 %v10826_v53  ;;  %5994 = vmatprep.subr.bf16.mxu1 %v10829_v54  ;;  %v10917_v53 = vld [vmem:[#allocation2 + $0xe10] ss:$20 sps:$4 sm:$0xff]   ;;  %v10920_v54 = vld [vmem:[#allocation2 + $0xe18] ss:$20 sps:$4 sm:$0xff]  }
 0x19d   :  { %5565 = vmatpush1.bf16.msra.mxu0 %v10824_v55  ;;  %5995 = vmatpush1.bf16.msra.mxu1 %v10827_v56  ;;  %v10925_v55 = vld [vmem:[#allocation2 + $0xe3c] ss:$20 sps:$4 sm:$0xff]   ;;  %v10928_v56 = vld [vmem:[#allocation2 + $0xe44] ss:$20 sps:$4 sm:$0xff]  }
 0x19e   :  { %5566 = vmatprep.subr.bf16.mxu0 %v10832_v57  ;;  %5996 = vmatprep.subr.bf16.mxu1 %v10835_v58  ;;  %v10923_v57 = vld [vmem:[#allocation2 + $0xe38] ss:$20 sps:$4 sm:$0xff]   ;;  %v10926_v58 = vld [vmem:[#allocation2 + $0xe40] ss:$20 sps:$4 sm:$0xff]  }
 0x1a1   :  { %5567 = vmatpush1.bf16.msra.mxu0 %v10830_v59  ;;  %5997 = vmatpush1.bf16.msra.mxu1 %v10833_v60  ;;  %v10931_v59 = vld [vmem:[#allocation2 + $0xe64] ss:$20 sps:$4 sm:$0xff]   ;;  %v10934_v60 = vld [vmem:[#allocation2 + $0xe6c] ss:$20 sps:$4 sm:$0xff]  }
 0x1a2   :  { %5568 = vmatprep.subr.bf16.mxu0 %v10838_v61  ;;  %5998 = vmatprep.subr.bf16.mxu1 %v10841_v62  ;;  %v10929_v61 = vld [vmem:[#allocation2 + $0xe60] ss:$20 sps:$4 sm:$0xff]   ;;  %v10932_v62 = vld [vmem:[#allocation2 + $0xe68] ss:$20 sps:$4 sm:$0xff]  }
 0x1a5   :  { %5569 = vmatpush1.bf16.msra.mxu0 %v10836_v63  ;;  %5999 = vmatpush1.bf16.msra.mxu1 %v10839_v0  ;;  %v10937_v63 = vld [vmem:[#allocation2 + $0xe8c] ss:$20 sps:$4 sm:$0xff]   ;;  %v10940_v0 = vld [vmem:[#allocation2 + $0xe94] ss:$20 sps:$4 sm:$0xff]  }
 0x1a6   :  { %5570 = vmatprep.subr.bf16.mxu0 %v10844_v1  ;;  %6000 = vmatprep.subr.bf16.mxu1 %v10847_v2  ;;  %v10935_v1 = vld [vmem:[#allocation2 + $0xe88] ss:$20 sps:$4 sm:$0xff]   ;;  %v10938_v2 = vld [vmem:[#allocation2 + $0xe90] ss:$20 sps:$4 sm:$0xff]  }
 0x1a9   :  { %5571 = vmatpush1.bf16.msra.mxu0 %v10842_v3  ;;  %6001 = vmatpush1.bf16.msra.mxu1 %v10845_v4  ;;  %v10943_v3 = vld [vmem:[#allocation2 + $0xeb4] ss:$20 sps:$4 sm:$0xff]   ;;  %v10946_v4 = vld [vmem:[#allocation2 + $0xebc] ss:$20 sps:$4 sm:$0xff]  }
 0x1aa   :  { %5572 = vmatprep.subr.bf16.mxu0 %v10850_v5  ;;  %6002 = vmatprep.subr.bf16.mxu1 %v10853_v6  ;;  %v10941_v5 = vld [vmem:[#allocation2 + $0xeb0] ss:$20 sps:$4 sm:$0xff]   ;;  %v10944_v6 = vld [vmem:[#allocation2 + $0xeb8] ss:$20 sps:$4 sm:$0xff]  }
 0x1ad   :  { %5573 = vmatpush1.bf16.msra.mxu0 %v10848_v7  ;;  %6003 = vmatpush1.bf16.msra.mxu1 %v10851_v8  ;;  %v10949_v7 = vld [vmem:[#allocation2 + $0xedc] ss:$20 sps:$4 sm:$0xff]   ;;  %v10952_v8 = vld [vmem:[#allocation2 + $0xee4] ss:$20 sps:$4 sm:$0xff]  }
 0x1ae   :  { %5585 = vmatprep.subr.bf16.mxu0 %v10859_v10  ;;  %6015 = vmatprep.subr.bf16.mxu1 %v10862_v11  ;;  %v10950_v10 = vld [vmem:[#allocation2 + $0xee0] ss:$20 sps:$4 sm:$0xff]   ;;  %v10953_v11 = vld [vmem:[%s12334_s0 + $0x28] ss:$80 sps:$4 sm:$0xff]  }
 0x1b0   :  { %5575 = vmatmul.mubr.bf16.vlgmr.msra.gmra.mrb[0].mxu0 %v10854_v9  ;;  %6005 = vmatmul.mubr.bf16.vlgmr.msra.gmra.mrb[0].mxu1 %v10854_v9  ;;  %v10947_v9 = vld [vmem:[#allocation2 + $0xed8] ss:$20 sps:$4 sm:$0xff]  }
 0x1b1   :  { %5586 = vmatpush1.bf16.msra.mxu0 %v10857_v12  ;;  %6016 = vmatpush1.bf16.msra.mxu1 %v10860_v13  ;;  %v10958_v12 = vld [vmem:[#allocation2 + $0xf04] ss:$20 sps:$4 sm:$0xff]   ;;  %v10961_v13 = vld [vmem:[#allocation2 + $0xf0c] ss:$20 sps:$4 sm:$0xff]  }
 0x1b2   :  { %5587 = vmatprep.subr.bf16.mxu0 %v10865_v14  ;;  %6017 = vmatprep.subr.bf16.mxu1 %v10868_v15  ;;  %v10956_v14 = vld [vmem:[#allocation2 + $0xf00] ss:$20 sps:$4 sm:$0xff]   ;;  %v10959_v15 = vld [vmem:[#allocation2 + $0xf08] ss:$20 sps:$4 sm:$0xff]  }
 0x1b3   :  { %5617 = vmatprep.mubr.bf16.mxu0 %v10955_v16  ;;  %6047 = vmatprep.mubr.bf16.mxu1 %v10955_v16  ;;  %v10964_v16 = vld [vmem:[#allocation2 + $0xf2c] ss:$20 sps:$4 sm:$0xff]  }
 0x1b5   :  { %5588 = vmatpush1.bf16.msra.mxu0 %v10863_v17  ;;  %6018 = vmatpush1.bf16.msra.mxu1 %v10866_v18  ;;  %v10967_v17 = vld [vmem:[#allocation2 + $0xf34] ss:$20 sps:$4 sm:$0xff]  }
 0x1b6   :  { %5589 = vmatprep.subr.bf16.mxu0 %v10871_v19  ;;  %6019 = vmatprep.subr.bf16.mxu1 %v10874_v20  ;;  %v11054_v18 = vld [vmem:[%s12334_s0 + $0x34] ss:$80 sps:$4 sm:$0xff]   ;;  %v10962_v19 = vld [vmem:[#allocation2 + $0xf28] ss:$20 sps:$4 sm:$0xff]  }
 0x1b7   :  { %v10965_v20 = vld [vmem:[#allocation2 + $0xf30] ss:$20 sps:$4 sm:$0xff]  }
 0x1b9   :  { %5590 = vmatpush1.bf16.msra.mxu0 %v10869_v21  ;;  %6020 = vmatpush1.bf16.msra.mxu1 %v10872_v22  ;;  %v10970_v21 = vld [vmem:[#allocation2 + $0xf54] ss:$20 sps:$4 sm:$0xff]   ;;  %v10973_v22 = vld [vmem:[#allocation2 + $0xf5c] ss:$20 sps:$4 sm:$0xff]  }
 0x1ba   :  { %5591 = vmatprep.subr.bf16.mxu0 %v10877_v23  ;;  %6021 = vmatprep.subr.bf16.mxu1 %v10880_v24  ;;  %v10968_v23 = vld [vmem:[#allocation2 + $0xf50] ss:$20 sps:$4 sm:$0xff]   ;;  %v10971_v24 = vld [vmem:[#allocation2 + $0xf58] ss:$20 sps:$4 sm:$0xff]  }
 0x1bd   :  { %5592 = vmatpush1.bf16.msra.mxu0 %v10875_v25  ;;  %6022 = vmatpush1.bf16.msra.mxu1 %v10878_v26  ;;  %v10976_v25 = vld [vmem:[#allocation2 + $0xf7c] ss:$20 sps:$4 sm:$0xff]   ;;  %v10979_v26 = vld [vmem:[#allocation2 + $0xf84] ss:$20 sps:$4 sm:$0xff]  }
 0x1be   :  { %5593 = vmatprep.subr.bf16.mxu0 %v10883_v27  ;;  %6023 = vmatprep.subr.bf16.mxu1 %v10886_v28  ;;  %v10974_v27 = vld [vmem:[#allocation2 + $0xf78] ss:$20 sps:$4 sm:$0xff]   ;;  %v10977_v28 = vld [vmem:[#allocation2 + $0xf80] ss:$20 sps:$4 sm:$0xff]  }
 0x1c1   :  { %5594 = vmatpush1.bf16.msra.mxu0 %v10881_v29  ;;  %6024 = vmatpush1.bf16.msra.mxu1 %v10884_v30  ;;  %v10982_v29 = vld [vmem:[#allocation2 + $0xfa4] ss:$20 sps:$4 sm:$0xff]   ;;  %v10985_v30 = vld [vmem:[#allocation2 + $0xfac] ss:$20 sps:$4 sm:$0xff]  }
 0x1c2   :  { %5595 = vmatprep.subr.bf16.mxu0 %v10889_v31  ;;  %6025 = vmatprep.subr.bf16.mxu1 %v10892_v32  ;;  %v10980_v31 = vld [vmem:[#allocation2 + $0xfa0] ss:$20 sps:$4 sm:$0xff]   ;;  %v10983_v32 = vld [vmem:[#allocation2 + $0xfa8] ss:$20 sps:$4 sm:$0xff]  }
 0x1c5   :  { %5596 = vmatpush1.bf16.msra.mxu0 %v10887_v33  ;;  %6026 = vmatpush1.bf16.msra.mxu1 %v10890_v34  ;;  %v10988_v33 = vld [vmem:[#allocation2 + $0xfcc] ss:$20 sps:$4 sm:$0xff]   ;;  %v10991_v34 = vld [vmem:[#allocation2 + $0xfd4] ss:$20 sps:$4 sm:$0xff]  }
 0x1c6   :  { %5597 = vmatprep.subr.bf16.mxu0 %v10895_v35  ;;  %6027 = vmatprep.subr.bf16.mxu1 %v10898_v36  ;;  %v10986_v35 = vld [vmem:[#allocation2 + $0xfc8] ss:$20 sps:$4 sm:$0xff]   ;;  %v10989_v36 = vld [vmem:[#allocation2 + $0xfd0] ss:$20 sps:$4 sm:$0xff]  }
 0x1c9   :  { %5598 = vmatpush1.bf16.msra.mxu0 %v10893_v37  ;;  %6028 = vmatpush1.bf16.msra.mxu1 %v10896_v38  ;;  %v10994_v37 = vld [vmem:[#allocation2 + $0xff4] ss:$20 sps:$4 sm:$0xff]   ;;  %v10997_v38 = vld [vmem:[#allocation2 + $0xffc] ss:$20 sps:$4 sm:$0xff]  }
 0x1ca   :  { %5599 = vmatprep.subr.bf16.mxu0 %v10901_v39  ;;  %6029 = vmatprep.subr.bf16.mxu1 %v10904_v40  ;;  %v10992_v39 = vld [vmem:[#allocation2 + $0xff0] ss:$20 sps:$4 sm:$0xff]   ;;  %v10995_v40 = vld [vmem:[#allocation2 + $0xff8] ss:$20 sps:$4 sm:$0xff]  }
 0x1cd   :  { %5600 = vmatpush1.bf16.msra.mxu0 %v10899_v41  ;;  %6030 = vmatpush1.bf16.msra.mxu1 %v10902_v42  ;;  %v11000_v41 = vld [vmem:[#allocation2 + $0x101c] ss:$20 sps:$4 sm:$0xff]   ;;  %v11003_v42 = vld [vmem:[#allocation2 + $0x1024] ss:$20 sps:$4 sm:$0xff]  }
 0x1ce   :  { %5601 = vmatprep.subr.bf16.mxu0 %v10907_v43  ;;  %6031 = vmatprep.subr.bf16.mxu1 %v10910_v44  ;;  %v10998_v43 = vld [vmem:[#allocation2 + $0x1018] ss:$20 sps:$4 sm:$0xff]   ;;  %v11001_v44 = vld [vmem:[#allocation2 + $0x1020] ss:$20 sps:$4 sm:$0xff]  }
 0x1d1   :  { %5602 = vmatpush1.bf16.msra.mxu0 %v10905_v45  ;;  %6032 = vmatpush1.bf16.msra.mxu1 %v10908_v46  ;;  %v11006_v45 = vld [vmem:[#allocation2 + $0x1044] ss:$20 sps:$4 sm:$0xff]   ;;  %v11009_v46 = vld [vmem:[#allocation2 + $0x104c] ss:$20 sps:$4 sm:$0xff]  }
 0x1d2   :  { %5603 = vmatprep.subr.bf16.mxu0 %v10913_v47  ;;  %6033 = vmatprep.subr.bf16.mxu1 %v10916_v48  ;;  %v11004_v47 = vld [vmem:[#allocation2 + $0x1040] ss:$20 sps:$4 sm:$0xff]   ;;  %v11007_v48 = vld [vmem:[#allocation2 + $0x1048] ss:$20 sps:$4 sm:$0xff]  }
 0x1d5   :  { %5604 = vmatpush1.bf16.msra.mxu0 %v10911_v49  ;;  %6034 = vmatpush1.bf16.msra.mxu1 %v10914_v50  ;;  %v11012_v49 = vld [vmem:[#allocation2 + $0x106c] ss:$20 sps:$4 sm:$0xff]   ;;  %v11015_v50 = vld [vmem:[#allocation2 + $0x1074] ss:$20 sps:$4 sm:$0xff]  }
 0x1d6   :  { %5605 = vmatprep.subr.bf16.mxu0 %v10919_v51  ;;  %6035 = vmatprep.subr.bf16.mxu1 %v10922_v52  ;;  %v11010_v51 = vld [vmem:[#allocation2 + $0x1068] ss:$20 sps:$4 sm:$0xff]   ;;  %v11013_v52 = vld [vmem:[#allocation2 + $0x1070] ss:$20 sps:$4 sm:$0xff]  }
 0x1d9   :  { %5606 = vmatpush1.bf16.msra.mxu0 %v10917_v53  ;;  %6036 = vmatpush1.bf16.msra.mxu1 %v10920_v54  ;;  %v11018_v53 = vld [vmem:[#allocation2 + $0x1094] ss:$20 sps:$4 sm:$0xff]   ;;  %v11021_v54 = vld [vmem:[#allocation2 + $0x109c] ss:$20 sps:$4 sm:$0xff]  }
 0x1da   :  { %5607 = vmatprep.subr.bf16.mxu0 %v10925_v55  ;;  %6037 = vmatprep.subr.bf16.mxu1 %v10928_v56  ;;  %v11016_v55 = vld [vmem:[#allocation2 + $0x1090] ss:$20 sps:$4 sm:$0xff]   ;;  %v11019_v56 = vld [vmem:[#allocation2 + $0x1098] ss:$20 sps:$4 sm:$0xff]  }
 0x1dd   :  { %5608 = vmatpush1.bf16.msra.mxu0 %v10923_v57  ;;  %6038 = vmatpush1.bf16.msra.mxu1 %v10926_v58  ;;  %v11024_v57 = vld [vmem:[#allocation2 + $0x10bc] ss:$20 sps:$4 sm:$0xff]   ;;  %v11027_v58 = vld [vmem:[#allocation2 + $0x10c4] ss:$20 sps:$4 sm:$0xff]  }
 0x1de   :  { %5609 = vmatprep.subr.bf16.mxu0 %v10931_v59  ;;  %6039 = vmatprep.subr.bf16.mxu1 %v10934_v60  ;;  %v11022_v59 = vld [vmem:[#allocation2 + $0x10b8] ss:$20 sps:$4 sm:$0xff]   ;;  %v11025_v60 = vld [vmem:[#allocation2 + $0x10c0] ss:$20 sps:$4 sm:$0xff]  }
 0x1e1   :  { %5610 = vmatpush1.bf16.msra.mxu0 %v10929_v61  ;;  %6040 = vmatpush1.bf16.msra.mxu1 %v10932_v62  ;;  %v11030_v61 = vld [vmem:[#allocation2 + $0x10e4] ss:$20 sps:$4 sm:$0xff]   ;;  %v11033_v62 = vld [vmem:[#allocation2 + $0x10ec] ss:$20 sps:$4 sm:$0xff]  }
 0x1e2   :  { %5611 = vmatprep.subr.bf16.mxu0 %v10937_v63  ;;  %6041 = vmatprep.subr.bf16.mxu1 %v10940_v0  ;;  %v11028_v63 = vld [vmem:[#allocation2 + $0x10e0] ss:$20 sps:$4 sm:$0xff]   ;;  %v11031_v0 = vld [vmem:[#allocation2 + $0x10e8] ss:$20 sps:$4 sm:$0xff]  }
 0x1e5   :  { %5612 = vmatpush1.bf16.msra.mxu0 %v10935_v1  ;;  %6042 = vmatpush1.bf16.msra.mxu1 %v10938_v2  ;;  %v11036_v1 = vld [vmem:[#allocation2 + $0x110c] ss:$20 sps:$4 sm:$0xff]   ;;  %v11039_v2 = vld [vmem:[#allocation2 + $0x1114] ss:$20 sps:$4 sm:$0xff]  }
 0x1e6   :  { %5613 = vmatprep.subr.bf16.mxu0 %v10943_v3  ;;  %6043 = vmatprep.subr.bf16.mxu1 %v10946_v4  ;;  %v11034_v3 = vld [vmem:[#allocation2 + $0x1108] ss:$20 sps:$4 sm:$0xff]   ;;  %v11037_v4 = vld [vmem:[#allocation2 + $0x1110] ss:$20 sps:$4 sm:$0xff]  }
 0x1e9   :  { %5614 = vmatpush1.bf16.msra.mxu0 %v10941_v5  ;;  %6044 = vmatpush1.bf16.msra.mxu1 %v10944_v6  ;;  %v11042_v5 = vld [vmem:[#allocation2 + $0x1134] ss:$20 sps:$4 sm:$0xff]   ;;  %v11045_v6 = vld [vmem:[#allocation2 + $0x113c] ss:$20 sps:$4 sm:$0xff]  }
 0x1ea   :  { %5615 = vmatprep.subr.bf16.mxu0 %v10949_v7  ;;  %6045 = vmatprep.subr.bf16.mxu1 %v10952_v8  ;;  %v11040_v7 = vld [vmem:[#allocation2 + $0x1130] ss:$20 sps:$4 sm:$0xff]   ;;  %v11043_v8 = vld [vmem:[#allocation2 + $0x1138] ss:$20 sps:$4 sm:$0xff]  }
 0x1ed   :  { %5616 = vmatpush1.bf16.msra.mxu0 %v10947_v9  ;;  %6046 = vmatpush1.bf16.msra.mxu1 %v10950_v10  ;;  %v11048_v9 = vld [vmem:[#allocation2 + $0x115c] ss:$20 sps:$4 sm:$0xff]   ;;  %v11051_v10 = vld [vmem:[#allocation2 + $0x1164] ss:$20 sps:$4 sm:$0xff]  }
 0x1ee   :  { %5628 = vmatprep.subr.bf16.mxu0 %v10958_v12  ;;  %6058 = vmatprep.subr.bf16.mxu1 %v10961_v13  ;;  %v11049_v12 = vld [vmem:[#allocation2 + $0x1160] ss:$20 sps:$4 sm:$0xff]  }
 0x1ef   :  { %v11052_v13 = vld [vmem:[%s12334_s0 + $0x30] ss:$80 sps:$4 sm:$0xff]  }
 0x1f0   :  { %5618 = vmatmul.mubr.bf16.vlgmr.msra.gmra.mrb[0].mxu0 %v10953_v11  ;;  %6048 = vmatmul.mubr.bf16.vlgmr.msra.gmra.mrb[0].mxu1 %v10953_v11  ;;  %v11046_v11 = vld [vmem:[#allocation2 + $0x1158] ss:$20 sps:$4 sm:$0xff]  }
 0x1f1   :  { %5629 = vmatpush1.bf16.msra.mxu0 %v10956_v14  ;;  %6059 = vmatpush1.bf16.msra.mxu1 %v10959_v15  ;;  %v11057_v14 = vld [vmem:[#allocation2 + $0x1184] ss:$20 sps:$4 sm:$0xff]   ;;  %v11060_v15 = vld [vmem:[#allocation2 + $0x118c] ss:$20 sps:$4 sm:$0xff]  }
 0x1f2   :  { %5630 = vmatprep.subr.bf16.mxu0 %v10964_v16  ;;  %6060 = vmatprep.subr.bf16.mxu1 %v10967_v17  ;;  %v11055_v16 = vld [vmem:[#allocation2 + $0x1180] ss:$20 sps:$4 sm:$0xff]   ;;  %v11058_v17 = vld [vmem:[#allocation2 + $0x1188] ss:$20 sps:$4 sm:$0xff]  }
 0x1f3   :  { %5660 = vmatprep.mubr.bf16.mxu0 %v11054_v18  ;;  %6090 = vmatprep.mubr.bf16.mxu1 %v11054_v18  ;;  %v11063_v18 = vld [vmem:[#allocation2 + $0x11ac] ss:$20 sps:$4 sm:$0xff]  }
 0x1f5   :  { %5631 = vmatpush1.bf16.msra.mxu0 %v10962_v19  ;;  %6061 = vmatpush1.bf16.msra.mxu1 %v10965_v20  ;;  %v11066_v19 = vld [vmem:[#allocation2 + $0x11b4] ss:$20 sps:$4 sm:$0xff]   ;;  %v11153_v20 = vld [vmem:[%s12334_s0 + $0x3c] ss:$80 sps:$4 sm:$0xff]  }
 0x1f6   :  { %5632 = vmatprep.subr.bf16.mxu0 %v10970_v21  ;;  %6062 = vmatprep.subr.bf16.mxu1 %v10973_v22  ;;  %v11061_v21 = vld [vmem:[#allocation2 + $0x11a8] ss:$20 sps:$4 sm:$0xff]   ;;  %v11064_v22 = vld [vmem:[#allocation2 + $0x11b0] ss:$20 sps:$4 sm:$0xff]  }
 0x1f9   :  { %5633 = vmatpush1.bf16.msra.mxu0 %v10968_v23  ;;  %6063 = vmatpush1.bf16.msra.mxu1 %v10971_v24  ;;  %v11069_v23 = vld [vmem:[#allocation2 + $0x11d4] ss:$20 sps:$4 sm:$0xff]   ;;  %v11072_v24 = vld [vmem:[#allocation2 + $0x11dc] ss:$20 sps:$4 sm:$0xff]  }
 0x1fa   :  { %5634 = vmatprep.subr.bf16.mxu0 %v10976_v25  ;;  %6064 = vmatprep.subr.bf16.mxu1 %v10979_v26  ;;  %v11067_v25 = vld [vmem:[#allocation2 + $0x11d0] ss:$20 sps:$4 sm:$0xff]   ;;  %v11070_v26 = vld [vmem:[#allocation2 + $0x11d8] ss:$20 sps:$4 sm:$0xff]  }
 0x1fd   :  { %5635 = vmatpush1.bf16.msra.mxu0 %v10974_v27  ;;  %6065 = vmatpush1.bf16.msra.mxu1 %v10977_v28  ;;  %v11075_v27 = vld [vmem:[#allocation2 + $0x11fc] ss:$20 sps:$4 sm:$0xff]   ;;  %v11078_v28 = vld [vmem:[#allocation2 + $0x1204] ss:$20 sps:$4 sm:$0xff]  }
 0x1fe   :  { %5636 = vmatprep.subr.bf16.mxu0 %v10982_v29  ;;  %6066 = vmatprep.subr.bf16.mxu1 %v10985_v30  ;;  %v11073_v29 = vld [vmem:[#allocation2 + $0x11f8] ss:$20 sps:$4 sm:$0xff]   ;;  %v11076_v30 = vld [vmem:[#allocation2 + $0x1200] ss:$20 sps:$4 sm:$0xff]  }
 0x201   :  { %5637 = vmatpush1.bf16.msra.mxu0 %v10980_v31  ;;  %6067 = vmatpush1.bf16.msra.mxu1 %v10983_v32  ;;  %v11081_v31 = vld [vmem:[#allocation2 + $0x1224] ss:$20 sps:$4 sm:$0xff]   ;;  %v11084_v32 = vld [vmem:[#allocation2 + $0x122c] ss:$20 sps:$4 sm:$0xff]  }
 0x202   :  { %5638 = vmatprep.subr.bf16.mxu0 %v10988_v33  ;;  %6068 = vmatprep.subr.bf16.mxu1 %v10991_v34  ;;  %v11079_v33 = vld [vmem:[#allocation2 + $0x1220] ss:$20 sps:$4 sm:$0xff]   ;;  %v11082_v34 = vld [vmem:[#allocation2 + $0x1228] ss:$20 sps:$4 sm:$0xff]  }
 0x205   :  { %5639 = vmatpush1.bf16.msra.mxu0 %v10986_v35  ;;  %6069 = vmatpush1.bf16.msra.mxu1 %v10989_v36  ;;  %v11087_v35 = vld [vmem:[#allocation2 + $0x124c] ss:$20 sps:$4 sm:$0xff]   ;;  %v11090_v36 = vld [vmem:[#allocation2 + $0x1254] ss:$20 sps:$4 sm:$0xff]  }
 0x206   :  { %5640 = vmatprep.subr.bf16.mxu0 %v10994_v37  ;;  %6070 = vmatprep.subr.bf16.mxu1 %v10997_v38  ;;  %v11085_v37 = vld [vmem:[#allocation2 + $0x1248] ss:$20 sps:$4 sm:$0xff]   ;;  %v11088_v38 = vld [vmem:[#allocation2 + $0x1250] ss:$20 sps:$4 sm:$0xff]  }
 0x209   :  { %5641 = vmatpush1.bf16.msra.mxu0 %v10992_v39  ;;  %6071 = vmatpush1.bf16.msra.mxu1 %v10995_v40  ;;  %v11093_v39 = vld [vmem:[#allocation2 + $0x1274] ss:$20 sps:$4 sm:$0xff]   ;;  %v11096_v40 = vld [vmem:[#allocation2 + $0x127c] ss:$20 sps:$4 sm:$0xff]  }
 0x20a   :  { %5642 = vmatprep.subr.bf16.mxu0 %v11000_v41  ;;  %6072 = vmatprep.subr.bf16.mxu1 %v11003_v42  ;;  %v11091_v41 = vld [vmem:[#allocation2 + $0x1270] ss:$20 sps:$4 sm:$0xff]   ;;  %v11094_v42 = vld [vmem:[#allocation2 + $0x1278] ss:$20 sps:$4 sm:$0xff]  }
 0x20d   :  { %5643 = vmatpush1.bf16.msra.mxu0 %v10998_v43  ;;  %6073 = vmatpush1.bf16.msra.mxu1 %v11001_v44  ;;  %v11099_v43 = vld [vmem:[#allocation2 + $0x129c] ss:$20 sps:$4 sm:$0xff]   ;;  %v11102_v44 = vld [vmem:[#allocation2 + $0x12a4] ss:$20 sps:$4 sm:$0xff]  }
 0x20e   :  { %5644 = vmatprep.subr.bf16.mxu0 %v11006_v45  ;;  %6074 = vmatprep.subr.bf16.mxu1 %v11009_v46  ;;  %v11097_v45 = vld [vmem:[#allocation2 + $0x1298] ss:$20 sps:$4 sm:$0xff]   ;;  %v11100_v46 = vld [vmem:[#allocation2 + $0x12a0] ss:$20 sps:$4 sm:$0xff]  }
 0x211   :  { %5645 = vmatpush1.bf16.msra.mxu0 %v11004_v47  ;;  %6075 = vmatpush1.bf16.msra.mxu1 %v11007_v48  ;;  %v11105_v47 = vld [vmem:[#allocation2 + $0x12c4] ss:$20 sps:$4 sm:$0xff]   ;;  %v11108_v48 = vld [vmem:[#allocation2 + $0x12cc] ss:$20 sps:$4 sm:$0xff]  }
 0x212   :  { %5646 = vmatprep.subr.bf16.mxu0 %v11012_v49  ;;  %6076 = vmatprep.subr.bf16.mxu1 %v11015_v50  ;;  %v11103_v49 = vld [vmem:[#allocation2 + $0x12c0] ss:$20 sps:$4 sm:$0xff]   ;;  %v11106_v50 = vld [vmem:[#allocation2 + $0x12c8] ss:$20 sps:$4 sm:$0xff]  }
 0x215   :  { %5647 = vmatpush1.bf16.msra.mxu0 %v11010_v51  ;;  %6077 = vmatpush1.bf16.msra.mxu1 %v11013_v52  ;;  %v11111_v51 = vld [vmem:[#allocation2 + $0x12ec] ss:$20 sps:$4 sm:$0xff]   ;;  %v11114_v52 = vld [vmem:[#allocation2 + $0x12f4] ss:$20 sps:$4 sm:$0xff]  }
 0x216   :  { %5648 = vmatprep.subr.bf16.mxu0 %v11018_v53  ;;  %6078 = vmatprep.subr.bf16.mxu1 %v11021_v54  ;;  %v11109_v53 = vld [vmem:[#allocation2 + $0x12e8] ss:$20 sps:$4 sm:$0xff]   ;;  %v11112_v54 = vld [vmem:[#allocation2 + $0x12f0] ss:$20 sps:$4 sm:$0xff]  }
 0x219   :  { %5649 = vmatpush1.bf16.msra.mxu0 %v11016_v55  ;;  %6079 = vmatpush1.bf16.msra.mxu1 %v11019_v56  ;;  %v11117_v55 = vld [vmem:[#allocation2 + $0x1314] ss:$20 sps:$4 sm:$0xff]   ;;  %v11120_v56 = vld [vmem:[#allocation2 + $0x131c] ss:$20 sps:$4 sm:$0xff]  }
 0x21a   :  { %5650 = vmatprep.subr.bf16.mxu0 %v11024_v57  ;;  %6080 = vmatprep.subr.bf16.mxu1 %v11027_v58  ;;  %v11115_v57 = vld [vmem:[#allocation2 + $0x1310] ss:$20 sps:$4 sm:$0xff]   ;;  %v11118_v58 = vld [vmem:[#allocation2 + $0x1318] ss:$20 sps:$4 sm:$0xff]  }
 0x21d   :  { %5651 = vmatpush1.bf16.msra.mxu0 %v11022_v59  ;;  %6081 = vmatpush1.bf16.msra.mxu1 %v11025_v60  ;;  %v11123_v59 = vld [vmem:[#allocation2 + $0x133c] ss:$20 sps:$4 sm:$0xff]   ;;  %v11126_v60 = vld [vmem:[#allocation2 + $0x1344] ss:$20 sps:$4 sm:$0xff]  }
 0x21e   :  { %5652 = vmatprep.subr.bf16.mxu0 %v11030_v61  ;;  %6082 = vmatprep.subr.bf16.mxu1 %v11033_v62  ;;  %v11121_v61 = vld [vmem:[#allocation2 + $0x1338] ss:$20 sps:$4 sm:$0xff]   ;;  %v11124_v62 = vld [vmem:[#allocation2 + $0x1340] ss:$20 sps:$4 sm:$0xff]  }
 0x221   :  { %5653 = vmatpush1.bf16.msra.mxu0 %v11028_v63  ;;  %6083 = vmatpush1.bf16.msra.mxu1 %v11031_v0  ;;  %v11129_v63 = vld [vmem:[#allocation2 + $0x1364] ss:$20 sps:$4 sm:$0xff]   ;;  %v11132_v0 = vld [vmem:[#allocation2 + $0x136c] ss:$20 sps:$4 sm:$0xff]  }
 0x222   :  { %5654 = vmatprep.subr.bf16.mxu0 %v11036_v1  ;;  %6084 = vmatprep.subr.bf16.mxu1 %v11039_v2  ;;  %v11127_v1 = vld [vmem:[#allocation2 + $0x1360] ss:$20 sps:$4 sm:$0xff]   ;;  %v11130_v2 = vld [vmem:[#allocation2 + $0x1368] ss:$20 sps:$4 sm:$0xff]  }
 0x225   :  { %5655 = vmatpush1.bf16.msra.mxu0 %v11034_v3  ;;  %6085 = vmatpush1.bf16.msra.mxu1 %v11037_v4  ;;  %v11135_v3 = vld [vmem:[#allocation2 + $0x138c] ss:$20 sps:$4 sm:$0xff]   ;;  %v11138_v4 = vld [vmem:[#allocation2 + $0x1394] ss:$20 sps:$4 sm:$0xff]  }
 0x226   :  { %5656 = vmatprep.subr.bf16.mxu0 %v11042_v5  ;;  %6086 = vmatprep.subr.bf16.mxu1 %v11045_v6  ;;  %v11133_v5 = vld [vmem:[#allocation2 + $0x1388] ss:$20 sps:$4 sm:$0xff]   ;;  %v11136_v6 = vld [vmem:[#allocation2 + $0x1390] ss:$20 sps:$4 sm:$0xff]  }
 0x229   :  { %5657 = vmatpush1.bf16.msra.mxu0 %v11040_v7  ;;  %6087 = vmatpush1.bf16.msra.mxu1 %v11043_v8  ;;  %v11141_v7 = vld [vmem:[#allocation2 + $0x13b4] ss:$20 sps:$4 sm:$0xff]   ;;  %v11144_v8 = vld [vmem:[#allocation2 + $0x13bc] ss:$20 sps:$4 sm:$0xff]  }
 0x22a   :  { %5658 = vmatprep.subr.bf16.mxu0 %v11048_v9  ;;  %6088 = vmatprep.subr.bf16.mxu1 %v11051_v10  ;;  %v11139_v9 = vld [vmem:[#allocation2 + $0x13b0] ss:$20 sps:$4 sm:$0xff]   ;;  %v11142_v10 = vld [vmem:[#allocation2 + $0x13b8] ss:$20 sps:$4 sm:$0xff]  }
 0x22d   :  { %5659 = vmatpush1.bf16.msra.mxu0 %v11046_v11  ;;  %6089 = vmatpush1.bf16.msra.mxu1 %v11049_v12  ;;  %v11147_v11 = vld [vmem:[#allocation2 + $0x13dc] ss:$20 sps:$4 sm:$0xff]   ;;  %v11150_v12 = vld [vmem:[#allocation2 + $0x13e4] ss:$20 sps:$4 sm:$0xff]  }
 0x22e   :  { %5671 = vmatprep.subr.bf16.mxu0 %v11057_v14  ;;  %6101 = vmatprep.subr.bf16.mxu1 %v11060_v15  ;;  %v11148_v14 = vld [vmem:[#allocation2 + $0x13e0] ss:$20 sps:$4 sm:$0xff]   ;;  %v11151_v15 = vld [vmem:[%s12334_s0 + $0x38] ss:$80 sps:$4 sm:$0xff]  }
 0x230   :  { %5661 = vmatmul.mubr.bf16.vlgmr.msra.gmra.mrb[0].mxu0 %v11052_v13  ;;  %6091 = vmatmul.mubr.bf16.vlgmr.msra.gmra.mrb[0].mxu1 %v11052_v13  ;;  %v11145_v13 = vld [vmem:[#allocation2 + $0x13d8] ss:$20 sps:$4 sm:$0xff]  }
 0x231   :  { %5672 = vmatpush1.bf16.msra.mxu0 %v11055_v16  ;;  %6102 = vmatpush1.bf16.msra.mxu1 %v11058_v17  ;;  %v11156_v16 = vld [vmem:[#allocation2 + $0x1404] ss:$20 sps:$4 sm:$0xff]   ;;  %v11159_v17 = vld [vmem:[#allocation2 + $0x140c] ss:$20 sps:$4 sm:$0xff]  }
 0x232   :  { %5673 = vmatprep.subr.bf16.mxu0 %v11063_v18  ;;  %6103 = vmatprep.subr.bf16.mxu1 %v11066_v19  ;;  %v11154_v18 = vld [vmem:[#allocation2 + $0x1400] ss:$20 sps:$4 sm:$0xff]   ;;  %v11157_v19 = vld [vmem:[#allocation2 + $0x1408] ss:$20 sps:$4 sm:$0xff]  }
 0x233   :  { %5703 = vmatprep.mubr.bf16.mxu0 %v11153_v20  ;;  %6133 = vmatprep.mubr.bf16.mxu1 %v11153_v20  ;;  %v11162_v20 = vld [vmem:[#allocation2 + $0x142c] ss:$20 sps:$4 sm:$0xff]  }
 0x235   :  { %5674 = vmatpush1.bf16.msra.mxu0 %v11061_v21  ;;  %6104 = vmatpush1.bf16.msra.mxu1 %v11064_v22  ;;  %v11165_v21 = vld [vmem:[#allocation2 + $0x1434] ss:$20 sps:$4 sm:$0xff]  }
 0x236   :  { %5675 = vmatprep.subr.bf16.mxu0 %v11069_v23  ;;  %6105 = vmatprep.subr.bf16.mxu1 %v11072_v24  ;;  %v11160_v22 = vld [vmem:[#allocation2 + $0x1428] ss:$20 sps:$4 sm:$0xff]   ;;  %v11252_v23 = vld [vmem:[%s12334_s0 + $0x44] ss:$80 sps:$4 sm:$0xff]  }
 0x237   :  { %v11163_v24 = vld [vmem:[#allocation2 + $0x1430] ss:$20 sps:$4 sm:$0xff]  }
 0x239   :  { %5676 = vmatpush1.bf16.msra.mxu0 %v11067_v25  ;;  %6106 = vmatpush1.bf16.msra.mxu1 %v11070_v26  ;;  %v11168_v25 = vld [vmem:[#allocation2 + $0x1454] ss:$20 sps:$4 sm:$0xff]   ;;  %v11171_v26 = vld [vmem:[#allocation2 + $0x145c] ss:$20 sps:$4 sm:$0xff]  }
 0x23a   :  { %5677 = vmatprep.subr.bf16.mxu0 %v11075_v27  ;;  %6107 = vmatprep.subr.bf16.mxu1 %v11078_v28  ;;  %v11166_v27 = vld [vmem:[#allocation2 + $0x1450] ss:$20 sps:$4 sm:$0xff]   ;;  %v11169_v28 = vld [vmem:[#allocation2 + $0x1458] ss:$20 sps:$4 sm:$0xff]  }
 0x23d   :  { %5678 = vmatpush1.bf16.msra.mxu0 %v11073_v29  ;;  %6108 = vmatpush1.bf16.msra.mxu1 %v11076_v30  ;;  %v11174_v29 = vld [vmem:[#allocation2 + $0x147c] ss:$20 sps:$4 sm:$0xff]   ;;  %v11177_v30 = vld [vmem:[#allocation2 + $0x1484] ss:$20 sps:$4 sm:$0xff]  }
 0x23e   :  { %5679 = vmatprep.subr.bf16.mxu0 %v11081_v31  ;;  %6109 = vmatprep.subr.bf16.mxu1 %v11084_v32  ;;  %v11172_v31 = vld [vmem:[#allocation2 + $0x1478] ss:$20 sps:$4 sm:$0xff]   ;;  %v11175_v32 = vld [vmem:[#allocation2 + $0x1480] ss:$20 sps:$4 sm:$0xff]  }
 0x241   :  { %5680 = vmatpush1.bf16.msra.mxu0 %v11079_v33  ;;  %6110 = vmatpush1.bf16.msra.mxu1 %v11082_v34  ;;  %v11180_v33 = vld [vmem:[#allocation2 + $0x14a4] ss:$20 sps:$4 sm:$0xff]   ;;  %v11183_v34 = vld [vmem:[#allocation2 + $0x14ac] ss:$20 sps:$4 sm:$0xff]  }
 0x242   :  { %5681 = vmatprep.subr.bf16.mxu0 %v11087_v35  ;;  %6111 = vmatprep.subr.bf16.mxu1 %v11090_v36  ;;  %v11178_v35 = vld [vmem:[#allocation2 + $0x14a0] ss:$20 sps:$4 sm:$0xff]   ;;  %v11181_v36 = vld [vmem:[#allocation2 + $0x14a8] ss:$20 sps:$4 sm:$0xff]  }
 0x245   :  { %5682 = vmatpush1.bf16.msra.mxu0 %v11085_v37  ;;  %6112 = vmatpush1.bf16.msra.mxu1 %v11088_v38  ;;  %v11186_v37 = vld [vmem:[#allocation2 + $0x14cc] ss:$20 sps:$4 sm:$0xff]   ;;  %v11189_v38 = vld [vmem:[#allocation2 + $0x14d4] ss:$20 sps:$4 sm:$0xff]  }
 0x246   :  { %5683 = vmatprep.subr.bf16.mxu0 %v11093_v39  ;;  %6113 = vmatprep.subr.bf16.mxu1 %v11096_v40  ;;  %v11184_v39 = vld [vmem:[#allocation2 + $0x14c8] ss:$20 sps:$4 sm:$0xff]   ;;  %v11187_v40 = vld [vmem:[#allocation2 + $0x14d0] ss:$20 sps:$4 sm:$0xff]  }
 0x249   :  { %5684 = vmatpush1.bf16.msra.mxu0 %v11091_v41  ;;  %6114 = vmatpush1.bf16.msra.mxu1 %v11094_v42  ;;  %v11192_v41 = vld [vmem:[#allocation2 + $0x14f4] ss:$20 sps:$4 sm:$0xff]   ;;  %v11195_v42 = vld [vmem:[#allocation2 + $0x14fc] ss:$20 sps:$4 sm:$0xff]  }
 0x24a   :  { %5685 = vmatprep.subr.bf16.mxu0 %v11099_v43  ;;  %6115 = vmatprep.subr.bf16.mxu1 %v11102_v44  ;;  %v11190_v43 = vld [vmem:[#allocation2 + $0x14f0] ss:$20 sps:$4 sm:$0xff]   ;;  %v11193_v44 = vld [vmem:[#allocation2 + $0x14f8] ss:$20 sps:$4 sm:$0xff]  }
 0x24d   :  { %5686 = vmatpush1.bf16.msra.mxu0 %v11097_v45  ;;  %6116 = vmatpush1.bf16.msra.mxu1 %v11100_v46  ;;  %v11198_v45 = vld [vmem:[#allocation2 + $0x151c] ss:$20 sps:$4 sm:$0xff]   ;;  %v11201_v46 = vld [vmem:[#allocation2 + $0x1524] ss:$20 sps:$4 sm:$0xff]  }
 0x24e   :  { %5687 = vmatprep.subr.bf16.mxu0 %v11105_v47  ;;  %6117 = vmatprep.subr.bf16.mxu1 %v11108_v48  ;;  %v11196_v47 = vld [vmem:[#allocation2 + $0x1518] ss:$20 sps:$4 sm:$0xff]   ;;  %v11199_v48 = vld [vmem:[#allocation2 + $0x1520] ss:$20 sps:$4 sm:$0xff]  }
 0x251   :  { %5688 = vmatpush1.bf16.msra.mxu0 %v11103_v49  ;;  %6118 = vmatpush1.bf16.msra.mxu1 %v11106_v50  ;;  %v11204_v49 = vld [vmem:[#allocation2 + $0x1544] ss:$20 sps:$4 sm:$0xff]   ;;  %v11207_v50 = vld [vmem:[#allocation2 + $0x154c] ss:$20 sps:$4 sm:$0xff]  }
 0x252   :  { %5689 = vmatprep.subr.bf16.mxu0 %v11111_v51  ;;  %6119 = vmatprep.subr.bf16.mxu1 %v11114_v52  ;;  %v11202_v51 = vld [vmem:[#allocation2 + $0x1540] ss:$20 sps:$4 sm:$0xff]   ;;  %v11205_v52 = vld [vmem:[#allocation2 + $0x1548] ss:$20 sps:$4 sm:$0xff]  }
 0x255   :  { %5690 = vmatpush1.bf16.msra.mxu0 %v11109_v53  ;;  %6120 = vmatpush1.bf16.msra.mxu1 %v11112_v54  ;;  %v11210_v53 = vld [vmem:[#allocation2 + $0x156c] ss:$20 sps:$4 sm:$0xff]   ;;  %v11213_v54 = vld [vmem:[#allocation2 + $0x1574] ss:$20 sps:$4 sm:$0xff]  }
 0x256   :  { %5691 = vmatprep.subr.bf16.mxu0 %v11117_v55  ;;  %6121 = vmatprep.subr.bf16.mxu1 %v11120_v56  ;;  %v11208_v55 = vld [vmem:[#allocation2 + $0x1568] ss:$20 sps:$4 sm:$0xff]   ;;  %v11211_v56 = vld [vmem:[#allocation2 + $0x1570] ss:$20 sps:$4 sm:$0xff]  }
 0x259   :  { %5692 = vmatpush1.bf16.msra.mxu0 %v11115_v57  ;;  %6122 = vmatpush1.bf16.msra.mxu1 %v11118_v58  ;;  %v11216_v57 = vld [vmem:[#allocation2 + $0x1594] ss:$20 sps:$4 sm:$0xff]   ;;  %v11219_v58 = vld [vmem:[#allocation2 + $0x159c] ss:$20 sps:$4 sm:$0xff]  }
 0x25a   :  { %5693 = vmatprep.subr.bf16.mxu0 %v11123_v59  ;;  %6123 = vmatprep.subr.bf16.mxu1 %v11126_v60  ;;  %v11214_v59 = vld [vmem:[#allocation2 + $0x1590] ss:$20 sps:$4 sm:$0xff]   ;;  %v11217_v60 = vld [vmem:[#allocation2 + $0x1598] ss:$20 sps:$4 sm:$0xff]  }
 0x25d   :  { %5694 = vmatpush1.bf16.msra.mxu0 %v11121_v61  ;;  %6124 = vmatpush1.bf16.msra.mxu1 %v11124_v62  ;;  %v11222_v61 = vld [vmem:[#allocation2 + $0x15bc] ss:$20 sps:$4 sm:$0xff]   ;;  %v11225_v62 = vld [vmem:[#allocation2 + $0x15c4] ss:$20 sps:$4 sm:$0xff]  }
 0x25e   :  { %5695 = vmatprep.subr.bf16.mxu0 %v11129_v63  ;;  %6125 = vmatprep.subr.bf16.mxu1 %v11132_v0  ;;  %v11220_v63 = vld [vmem:[#allocation2 + $0x15b8] ss:$20 sps:$4 sm:$0xff]   ;;  %v11223_v0 = vld [vmem:[#allocation2 + $0x15c0] ss:$20 sps:$4 sm:$0xff]  }
 0x261   :  { %5696 = vmatpush1.bf16.msra.mxu0 %v11127_v1  ;;  %6126 = vmatpush1.bf16.msra.mxu1 %v11130_v2  ;;  %v11228_v1 = vld [vmem:[#allocation2 + $0x15e4] ss:$20 sps:$4 sm:$0xff]   ;;  %v11231_v2 = vld [vmem:[#allocation2 + $0x15ec] ss:$20 sps:$4 sm:$0xff]  }
 0x262   :  { %5697 = vmatprep.subr.bf16.mxu0 %v11135_v3  ;;  %6127 = vmatprep.subr.bf16.mxu1 %v11138_v4  ;;  %v11226_v3 = vld [vmem:[#allocation2 + $0x15e0] ss:$20 sps:$4 sm:$0xff]   ;;  %v11229_v4 = vld [vmem:[#allocation2 + $0x15e8] ss:$20 sps:$4 sm:$0xff]  }
 0x265   :  { %5698 = vmatpush1.bf16.msra.mxu0 %v11133_v5  ;;  %6128 = vmatpush1.bf16.msra.mxu1 %v11136_v6  ;;  %v11234_v5 = vld [vmem:[#allocation2 + $0x160c] ss:$20 sps:$4 sm:$0xff]   ;;  %v11237_v6 = vld [vmem:[#allocation2 + $0x1614] ss:$20 sps:$4 sm:$0xff]  }
 0x266   :  { %5699 = vmatprep.subr.bf16.mxu0 %v11141_v7  ;;  %6129 = vmatprep.subr.bf16.mxu1 %v11144_v8  ;;  %v11232_v7 = vld [vmem:[#allocation2 + $0x1608] ss:$20 sps:$4 sm:$0xff]   ;;  %v11235_v8 = vld [vmem:[#allocation2 + $0x1610] ss:$20 sps:$4 sm:$0xff]  }
 0x269   :  { %5700 = vmatpush1.bf16.msra.mxu0 %v11139_v9  ;;  %6130 = vmatpush1.bf16.msra.mxu1 %v11142_v10  ;;  %v11240_v9 = vld [vmem:[#allocation2 + $0x1634] ss:$20 sps:$4 sm:$0xff]   ;;  %v11243_v10 = vld [vmem:[#allocation2 + $0x163c] ss:$20 sps:$4 sm:$0xff]  }
 0x26a   :  { %5701 = vmatprep.subr.bf16.mxu0 %v11147_v11  ;;  %6131 = vmatprep.subr.bf16.mxu1 %v11150_v12  ;;  %v11238_v11 = vld [vmem:[#allocation2 + $0x1630] ss:$20 sps:$4 sm:$0xff]   ;;  %v11241_v12 = vld [vmem:[#allocation2 + $0x1638] ss:$20 sps:$4 sm:$0xff]  }
 0x26d   :  { %5702 = vmatpush1.bf16.msra.mxu0 %v11145_v13  ;;  %6132 = vmatpush1.bf16.msra.mxu1 %v11148_v14  ;;  %v11246_v13 = vld [vmem:[#allocation2 + $0x165c] ss:$20 sps:$4 sm:$0xff]   ;;  %v11249_v14 = vld [vmem:[#allocation2 + $0x1664] ss:$20 sps:$4 sm:$0xff]  }
 0x26e   :  { %5714 = vmatprep.subr.bf16.mxu0 %v11156_v16  ;;  %6144 = vmatprep.subr.bf16.mxu1 %v11159_v17  ;;  %v11247_v16 = vld [vmem:[#allocation2 + $0x1660] ss:$20 sps:$4 sm:$0xff]  }
 0x26f   :  { %v11250_v17 = vld [vmem:[%s12334_s0 + $0x40] ss:$80 sps:$4 sm:$0xff]  }
 0x270   :  { %5704 = vmatmul.mubr.bf16.vlgmr.msra.gmra.mrb[0].mxu0 %v11151_v15  ;;  %6134 = vmatmul.mubr.bf16.vlgmr.msra.gmra.mrb[0].mxu1 %v11151_v15  ;;  %v11244_v15 = vld [vmem:[#allocation2 + $0x1658] ss:$20 sps:$4 sm:$0xff]  }
 0x271   :  { %5715 = vmatpush1.bf16.msra.mxu0 %v11154_v18  ;;  %6145 = vmatpush1.bf16.msra.mxu1 %v11157_v19  ;;  %v11255_v18 = vld [vmem:[#allocation2 + $0x1684] ss:$20 sps:$4 sm:$0xff]   ;;  %v11258_v19 = vld [vmem:[#allocation2 + $0x168c] ss:$20 sps:$4 sm:$0xff]  }
 0x272   :  { %5716 = vmatprep.subr.bf16.mxu0 %v11162_v20  ;;  %6146 = vmatprep.subr.bf16.mxu1 %v11165_v21  ;;  %v11253_v20 = vld [vmem:[#allocation2 + $0x1680] ss:$20 sps:$4 sm:$0xff]   ;;  %v11256_v21 = vld [vmem:[#allocation2 + $0x1688] ss:$20 sps:$4 sm:$0xff]  }
 0x273   :  { %5746 = vmatprep.mubr.bf16.mxu0 %v11252_v23  ;;  %6176 = vmatprep.mubr.bf16.mxu1 %v11252_v23  ;;  %v11264_v23 = vld [vmem:[#allocation2 + $0x16b4] ss:$20 sps:$4 sm:$0xff]  }
 0x275   :  { %5717 = vmatpush1.bf16.msra.mxu0 %v11160_v22  ;;  %6147 = vmatpush1.bf16.msra.mxu1 %v11163_v24  ;;  %v11261_v22 = vld [vmem:[#allocation2 + $0x16ac] ss:$20 sps:$4 sm:$0xff]   ;;  %v11259_v24 = vld [vmem:[#allocation2 + $0x16a8] ss:$20 sps:$4 sm:$0xff]  }
 0x276   :  { %5718 = vmatprep.subr.bf16.mxu0 %v11168_v25  ;;  %6148 = vmatprep.subr.bf16.mxu1 %v11171_v26  ;;  %v11351_v25 = vld [vmem:[%s12334_s0 + $0x4c] ss:$80 sps:$4 sm:$0xff]   ;;  %v11262_v26 = vld [vmem:[#allocation2 + $0x16b0] ss:$20 sps:$4 sm:$0xff]  }
 0x279   :  { %5719 = vmatpush1.bf16.msra.mxu0 %v11166_v27  ;;  %6149 = vmatpush1.bf16.msra.mxu1 %v11169_v28  ;;  %v11267_v27 = vld [vmem:[#allocation2 + $0x16d4] ss:$20 sps:$4 sm:$0xff]   ;;  %v11270_v28 = vld [vmem:[#allocation2 + $0x16dc] ss:$20 sps:$4 sm:$0xff]  }
 0x27a   :  { %5720 = vmatprep.subr.bf16.mxu0 %v11174_v29  ;;  %6150 = vmatprep.subr.bf16.mxu1 %v11177_v30  ;;  %v11265_v29 = vld [vmem:[#allocation2 + $0x16d0] ss:$20 sps:$4 sm:$0xff]   ;;  %v11268_v30 = vld [vmem:[#allocation2 + $0x16d8] ss:$20 sps:$4 sm:$0xff]  }
 0x27d   :  { %5721 = vmatpush1.bf16.msra.mxu0 %v11172_v31  ;;  %6151 = vmatpush1.bf16.msra.mxu1 %v11175_v32  ;;  %v11273_v31 = vld [vmem:[#allocation2 + $0x16fc] ss:$20 sps:$4 sm:$0xff]   ;;  %v11276_v32 = vld [vmem:[#allocation2 + $0x1704] ss:$20 sps:$4 sm:$0xff]  }
 0x27e   :  { %5722 = vmatprep.subr.bf16.mxu0 %v11180_v33  ;;  %6152 = vmatprep.subr.bf16.mxu1 %v11183_v34  ;;  %v11271_v33 = vld [vmem:[#allocation2 + $0x16f8] ss:$20 sps:$4 sm:$0xff]   ;;  %v11274_v34 = vld [vmem:[#allocation2 + $0x1700] ss:$20 sps:$4 sm:$0xff]  }
 0x281   :  { %5723 = vmatpush1.bf16.msra.mxu0 %v11178_v35  ;;  %6153 = vmatpush1.bf16.msra.mxu1 %v11181_v36  ;;  %v11279_v35 = vld [vmem:[#allocation2 + $0x1724] ss:$20 sps:$4 sm:$0xff]   ;;  %v11282_v36 = vld [vmem:[#allocation2 + $0x172c] ss:$20 sps:$4 sm:$0xff]  }
 0x282   :  { %5724 = vmatprep.subr.bf16.mxu0 %v11186_v37  ;;  %6154 = vmatprep.subr.bf16.mxu1 %v11189_v38  ;;  %v11277_v37 = vld [vmem:[#allocation2 + $0x1720] ss:$20 sps:$4 sm:$0xff]   ;;  %v11280_v38 = vld [vmem:[#allocation2 + $0x1728] ss:$20 sps:$4 sm:$0xff]  }
 0x285   :  { %5725 = vmatpush1.bf16.msra.mxu0 %v11184_v39  ;;  %6155 = vmatpush1.bf16.msra.mxu1 %v11187_v40  ;;  %v11285_v39 = vld [vmem:[#allocation2 + $0x174c] ss:$20 sps:$4 sm:$0xff]   ;;  %v11288_v40 = vld [vmem:[#allocation2 + $0x1754] ss:$20 sps:$4 sm:$0xff]  }
 0x286   :  { %5726 = vmatprep.subr.bf16.mxu0 %v11192_v41  ;;  %6156 = vmatprep.subr.bf16.mxu1 %v11195_v42  ;;  %v11283_v41 = vld [vmem:[#allocation2 + $0x1748] ss:$20 sps:$4 sm:$0xff]   ;;  %v11286_v42 = vld [vmem:[#allocation2 + $0x1750] ss:$20 sps:$4 sm:$0xff]  }
 0x289   :  { %5727 = vmatpush1.bf16.msra.mxu0 %v11190_v43  ;;  %6157 = vmatpush1.bf16.msra.mxu1 %v11193_v44  ;;  %v11291_v43 = vld [vmem:[#allocation2 + $0x1774] ss:$20 sps:$4 sm:$0xff]   ;;  %v11294_v44 = vld [vmem:[#allocation2 + $0x177c] ss:$20 sps:$4 sm:$0xff]  }
 0x28a   :  { %5728 = vmatprep.subr.bf16.mxu0 %v11198_v45  ;;  %6158 = vmatprep.subr.bf16.mxu1 %v11201_v46  ;;  %v11289_v45 = vld [vmem:[#allocation2 + $0x1770] ss:$20 sps:$4 sm:$0xff]   ;;  %v11292_v46 = vld [vmem:[#allocation2 + $0x1778] ss:$20 sps:$4 sm:$0xff]  }
 0x28d   :  { %5729 = vmatpush1.bf16.msra.mxu0 %v11196_v47  ;;  %6159 = vmatpush1.bf16.msra.mxu1 %v11199_v48  ;;  %v11297_v47 = vld [vmem:[#allocation2 + $0x179c] ss:$20 sps:$4 sm:$0xff]   ;;  %v11300_v48 = vld [vmem:[#allocation2 + $0x17a4] ss:$20 sps:$4 sm:$0xff]  }
 0x28e   :  { %5730 = vmatprep.subr.bf16.mxu0 %v11204_v49  ;;  %6160 = vmatprep.subr.bf16.mxu1 %v11207_v50  ;;  %v11295_v49 = vld [vmem:[#allocation2 + $0x1798] ss:$20 sps:$4 sm:$0xff]   ;;  %v11298_v50 = vld [vmem:[#allocation2 + $0x17a0] ss:$20 sps:$4 sm:$0xff]  }
 0x291   :  { %5731 = vmatpush1.bf16.msra.mxu0 %v11202_v51  ;;  %6161 = vmatpush1.bf16.msra.mxu1 %v11205_v52  ;;  %v11303_v51 = vld [vmem:[#allocation2 + $0x17c4] ss:$20 sps:$4 sm:$0xff]   ;;  %v11306_v52 = vld [vmem:[#allocation2 + $0x17cc] ss:$20 sps:$4 sm:$0xff]  }
 0x292   :  { %5732 = vmatprep.subr.bf16.mxu0 %v11210_v53  ;;  %6162 = vmatprep.subr.bf16.mxu1 %v11213_v54  ;;  %v11301_v53 = vld [vmem:[#allocation2 + $0x17c0] ss:$20 sps:$4 sm:$0xff]   ;;  %v11304_v54 = vld [vmem:[#allocation2 + $0x17c8] ss:$20 sps:$4 sm:$0xff]  }
 0x295   :  { %5733 = vmatpush1.bf16.msra.mxu0 %v11208_v55  ;;  %6163 = vmatpush1.bf16.msra.mxu1 %v11211_v56  ;;  %v11309_v55 = vld [vmem:[#allocation2 + $0x17ec] ss:$20 sps:$4 sm:$0xff]   ;;  %v11312_v56 = vld [vmem:[#allocation2 + $0x17f4] ss:$20 sps:$4 sm:$0xff]  }
 0x296   :  { %5734 = vmatprep.subr.bf16.mxu0 %v11216_v57  ;;  %6164 = vmatprep.subr.bf16.mxu1 %v11219_v58  ;;  %v11307_v57 = vld [vmem:[#allocation2 + $0x17e8] ss:$20 sps:$4 sm:$0xff]   ;;  %v11310_v58 = vld [vmem:[#allocation2 + $0x17f0] ss:$20 sps:$4 sm:$0xff]  }
 0x299   :  { %5735 = vmatpush1.bf16.msra.mxu0 %v11214_v59  ;;  %6165 = vmatpush1.bf16.msra.mxu1 %v11217_v60  ;;  %v11315_v59 = vld [vmem:[#allocation2 + $0x1814] ss:$20 sps:$4 sm:$0xff]   ;;  %v11318_v60 = vld [vmem:[#allocation2 + $0x181c] ss:$20 sps:$4 sm:$0xff]  }
 0x29a   :  { %5736 = vmatprep.subr.bf16.mxu0 %v11222_v61  ;;  %6166 = vmatprep.subr.bf16.mxu1 %v11225_v62  ;;  %v11313_v61 = vld [vmem:[#allocation2 + $0x1810] ss:$20 sps:$4 sm:$0xff]   ;;  %v11316_v62 = vld [vmem:[#allocation2 + $0x1818] ss:$20 sps:$4 sm:$0xff]  }
 0x29d   :  { %5737 = vmatpush1.bf16.msra.mxu0 %v11220_v63  ;;  %6167 = vmatpush1.bf16.msra.mxu1 %v11223_v0  ;;  %v11321_v63 = vld [vmem:[#allocation2 + $0x183c] ss:$20 sps:$4 sm:$0xff]   ;;  %v11324_v0 = vld [vmem:[#allocation2 + $0x1844] ss:$20 sps:$4 sm:$0xff]  }
 0x29e   :  { %5738 = vmatprep.subr.bf16.mxu0 %v11228_v1  ;;  %6168 = vmatprep.subr.bf16.mxu1 %v11231_v2  ;;  %v11319_v1 = vld [vmem:[#allocation2 + $0x1838] ss:$20 sps:$4 sm:$0xff]   ;;  %v11322_v2 = vld [vmem:[#allocation2 + $0x1840] ss:$20 sps:$4 sm:$0xff]  }
 0x2a1   :  { %5739 = vmatpush1.bf16.msra.mxu0 %v11226_v3  ;;  %6169 = vmatpush1.bf16.msra.mxu1 %v11229_v4  ;;  %v11327_v3 = vld [vmem:[#allocation2 + $0x1864] ss:$20 sps:$4 sm:$0xff]   ;;  %v11330_v4 = vld [vmem:[#allocation2 + $0x186c] ss:$20 sps:$4 sm:$0xff]  }
 0x2a2   :  { %5740 = vmatprep.subr.bf16.mxu0 %v11234_v5  ;;  %6170 = vmatprep.subr.bf16.mxu1 %v11237_v6  ;;  %v11325_v5 = vld [vmem:[#allocation2 + $0x1860] ss:$20 sps:$4 sm:$0xff]   ;;  %v11328_v6 = vld [vmem:[#allocation2 + $0x1868] ss:$20 sps:$4 sm:$0xff]  }
 0x2a5   :  { %5741 = vmatpush1.bf16.msra.mxu0 %v11232_v7  ;;  %6171 = vmatpush1.bf16.msra.mxu1 %v11235_v8  ;;  %v11333_v7 = vld [vmem:[#allocation2 + $0x188c] ss:$20 sps:$4 sm:$0xff]   ;;  %v11336_v8 = vld [vmem:[#allocation2 + $0x1894] ss:$20 sps:$4 sm:$0xff]  }
 0x2a6   :  { %5742 = vmatprep.subr.bf16.mxu0 %v11240_v9  ;;  %6172 = vmatprep.subr.bf16.mxu1 %v11243_v10  ;;  %v11331_v9 = vld [vmem:[#allocation2 + $0x1888] ss:$20 sps:$4 sm:$0xff]   ;;  %v11334_v10 = vld [vmem:[#allocation2 + $0x1890] ss:$20 sps:$4 sm:$0xff]  }
 0x2a9   :  { %5743 = vmatpush1.bf16.msra.mxu0 %v11238_v11  ;;  %6173 = vmatpush1.bf16.msra.mxu1 %v11241_v12  ;;  %v11339_v11 = vld [vmem:[#allocation2 + $0x18b4] ss:$20 sps:$4 sm:$0xff]   ;;  %v11342_v12 = vld [vmem:[#allocation2 + $0x18bc] ss:$20 sps:$4 sm:$0xff]  }
 0x2aa   :  { %5744 = vmatprep.subr.bf16.mxu0 %v11246_v13  ;;  %6174 = vmatprep.subr.bf16.mxu1 %v11249_v14  ;;  %v11337_v13 = vld [vmem:[#allocation2 + $0x18b0] ss:$20 sps:$4 sm:$0xff]   ;;  %v11340_v14 = vld [vmem:[#allocation2 + $0x18b8] ss:$20 sps:$4 sm:$0xff]  }
 0x2ad   :  { %5745 = vmatpush1.bf16.msra.mxu0 %v11244_v15  ;;  %6175 = vmatpush1.bf16.msra.mxu1 %v11247_v16  ;;  %v11345_v15 = vld [vmem:[#allocation2 + $0x18dc] ss:$20 sps:$4 sm:$0xff]   ;;  %v11348_v16 = vld [vmem:[#allocation2 + $0x18e4] ss:$20 sps:$4 sm:$0xff]  }
 0x2ae   :  { %5757 = vmatprep.subr.bf16.mxu0 %v11255_v18  ;;  %6187 = vmatprep.subr.bf16.mxu1 %v11258_v19  ;;  %v11346_v18 = vld [vmem:[#allocation2 + $0x18e0] ss:$20 sps:$4 sm:$0xff]   ;;  %v11349_v19 = vld [vmem:[%s12334_s0 + $0x48] ss:$80 sps:$4 sm:$0xff]  }
 0x2b0   :  { %5747 = vmatmul.mubr.bf16.vlgmr.msra.gmra.mrb[0].mxu0 %v11250_v17  ;;  %6177 = vmatmul.mubr.bf16.vlgmr.msra.gmra.mrb[0].mxu1 %v11250_v17  ;;  %v11343_v17 = vld [vmem:[#allocation2 + $0x18d8] ss:$20 sps:$4 sm:$0xff]  }
 0x2b1   :  { %5758 = vmatpush1.bf16.msra.mxu0 %v11253_v20  ;;  %6188 = vmatpush1.bf16.msra.mxu1 %v11256_v21  ;;  %v11352_v20 = vld [vmem:[#allocation2 + $0x150] ss:$20 sps:$4 sm:$0xff]  }
 0x2b2   :  { %5759 = vmatprep.subr.bf16.mxu0 %v11261_v22  ;;  %6189 = vmatprep.subr.bf16.mxu1 %v11264_v23  ;;  %v11353_v21 = vld [vmem:[#allocation2 + $0x3d0] ss:$20 sps:$4 sm:$0xff]  }
 0x2b3   :  { %5789 = vmatprep.mubr.bf16.mxu0 %v11351_v25  ;;  %6219 = vmatprep.mubr.bf16.mxu1 %v11351_v25  ;;  %v11354_v22 = vld [vmem:[#allocation2 + $0x10] ss:$20 sps:$4 sm:$0xff]   ;;  %v11357_v25 = vld [vmem:[#allocation2 + $0x3f8] ss:$20 sps:$4 sm:$0xff]  }
 0x2b4   :  { %v11355_v23 = vld [vmem:[#allocation2 + $0x290] ss:$20 sps:$4 sm:$0xff]  }
 0x2b5   :  { %5760 = vmatpush1.bf16.msra.mxu0 %v11259_v24  ;;  %6190 = vmatpush1.bf16.msra.mxu1 %v11262_v26  ;;  %v11356_v24 = vld [vmem:[#allocation2 + $0x178] ss:$20 sps:$4 sm:$0xff]  }
 0x2b6   :  { %5761 = vmatprep.subr.bf16.mxu0 %v11267_v27  ;;  %6191 = vmatprep.subr.bf16.mxu1 %v11270_v28  ;;  %v11358_v26 = vld [vmem:[#allocation2 + $0x38] ss:$20 sps:$4 sm:$0xff]   ;;  %v11360_v28 = vld [vmem:[#allocation2 + $0x1a0] ss:$20 sps:$4 sm:$0xff]  }
 0x2b7   :  { %v11359_v27 = vld [vmem:[#allocation2 + $0x2b8] ss:$20 sps:$4 sm:$0xff]  }
 0x2b9   :  { %5762 = vmatpush1.bf16.msra.mxu0 %v11265_v29  ;;  %6192 = vmatpush1.bf16.msra.mxu1 %v11268_v30  ;;  %v11361_v29 = vld [vmem:[#allocation2 + $0x420] ss:$20 sps:$4 sm:$0xff]  }
 0x2ba   :  { %5763 = vmatprep.subr.bf16.mxu0 %v11273_v31  ;;  %6193 = vmatprep.subr.bf16.mxu1 %v11276_v32  ;;  %v11362_v30 = vld [vmem:[#allocation2 + $0x60] ss:$20 sps:$4 sm:$0xff]   ;;  %v11833_v32 = vld [vmem:[%s12334_s0 + $0xc] ss:$80 sps:$4 sm:$0xff]  }
 0x2bb   :  { %v11832_v31 = vld [vmem:[%s12334_s0 + $0x4] ss:$80 sps:$4 sm:$0xff]  }
 0x2bd   :  { %5764 = vmatpush1.bf16.msra.mxu0 %v11271_v33  ;;  %6194 = vmatpush1.bf16.msra.mxu1 %v11274_v34  ;;  %v11363_v33 = vld [vmem:[#allocation2 + $0x2e0] ss:$20 sps:$4 sm:$0xff]   ;;  %v11364_v34 = vld [vmem:[#allocation2 + $0x1c8] ss:$20 sps:$4 sm:$0xff]  }
 0x2be   :  { %5765 = vmatprep.subr.bf16.mxu0 %v11279_v35  ;;  %6195 = vmatprep.subr.bf16.mxu1 %v11282_v36  ;;  %v11365_v35 = vld [vmem:[#allocation2 + $0x448] ss:$20 sps:$4 sm:$0xff]  }
 0x2bf   :  { %v11366_v36 = vld [vmem:[#allocation2 + $0x88] ss:$20 sps:$4 sm:$0xff]  }
 0x2c1   :  { %5766 = vmatpush1.bf16.msra.mxu0 %v11277_v37  ;;  %6196 = vmatpush1.bf16.msra.mxu1 %v11280_v38  ;;  %v11367_v37 = vld [vmem:[#allocation2 + $0x308] ss:$20 sps:$4 sm:$0xff]   ;;  %v11368_v38 = vld [vmem:[#allocation2 + $0x1f0] ss:$20 sps:$4 sm:$0xff]  }
 0x2c2   :  { %5767 = vmatprep.subr.bf16.mxu0 %v11285_v39  ;;  %6197 = vmatprep.subr.bf16.mxu1 %v11288_v40  ;;  %v11369_v39 = vld [vmem:[#allocation2 + $0x470] ss:$20 sps:$4 sm:$0xff]  }
 0x2c3   :  { %v11370_v40 = vld [vmem:[#allocation2 + $0xb0] ss:$20 sps:$4 sm:$0xff]  }
 0x2c5   :  { %5768 = vmatpush1.bf16.msra.mxu0 %v11283_v41  ;;  %6198 = vmatpush1.bf16.msra.mxu1 %v11286_v42  ;;  %v11371_v41 = vld [vmem:[#allocation2 + $0x330] ss:$20 sps:$4 sm:$0xff]   ;;  %v11372_v42 = vld [vmem:[#allocation2 + $0x218] ss:$20 sps:$4 sm:$0xff]  }
 0x2c6   :  { %5769 = vmatprep.subr.bf16.mxu0 %v11291_v43  ;;  %6199 = vmatprep.subr.bf16.mxu1 %v11294_v44  ;;  %v11373_v43 = vld [vmem:[#allocation2 + $0x498] ss:$20 sps:$4 sm:$0xff]  }
 0x2c7   :  { %v11374_v44 = vld [vmem:[#allocation2 + $0xd8] ss:$20 sps:$4 sm:$0xff]  }
 0x2c9   :  { %5770 = vmatpush1.bf16.msra.mxu0 %v11289_v45  ;;  %6200 = vmatpush1.bf16.msra.mxu1 %v11292_v46  ;;  %v11375_v45 = vld [vmem:[#allocation2 + $0x358] ss:$20 sps:$4 sm:$0xff]   ;;  %v11376_v46 = vld [vmem:[#allocation2 + $0x240] ss:$20 sps:$4 sm:$0xff]  }
 0x2ca   :  { %5771 = vmatprep.subr.bf16.mxu0 %v11297_v47  ;;  %6201 = vmatprep.subr.bf16.mxu1 %v11300_v48  ;;  %v11377_v47 = vld [vmem:[#allocation2 + $0x4c0] ss:$20 sps:$4 sm:$0xff]  }
 0x2cb   :  { %v11378_v48 = vld [vmem:[#allocation2 + $0x100] ss:$20 sps:$4 sm:$0xff]  }
 0x2cd   :  { %5772 = vmatpush1.bf16.msra.mxu0 %v11295_v49  ;;  %6202 = vmatpush1.bf16.msra.mxu1 %v11298_v50  ;;  %v11379_v49 = vld [vmem:[#allocation2 + $0x380] ss:$20 sps:$4 sm:$0xff]   ;;  %v11380_v50 = vld [vmem:[#allocation2 + $0x268] ss:$20 sps:$4 sm:$0xff]  }
 0x2ce   :  { %5773 = vmatprep.subr.bf16.mxu0 %v11303_v51  ;;  %6203 = vmatprep.subr.bf16.mxu1 %v11306_v52  ;;  %v11381_v51 = vld [vmem:[#allocation2 + $0x4e8] ss:$20 sps:$4 sm:$0xff]  }
 0x2cf   :  { %v11382_v52 = vld [vmem:[#allocation2 + $0x128] ss:$20 sps:$4 sm:$0xff]  }
 0x2d1   :  { %5774 = vmatpush1.bf16.msra.mxu0 %v11301_v53  ;;  %6204 = vmatpush1.bf16.msra.mxu1 %v11304_v54  ;;  %v11383_v53 = vld [vmem:[#allocation2 + $0x3a8] ss:$20 sps:$4 sm:$0xff]   ;;  %v11384_v54 = vld [vmem:[#allocation2 + $0x650] ss:$20 sps:$4 sm:$0xff]  }
 0x2d2   :  { %5775 = vmatprep.subr.bf16.mxu0 %v11309_v55  ;;  %6205 = vmatprep.subr.bf16.mxu1 %v11312_v56  ;;  %v11385_v55 = vld [vmem:[#allocation2 + $0x8d0] ss:$20 sps:$4 sm:$0xff]  }
 0x2d3   :  { %v11386_v56 = vld [vmem:[#allocation2 + $0x510] ss:$20 sps:$4 sm:$0xff]  }
 0x2d5   :  { %5776 = vmatpush1.bf16.msra.mxu0 %v11307_v57  ;;  %6206 = vmatpush1.bf16.msra.mxu1 %v11310_v58  ;;  %v11387_v57 = vld [vmem:[#allocation2 + $0x790] ss:$20 sps:$4 sm:$0xff]   ;;  %v11388_v58 = vld [vmem:[#allocation2 + $0x678] ss:$20 sps:$4 sm:$0xff]  }
 0x2d6   :  { %5777 = vmatprep.subr.bf16.mxu0 %v11315_v59  ;;  %6207 = vmatprep.subr.bf16.mxu1 %v11318_v60  ;;  %v11389_v59 = vld [vmem:[#allocation2 + $0x8f8] ss:$20 sps:$4 sm:$0xff]   ;;  %v11834_v60 = vld [vmem:[%s12334_s0] ss:$80 sps:$4 sm:$0xff]  }
 0x2d9   :  { %5778 = vmatpush1.bf16.msra.mxu0 %v11313_v61  ;;  %6208 = vmatpush1.bf16.msra.mxu1 %v11316_v62  ;;  %v11835_v61 = vld [vmem:[%s12334_s0 + $0x8] ss:$80 sps:$4 sm:$0xff]  }
 0x2da   :  { %5779 = vmatprep.subr.bf16.mxu0 %v11321_v63  ;;  %6209 = vmatprep.subr.bf16.mxu1 %v11324_v0  ;;  %v11390_v62 = vld [vmem:[#allocation2 + $0x538] ss:$20 sps:$4 sm:$0xff]   ;;  %v11392_v0 = vld [vmem:[#allocation2 + $0x6a0] ss:$20 sps:$4 sm:$0xff]  }
 0x2db   :  { %v11391_v63 = vld [vmem:[#allocation2 + $0x7b8] ss:$20 sps:$4 sm:$0xff]  }
 0x2dd   :  { %5780 = vmatpush1.bf16.msra.mxu0 %v11319_v1  ;;  %6210 = vmatpush1.bf16.msra.mxu1 %v11322_v2  ;;  %v11393_v1 = vld [vmem:[#allocation2 + $0x920] ss:$20 sps:$4 sm:$0xff]  }
 0x2de   :  { %5781 = vmatprep.subr.bf16.mxu0 %v11327_v3  ;;  %6211 = vmatprep.subr.bf16.mxu1 %v11330_v4  ;;  %v11836_v2 = vld [vmem:[%s12334_s0 + $0x14] ss:$80 sps:$4 sm:$0xff]   ;;  %v11837_v3 = vld [vmem:[%s12334_s0 + $0x1c] ss:$80 sps:$4 sm:$0xff]  }
 0x2df   :  { %v11394_v4 = vld [vmem:[#allocation2 + $0x560] ss:$20 sps:$4 sm:$0xff]  }
 0x2e1   :  { %5782 = vmatpush1.bf16.msra.mxu0 %v11325_v5  ;;  %6212 = vmatpush1.bf16.msra.mxu1 %v11328_v6  ;;  %v11395_v5 = vld [vmem:[#allocation2 + $0x7e0] ss:$20 sps:$4 sm:$0xff]   ;;  %v11396_v6 = vld [vmem:[#allocation2 + $0x6c8] ss:$20 sps:$4 sm:$0xff]  }
 0x2e2   :  { %5783 = vmatprep.subr.bf16.mxu0 %v11333_v7  ;;  %6213 = vmatprep.subr.bf16.mxu1 %v11336_v8  ;;  %v11397_v7 = vld [vmem:[#allocation2 + $0x948] ss:$20 sps:$4 sm:$0xff]  }
 0x2e3   :  { %v11398_v8 = vld [vmem:[#allocation2 + $0x588] ss:$20 sps:$4 sm:$0xff]  }
 0x2e5   :  { %5784 = vmatpush1.bf16.msra.mxu0 %v11331_v9  ;;  %6214 = vmatpush1.bf16.msra.mxu1 %v11334_v10  ;;  %v11399_v9 = vld [vmem:[#allocation2 + $0x808] ss:$20 sps:$4 sm:$0xff]   ;;  %v11400_v10 = vld [vmem:[#allocation2 + $0x6f0] ss:$20 sps:$4 sm:$0xff]  }
 0x2e6   :  { %5785 = vmatprep.subr.bf16.mxu0 %v11339_v11  ;;  %6215 = vmatprep.subr.bf16.mxu1 %v11342_v12  ;;  %v11401_v11 = vld [vmem:[#allocation2 + $0x970] ss:$20 sps:$4 sm:$0xff]  }
 0x2e7   :  { %v11402_v12 = vld [vmem:[#allocation2 + $0x5b0] ss:$20 sps:$4 sm:$0xff]  }
 0x2e9   :  { %5786 = vmatpush1.bf16.msra.mxu0 %v11337_v13  ;;  %6216 = vmatpush1.bf16.msra.mxu1 %v11340_v14  ;;  %v11403_v13 = vld [vmem:[#allocation2 + $0x830] ss:$20 sps:$4 sm:$0xff]   ;;  %v11404_v14 = vld [vmem:[#allocation2 + $0x718] ss:$20 sps:$4 sm:$0xff]  }
 0x2ea   :  { %5787 = vmatprep.subr.bf16.mxu0 %v11345_v15  ;;  %6217 = vmatprep.subr.bf16.mxu1 %v11348_v16  ;;  %v11405_v15 = vld [vmem:[#allocation2 + $0x998] ss:$20 sps:$4 sm:$0xff]  }
 0x2eb   :  { %v11406_v16 = vld [vmem:[#allocation2 + $0x5d8] ss:$20 sps:$4 sm:$0xff]  }
 0x2ed   :  { %5788 = vmatpush1.bf16.msra.mxu0 %v11343_v17  ;;  %6218 = vmatpush1.bf16.msra.mxu1 %v11346_v18  ;;  %v11407_v17 = vld [vmem:[#allocation2 + $0x858] ss:$20 sps:$4 sm:$0xff]   ;;  %v11408_v18 = vld [vmem:[#allocation2 + $0x740] ss:$20 sps:$4 sm:$0xff]  }
 0x2ee   :  { %9879 = vmatprep.subr.bf16.mxu0 %v11352_v20  ;;  %9901 = vmatprep.subr.bf16.mxu1 %v11353_v21  ;;  %v11410_v20 = vld [vmem:[#allocation2 + $0x600] ss:$20 sps:$4 sm:$0xff]  }
 0x2ef   :  { %v11411_v21 = vld [vmem:[#allocation2 + $0x880] ss:$20 sps:$4 sm:$0xff]  }
 0x2f0   :  { %5790 = vmatmul.mubr.bf16.vlgmr.msra.gmra.mrb[0].mxu0 %v11349_v19  ;;  %6220 = vmatmul.mubr.bf16.vlgmr.msra.gmra.mrb[0].mxu1 %v11349_v19  ;;  %v11409_v19 = vld [vmem:[#allocation2 + $0x9c0] ss:$20 sps:$4 sm:$0xff]  }
 0x2f1   :  { %9880 = vmatpush3.bf16.msra.mxu0 %v11354_v22  ;;  %9902 = vmatpush3.bf16.msra.mxu1 %v11355_v23  ;;  %v11412_v22 = vld [vmem:[#allocation2 + $0x768] ss:$20 sps:$4 sm:$0xff]  }
 0x2f2   :  { %9881 = vmatprep.subr.bf16.mxu0 %v11356_v24  ;;  %9903 = vmatprep.subr.bf16.mxu1 %v11357_v25  ;;  %v11413_v23 = vld [vmem:[#allocation2 + $0x9e8] ss:$20 sps:$4 sm:$0xff]  }
 0x2f3   :  { %6262 = vmatprep.mubr.bf16.mxu0 %v11832_v31  ;;  %6303 = vmatprep.mubr.bf16.mxu1 %v11833_v32  ;;  %v11414_v24 = vld [vmem:[#allocation2 + $0x628] ss:$20 sps:$4 sm:$0xff]   ;;  %v11421_v31 = vld [vmem:[#allocation2 + $0xdf8] ss:$20 sps:$4 sm:$0xff]   ;;  %v11838_v32 = vld [vmem:[%s12334_s0 + $0x10] ss:$80 sps:$4 sm:$0xff]  }
 0x2f4   :  { %v11415_v25 = vld [vmem:[#allocation2 + $0x8a8] ss:$20 sps:$4 sm:$0xff]  }
 0x2f5   :  { %9882 = vmatpush3.bf16.msra.mxu0 %v11358_v26  ;;  %9904 = vmatpush3.bf16.msra.mxu1 %v11359_v27  ;;  %v11416_v26 = vld [vmem:[#allocation2 + $0xb50] ss:$20 sps:$4 sm:$0xff]  }
 0x2f6   :  { %9883 = vmatprep.subr.bf16.mxu0 %v11360_v28  ;;  %9905 = vmatprep.subr.bf16.mxu1 %v11361_v29  ;;  %v11417_v27 = vld [vmem:[#allocation2 + $0xdd0] ss:$20 sps:$4 sm:$0xff]  }
 0x2f7   :  { %v11418_v28 = vld [vmem:[#allocation2 + $0xa10] ss:$20 sps:$4 sm:$0xff]  }
 0x2f8   :  { %v11419_v29 = vld [vmem:[#allocation2 + $0xc90] ss:$20 sps:$4 sm:$0xff]  }
 0x2f9   :  { %9884 = vmatpush3.bf16.msra.mxu0 %v11362_v30  ;;  %9906 = vmatpush3.bf16.msra.mxu1 %v11363_v33  ;;  %v11420_v30 = vld [vmem:[#allocation2 + $0xb78] ss:$20 sps:$4 sm:$0xff]  }
 0x2fa   :  { %9885 = vmatprep.subr.bf16.mxu0 %v11364_v34  ;;  %9907 = vmatprep.subr.bf16.mxu1 %v11365_v35  ;;  %v11839_v33 = vld [vmem:[%s12334_s0 + $0x18] ss:$80 sps:$4 sm:$0xff]  }
 0x2fb   :  { %v11422_v34 = vld [vmem:[#allocation2 + $0xa38] ss:$20 sps:$4 sm:$0xff]  }
 0x2fc   :  { %v11423_v35 = vld [vmem:[#allocation2 + $0xcb8] ss:$20 sps:$4 sm:$0xff]  }
 0x2fd   :  { %9886 = vmatpush3.bf16.msra.mxu0 %v11366_v36  ;;  %9908 = vmatpush3.bf16.msra.mxu1 %v11367_v37  ;;  %v11424_v36 = vld [vmem:[#allocation2 + $0xba0] ss:$20 sps:$4 sm:$0xff]  }
 0x2fe   :  { %9887 = vmatprep.subr.bf16.mxu0 %v11368_v38  ;;  %9909 = vmatprep.subr.bf16.mxu1 %v11369_v39  ;;  %v11425_v37 = vld [vmem:[#allocation2 + $0xe20] ss:$20 sps:$4 sm:$0xff]   ;;  %v11841_v39 = vld [vmem:[%s12334_s0 + $0x2c] ss:$80 sps:$4 sm:$0xff]  }
 0x2ff   :  { %v11840_v38 = vld [vmem:[%s12334_s0 + $0x24] ss:$80 sps:$4 sm:$0xff]  }
 0x301   :  { %9888 = vmatpush3.bf16.msra.mxu0 %v11370_v40  ;;  %9910 = vmatpush3.bf16.msra.mxu1 %v11371_v41  ;;  %v11426_v40 = vld [vmem:[#allocation2 + $0xa60] ss:$20 sps:$4 sm:$0xff]  }
 0x302   :  { %9889 = vmatprep.subr.bf16.mxu0 %v11372_v42  ;;  %9911 = vmatprep.subr.bf16.mxu1 %v11373_v43  ;;  %v11427_v41 = vld [vmem:[#allocation2 + $0xce0] ss:$20 sps:$4 sm:$0xff]   ;;  %v11428_v42 = vld [vmem:[#allocation2 + $0xbc8] ss:$20 sps:$4 sm:$0xff]  }
 0x303   :  { %v11429_v43 = vld [vmem:[#allocation2 + $0xe48] ss:$20 sps:$4 sm:$0xff]  }
 0x305   :  { %9890 = vmatpush3.bf16.msra.mxu0 %v11374_v44  ;;  %9912 = vmatpush3.bf16.msra.mxu1 %v11375_v45  ;;  %v11430_v44 = vld [vmem:[#allocation2 + $0xa88] ss:$20 sps:$4 sm:$0xff]  }
 0x306   :  { %9891 = vmatprep.subr.bf16.mxu0 %v11376_v46  ;;  %9913 = vmatprep.subr.bf16.mxu1 %v11377_v47  ;;  %v11431_v45 = vld [vmem:[#allocation2 + $0xd08] ss:$20 sps:$4 sm:$0xff]   ;;  %v11432_v46 = vld [vmem:[#allocation2 + $0xbf0] ss:$20 sps:$4 sm:$0xff]  }
 0x307   :  { %v11433_v47 = vld [vmem:[#allocation2 + $0xe70] ss:$20 sps:$4 sm:$0xff]  }
 0x309   :  { %9892 = vmatpush3.bf16.msra.mxu0 %v11378_v48  ;;  %9914 = vmatpush3.bf16.msra.mxu1 %v11379_v49  ;;  %v11434_v48 = vld [vmem:[#allocation2 + $0xab0] ss:$20 sps:$4 sm:$0xff]  }
 0x30a   :  { %9893 = vmatprep.subr.bf16.mxu0 %v11380_v50  ;;  %9915 = vmatprep.subr.bf16.mxu1 %v11381_v51  ;;  %v11435_v49 = vld [vmem:[#allocation2 + $0xd30] ss:$20 sps:$4 sm:$0xff]   ;;  %v11436_v50 = vld [vmem:[#allocation2 + $0xc18] ss:$20 sps:$4 sm:$0xff]  }
 0x30b   :  { %v11437_v51 = vld [vmem:[#allocation2 + $0xe98] ss:$20 sps:$4 sm:$0xff]  }
 0x30d   :  { %9894 = vmatpush3.bf16.msra.mxu0 %v11382_v52  ;;  %9916 = vmatpush3.bf16.msra.mxu1 %v11383_v53  ;;  %v11438_v52 = vld [vmem:[#allocation2 + $0xad8] ss:$20 sps:$4 sm:$0xff]  }
 0x30e   :  { %9923 = vmatprep.subr.bf16.mxu0 %v11384_v54  ;;  %9945 = vmatprep.subr.bf16.mxu1 %v11385_v55  ;;  %v11439_v53 = vld [vmem:[#allocation2 + $0xd58] ss:$20 sps:$4 sm:$0xff]   ;;  %v11440_v54 = vld [vmem:[#allocation2 + $0xc40] ss:$20 sps:$4 sm:$0xff]  }
 0x30f   :  { %v11441_v55 = vld [vmem:[#allocation2 + $0xec0] ss:$20 sps:$4 sm:$0xff]  }
 0x310   :  { %6263 = vmatmul.mubr.bf16.vlgmr.msra.gmra.mrb[4].mxu0 %v11834_v60  ;;  %6304 = vmatmul.mubr.bf16.vlgmr.msra.gmra.mrb[4].mxu1 %v11835_v61  ;;  %v11446_v60 = vld [vmem:[#allocation2 + $0xb28] ss:$20 sps:$4 sm:$0xff]  }
 0x311   :  { %9924 = vmatpush3.bf16.msra.mxu0 %v11386_v56  ;;  %9946 = vmatpush3.bf16.msra.mxu1 %v11387_v57  ;;  %v11442_v56 = vld [vmem:[#allocation2 + $0xb00] ss:$20 sps:$4 sm:$0xff]   ;;  %v11447_v61 = vld [vmem:[#allocation2 + $0xda8] ss:$20 sps:$4 sm:$0xff]  }
 0x312   :  { %9925 = vmatprep.subr.bf16.mxu0 %v11388_v58  ;;  %9947 = vmatprep.subr.bf16.mxu1 %v11389_v59  ;;  %v11443_v57 = vld [vmem:[#allocation2 + $0xd80] ss:$20 sps:$4 sm:$0xff]   ;;  %v11444_v58 = vld [vmem:[#allocation2 + $0xc68] ss:$20 sps:$4 sm:$0xff]  }
 0x313   :  { %6344 = vmatprep.mubr.bf16.mxu0 %v11836_v2  ;;  %6385 = vmatprep.mubr.bf16.mxu1 %v11837_v3  ;;  %v11445_v59 = vld [vmem:[#allocation2 + $0xee8] ss:$20 sps:$4 sm:$0xff]   ;;  %v11452_v2 = vld [vmem:[#allocation2 + $0x1078] ss:$20 sps:$4 sm:$0xff]  }
 0x314   :  { %v11453_v3 = vld [vmem:[#allocation2 + $0x12f8] ss:$20 sps:$4 sm:$0xff]  }
 0x315   :  { %9926 = vmatpush3.bf16.msra.mxu0 %v11390_v62  ;;  %9948 = vmatpush3.bf16.msra.mxu1 %v11391_v63  ;;  %v11448_v62 = vld [vmem:[#allocation2 + $0x1050] ss:$20 sps:$4 sm:$0xff]  }
 0x316   :  { %9927 = vmatprep.subr.bf16.mxu0 %v11392_v0  ;;  %9949 = vmatprep.subr.bf16.mxu1 %v11393_v1  ;;  %v11449_v63 = vld [vmem:[#allocation2 + $0x12d0] ss:$20 sps:$4 sm:$0xff]  }
 0x317   :  { %v11450_v0 = vld [vmem:[#allocation2 + $0xf10] ss:$20 sps:$4 sm:$0xff]  }
 0x318   :  { %v11451_v1 = vld [vmem:[#allocation2 + $0x1190] ss:$20 sps:$4 sm:$0xff]  }
 0x319   :  { %9928 = vmatpush3.bf16.msra.mxu0 %v11394_v4  ;;  %9950 = vmatpush3.bf16.msra.mxu1 %v11395_v5  ;;  %v11842_v4 = vld [vmem:[%s12334_s0 + $0x20] ss:$80 sps:$4 sm:$0xff]   ;;  %v11843_v5 = vld [vmem:[%s12334_s0 + $0x28] ss:$80 sps:$4 sm:$0xff]  }
 0x31a   :  { %9929 = vmatprep.subr.bf16.mxu0 %v11396_v6  ;;  %9951 = vmatprep.subr.bf16.mxu1 %v11397_v7  ;;  %v11454_v6 = vld [vmem:[#allocation2 + $0xf38] ss:$20 sps:$4 sm:$0xff]  }
 0x31b   :  { %v11455_v7 = vld [vmem:[#allocation2 + $0x11b8] ss:$20 sps:$4 sm:$0xff]  }
 0x31d   :  { %9930 = vmatpush3.bf16.msra.mxu0 %v11398_v8  ;;  %9952 = vmatpush3.bf16.msra.mxu1 %v11399_v9  ;;  %v11456_v8 = vld [vmem:[#allocation2 + $0x10a0] ss:$20 sps:$4 sm:$0xff]  }
 0x31e   :  { %9931 = vmatprep.subr.bf16.mxu0 %v11400_v10  ;;  %9953 = vmatprep.subr.bf16.mxu1 %v11401_v11  ;;  %v11457_v9 = vld [vmem:[#allocation2 + $0x1320] ss:$20 sps:$4 sm:$0xff]   ;;  %v11845_v11 = vld [vmem:[%s12334_s0 + $0x3c] ss:$80 sps:$4 sm:$0xff]  }
 0x31f   :  { %v11844_v10 = vld [vmem:[%s12334_s0 + $0x34] ss:$80 sps:$4 sm:$0xff]  }
 0x321   :  { %9932 = vmatpush3.bf16.msra.mxu0 %v11402_v12  ;;  %9954 = vmatpush3.bf16.msra.mxu1 %v11403_v13  ;;  %v11458_v12 = vld [vmem:[#allocation2 + $0xf60] ss:$20 sps:$4 sm:$0xff]  }
 0x322   :  { %9933 = vmatprep.subr.bf16.mxu0 %v11404_v14  ;;  %9955 = vmatprep.subr.bf16.mxu1 %v11405_v15  ;;  %v11459_v13 = vld [vmem:[#allocation2 + $0x11e0] ss:$20 sps:$4 sm:$0xff]   ;;  %v11460_v14 = vld [vmem:[#allocation2 + $0x10c8] ss:$20 sps:$4 sm:$0xff]  }
 0x323   :  { %v11461_v15 = vld [vmem:[#allocation2 + $0x1348] ss:$20 sps:$4 sm:$0xff]  }
 0x325   :  { %9934 = vmatpush3.bf16.msra.mxu0 %v11406_v16  ;;  %9956 = vmatpush3.bf16.msra.mxu1 %v11407_v17  ;;  %v11462_v16 = vld [vmem:[#allocation2 + $0xf88] ss:$20 sps:$4 sm:$0xff]  }
 0x326   :  { %9935 = vmatprep.subr.bf16.mxu0 %v11408_v18  ;;  %9957 = vmatprep.subr.bf16.mxu1 %v11409_v19  ;;  %v11463_v17 = vld [vmem:[#allocation2 + $0x1208] ss:$20 sps:$4 sm:$0xff]   ;;  %v11464_v18 = vld [vmem:[#allocation2 + $0x10f0] ss:$20 sps:$4 sm:$0xff]  }
 0x327   :  { %v11465_v19 = vld [vmem:[#allocation2 + $0x1370] ss:$20 sps:$4 sm:$0xff]  }
 0x329   :  { %9936 = vmatpush3.bf16.msra.mxu0 %v11410_v20  ;;  %9958 = vmatpush3.bf16.msra.mxu1 %v11411_v21  ;;  %v11466_v20 = vld [vmem:[#allocation2 + $0xfb0] ss:$20 sps:$4 sm:$0xff]  }
 0x32a   :  { %9937 = vmatprep.subr.bf16.mxu0 %v11412_v22  ;;  %9959 = vmatprep.subr.bf16.mxu1 %v11413_v23  ;;  %v11467_v21 = vld [vmem:[#allocation2 + $0x1230] ss:$20 sps:$4 sm:$0xff]   ;;  %v11468_v22 = vld [vmem:[#allocation2 + $0x1118] ss:$20 sps:$4 sm:$0xff]  }
 0x32b   :  { %v11469_v23 = vld [vmem:[#allocation2 + $0x1398] ss:$20 sps:$4 sm:$0xff]  }
 0x32d   :  { %9938 = vmatpush3.bf16.msra.mxu0 %v11414_v24  ;;  %9960 = vmatpush3.bf16.msra.mxu1 %v11415_v25  ;;  %v11470_v24 = vld [vmem:[#allocation2 + $0xfd8] ss:$20 sps:$4 sm:$0xff]  }
 0x32e   :  { %9967 = vmatprep.subr.bf16.mxu0 %v11416_v26  ;;  %9989 = vmatprep.subr.bf16.mxu1 %v11417_v27  ;;  %v11471_v25 = vld [vmem:[#allocation2 + $0x1258] ss:$20 sps:$4 sm:$0xff]   ;;  %v11472_v26 = vld [vmem:[#allocation2 + $0x1140] ss:$20 sps:$4 sm:$0xff]  }
 0x32f   :  { %v11473_v27 = vld [vmem:[#allocation2 + $0x13c0] ss:$20 sps:$4 sm:$0xff]  }
 0x330   :  { %6345 = vmatmul.mubr.bf16.vlgmr.msra.gmra.mrb[8].mxu0 %v11838_v32  ;;  %6386 = vmatmul.mubr.bf16.vlgmr.msra.gmra.mrb[8].mxu1 %v11839_v33  ;;  %v11478_v32 = vld [vmem:[#allocation2 + $0x1028] ss:$20 sps:$4 sm:$0xff]  }
 0x331   :  { %9968 = vmatpush3.bf16.msra.mxu0 %v11418_v28  ;;  %9990 = vmatpush3.bf16.msra.mxu1 %v11419_v29  ;;  %v11474_v28 = vld [vmem:[#allocation2 + $0x1000] ss:$20 sps:$4 sm:$0xff]   ;;  %v11479_v33 = vld [vmem:[#allocation2 + $0x12a8] ss:$20 sps:$4 sm:$0xff]  }
 0x332   :  { %9969 = vmatprep.subr.bf16.mxu0 %v11420_v30  ;;  %9991 = vmatprep.subr.bf16.mxu1 %v11421_v31  ;;  %v11475_v29 = vld [vmem:[#allocation2 + $0x1280] ss:$20 sps:$4 sm:$0xff]   ;;  %v11476_v30 = vld [vmem:[#allocation2 + $0x1168] ss:$20 sps:$4 sm:$0xff]  }
 0x333   :  { %6426 = vmatprep.mubr.bf16.mxu0 %v11840_v38  ;;  %6467 = vmatprep.mubr.bf16.mxu1 %v11841_v39  ;;  %v11477_v31 = vld [vmem:[#allocation2 + $0x13e8] ss:$20 sps:$4 sm:$0xff]   ;;  %v11484_v38 = vld [vmem:[#allocation2 + $0x1578] ss:$20 sps:$4 sm:$0xff]  }
 0x334   :  { %v11485_v39 = vld [vmem:[#allocation2 + $0x17f8] ss:$20 sps:$4 sm:$0xff]  }
 0x335   :  { %9970 = vmatpush3.bf16.msra.mxu0 %v11422_v34  ;;  %9992 = vmatpush3.bf16.msra.mxu1 %v11423_v35  ;;  %v11480_v34 = vld [vmem:[#allocation2 + $0x1550] ss:$20 sps:$4 sm:$0xff]  }
 0x336   :  { %9971 = vmatprep.subr.bf16.mxu0 %v11424_v36  ;;  %9993 = vmatprep.subr.bf16.mxu1 %v11425_v37  ;;  %v11481_v35 = vld [vmem:[#allocation2 + $0x17d0] ss:$20 sps:$4 sm:$0xff]  }
 0x337   :  { %v11482_v36 = vld [vmem:[#allocation2 + $0x1410] ss:$20 sps:$4 sm:$0xff]  }
 0x338   :  { %v11483_v37 = vld [vmem:[#allocation2 + $0x1690] ss:$20 sps:$4 sm:$0xff]  }
 0x339   :  { %9972 = vmatpush3.bf16.msra.mxu0 %v11426_v40  ;;  %9994 = vmatpush3.bf16.msra.mxu1 %v11427_v41  ;;  %v11846_v40 = vld [vmem:[%s12334_s0 + $0x30] ss:$80 sps:$4 sm:$0xff]   ;;  %v11847_v41 = vld [vmem:[%s12334_s0 + $0x38] ss:$80 sps:$4 sm:$0xff]  }
 0x33a   :  { %9973 = vmatprep.subr.bf16.mxu0 %v11428_v42  ;;  %9995 = vmatprep.subr.bf16.mxu1 %v11429_v43  ;;  %v11486_v42 = vld [vmem:[#allocation2 + $0x1438] ss:$20 sps:$4 sm:$0xff]  }
 0x33b   :  { %v11487_v43 = vld [vmem:[#allocation2 + $0x16b8] ss:$20 sps:$4 sm:$0xff]  }
 0x33d   :  { %9974 = vmatpush3.bf16.msra.mxu0 %v11430_v44  ;;  %9996 = vmatpush3.bf16.msra.mxu1 %v11431_v45  ;;  %v11488_v44 = vld [vmem:[#allocation2 + $0x15a0] ss:$20 sps:$4 sm:$0xff]  }
 0x33e   :  { %9975 = vmatprep.subr.bf16.mxu0 %v11432_v46  ;;  %9997 = vmatprep.subr.bf16.mxu1 %v11433_v47  ;;  %v11489_v45 = vld [vmem:[#allocation2 + $0x1820] ss:$20 sps:$4 sm:$0xff]   ;;  %v11849_v47 = vld [vmem:[%s12334_s0 + $0x4c] ss:$80 sps:$4 sm:$0xff]  }
 0x33f   :  { %v11848_v46 = vld [vmem:[%s12334_s0 + $0x44] ss:$80 sps:$4 sm:$0xff]  }
 0x341   :  { %9976 = vmatpush3.bf16.msra.mxu0 %v11434_v48  ;;  %9998 = vmatpush3.bf16.msra.mxu1 %v11435_v49  ;;  %v11490_v48 = vld [vmem:[#allocation2 + $0x1460] ss:$20 sps:$4 sm:$0xff]  }
 0x342   :  { %9977 = vmatprep.subr.bf16.mxu0 %v11436_v50  ;;  %9999 = vmatprep.subr.bf16.mxu1 %v11437_v51  ;;  %v11491_v49 = vld [vmem:[#allocation2 + $0x16e0] ss:$20 sps:$4 sm:$0xff]   ;;  %v11492_v50 = vld [vmem:[#allocation2 + $0x15c8] ss:$20 sps:$4 sm:$0xff]  }
 0x343   :  { %v11493_v51 = vld [vmem:[#allocation2 + $0x1848] ss:$20 sps:$4 sm:$0xff]  }
 0x345   :  { %9978 = vmatpush3.bf16.msra.mxu0 %v11438_v52  ;;  %10000 = vmatpush3.bf16.msra.mxu1 %v11439_v53  ;;  %v11494_v52 = vld [vmem:[#allocation2 + $0x1488] ss:$20 sps:$4 sm:$0xff]  }
 0x346   :  { %9979 = vmatprep.subr.bf16.mxu0 %v11440_v54  ;;  %10001 = vmatprep.subr.bf16.mxu1 %v11441_v55  ;;  %v11495_v53 = vld [vmem:[#allocation2 + $0x1708] ss:$20 sps:$4 sm:$0xff]   ;;  %v11496_v54 = vld [vmem:[#allocation2 + $0x15f0] ss:$20 sps:$4 sm:$0xff]  }
 0x347   :  { %v11497_v55 = vld [vmem:[#allocation2 + $0x1870] ss:$20 sps:$4 sm:$0xff]  }
 0x349   :  { %9980 = vmatpush3.bf16.msra.mxu0 %v11442_v56  ;;  %10002 = vmatpush3.bf16.msra.mxu1 %v11443_v57  ;;  %v11498_v56 = vld [vmem:[#allocation2 + $0x14b0] ss:$20 sps:$4 sm:$0xff]  }
 0x34a   :  { %9981 = vmatprep.subr.bf16.mxu0 %v11444_v58  ;;  %10003 = vmatprep.subr.bf16.mxu1 %v11445_v59  ;;  %v11499_v57 = vld [vmem:[#allocation2 + $0x1730] ss:$20 sps:$4 sm:$0xff]   ;;  %v11500_v58 = vld [vmem:[#allocation2 + $0x1618] ss:$20 sps:$4 sm:$0xff]  }
 0x34b   :  { %v11501_v59 = vld [vmem:[#allocation2 + $0x1898] ss:$20 sps:$4 sm:$0xff]  }
 0x34d   :  { %9982 = vmatpush3.bf16.msra.mxu0 %v11446_v60  ;;  %10004 = vmatpush3.bf16.msra.mxu1 %v11447_v61  ;;  %v11502_v60 = vld [vmem:[#allocation2 + $0x14d8] ss:$20 sps:$4 sm:$0xff]  }
 0x34e   :  { %10011 = vmatprep.subr.bf16.mxu0 %v11448_v62  ;;  %10033 = vmatprep.subr.bf16.mxu1 %v11449_v63  ;;  %v11503_v61 = vld [vmem:[#allocation2 + $0x1758] ss:$20 sps:$4 sm:$0xff]   ;;  %v11504_v62 = vld [vmem:[#allocation2 + $0x1640] ss:$20 sps:$4 sm:$0xff]  }
 0x34f   :  { %v11505_v63 = vld [vmem:[#allocation2 + $0x18c0] ss:$20 sps:$4 sm:$0xff]  }
 0x350   :  { %6427 = vmatmul.mubr.bf16.vlgmr.msra.gmra.mrb[12].mxu0 %v11842_v4  ;;  %6468 = vmatmul.mubr.bf16.vlgmr.msra.gmra.mrb[12].mxu1 %v11843_v5  ;;  %v11510_v4 = vld [vmem:[#allocation2 + $0x1528] ss:$20 sps:$4 sm:$0xff]  }
 0x351   :  { %10012 = vmatpush3.bf16.msra.mxu0 %v11450_v0  ;;  %10034 = vmatpush3.bf16.msra.mxu1 %v11451_v1  ;;  %v11506_v0 = vld [vmem:[#allocation2 + $0x1500] ss:$20 sps:$4 sm:$0xff]   ;;  %v11511_v5 = vld [vmem:[#allocation2 + $0x17a8] ss:$20 sps:$4 sm:$0xff]  }
 0x352   :  { %10013 = vmatprep.subr.bf16.mxu0 %v11452_v2  ;;  %10035 = vmatprep.subr.bf16.mxu1 %v11453_v3  ;;  %v11507_v1 = vld [vmem:[#allocation2 + $0x1780] ss:$20 sps:$4 sm:$0xff]   ;;  %v11508_v2 = vld [vmem:[#allocation2 + $0x1668] ss:$20 sps:$4 sm:$0xff]  }
 0x353   :  { %6508 = vmatprep.mubr.bf16.mxu0 %v11844_v10  ;;  %6549 = vmatprep.mubr.bf16.mxu1 %v11845_v11  ;;  %v11509_v3 = vld [vmem:[#allocation2 + $0x18e8] ss:$20 sps:$4 sm:$0xff]  }
 0x354   :  { %v11520_v10 = vld [vmem:[#allocation6 + $0x2c] ss:$20 sps:$4 sm:$0xff]   ;;  %v11523_v11 = vld [vmem:[#allocation6 + $0x34] ss:$20 sps:$4 sm:$0xff]  }
 0x355   :  { %10014 = vmatpush3.bf16.msra.mxu0 %v11454_v6  ;;  %10036 = vmatpush3.bf16.msra.mxu1 %v11455_v7  ;;  %v11514_v6 = vld [vmem:[#allocation6 + $0x4] ss:$20 sps:$4 sm:$0xff]   ;;  %v11517_v7 = vld [vmem:[#allocation6 + $0xc] ss:$20 sps:$4 sm:$0xff]  }
 0x356   :  { %10015 = vmatprep.subr.bf16.mxu0 %v11456_v8  ;;  %10037 = vmatprep.subr.bf16.mxu1 %v11457_v9  ;;  %v11512_v8 = vld [vmem:[#allocation6] ss:$20 sps:$4 sm:$0xff]   ;;  %v11515_v9 = vld [vmem:[#allocation6 + $0x8] ss:$20 sps:$4 sm:$0xff]  }
 0x359   :  { %10016 = vmatpush3.bf16.msra.mxu0 %v11458_v12  ;;  %10038 = vmatpush3.bf16.msra.mxu1 %v11459_v13  ;;  %v11850_v12 = vld [vmem:[%s12334_s0 + $0x40] ss:$80 sps:$4 sm:$0xff]   ;;  %v11851_v13 = vld [vmem:[%s12334_s0 + $0x48] ss:$80 sps:$4 sm:$0xff]  }
 0x35a   :  { %10017 = vmatprep.subr.bf16.mxu0 %v11460_v14  ;;  %10039 = vmatprep.subr.bf16.mxu1 %v11461_v15  ;;  %v11518_v14 = vld [vmem:[#allocation6 + $0x28] ss:$20 sps:$4 sm:$0xff]   ;;  %v11521_v15 = vld [vmem:[#allocation6 + $0x30] ss:$20 sps:$4 sm:$0xff]  }
 0x35d   :  { %10018 = vmatpush3.bf16.msra.mxu0 %v11462_v16  ;;  %10040 = vmatpush3.bf16.msra.mxu1 %v11463_v17  ;;  %v11526_v16 = vld [vmem:[#allocation6 + $0x54] ss:$20 sps:$4 sm:$0xff]   ;;  %v11529_v17 = vld [vmem:[#allocation6 + $0x5c] ss:$20 sps:$4 sm:$0xff]  }
 0x35e   :  { %10019 = vmatprep.subr.bf16.mxu0 %v11464_v18  ;;  %10041 = vmatprep.subr.bf16.mxu1 %v11465_v19  ;;  %v11524_v18 = vld [vmem:[#allocation6 + $0x50] ss:$20 sps:$4 sm:$0xff]   ;;  %v11527_v19 = vld [vmem:[#allocation6 + $0x58] ss:$20 sps:$4 sm:$0xff]  }
 0x361   :  { %10020 = vmatpush3.bf16.msra.mxu0 %v11466_v20  ;;  %10042 = vmatpush3.bf16.msra.mxu1 %v11467_v21  ;;  %v11532_v20 = vld [vmem:[#allocation6 + $0x7c] ss:$20 sps:$4 sm:$0xff]   ;;  %v11535_v21 = vld [vmem:[#allocation6 + $0x84] ss:$20 sps:$4 sm:$0xff]  }
 0x362   :  { %10021 = vmatprep.subr.bf16.mxu0 %v11468_v22  ;;  %10043 = vmatprep.subr.bf16.mxu1 %v11469_v23  ;;  %v11530_v22 = vld [vmem:[#allocation6 + $0x78] ss:$20 sps:$4 sm:$0xff]   ;;  %v11533_v23 = vld [vmem:[#allocation6 + $0x80] ss:$20 sps:$4 sm:$0xff]  }
 0x365   :  { %10022 = vmatpush3.bf16.msra.mxu0 %v11470_v24  ;;  %10044 = vmatpush3.bf16.msra.mxu1 %v11471_v25  ;;  %v11538_v24 = vld [vmem:[#allocation6 + $0xa4] ss:$20 sps:$4 sm:$0xff]   ;;  %v11541_v25 = vld [vmem:[#allocation6 + $0xac] ss:$20 sps:$4 sm:$0xff]  }
 0x366   :  { %10023 = vmatprep.subr.bf16.mxu0 %v11472_v26  ;;  %10045 = vmatprep.subr.bf16.mxu1 %v11473_v27  ;;  %v11536_v26 = vld [vmem:[#allocation6 + $0xa0] ss:$20 sps:$4 sm:$0xff]   ;;  %v11539_v27 = vld [vmem:[#allocation6 + $0xa8] ss:$20 sps:$4 sm:$0xff]  }
 0x369   :  { %10024 = vmatpush3.bf16.msra.mxu0 %v11474_v28  ;;  %10046 = vmatpush3.bf16.msra.mxu1 %v11475_v29  ;;  %v11544_v28 = vld [vmem:[#allocation6 + $0xcc] ss:$20 sps:$4 sm:$0xff]   ;;  %v11547_v29 = vld [vmem:[#allocation6 + $0xd4] ss:$20 sps:$4 sm:$0xff]  }
 0x36a   :  { %10025 = vmatprep.subr.bf16.mxu0 %v11476_v30  ;;  %10047 = vmatprep.subr.bf16.mxu1 %v11477_v31  ;;  %v11542_v30 = vld [vmem:[#allocation6 + $0xc8] ss:$20 sps:$4 sm:$0xff]   ;;  %v11545_v31 = vld [vmem:[#allocation6 + $0xd0] ss:$20 sps:$4 sm:$0xff]  }
 0x36d   :  { %10026 = vmatpush3.bf16.msra.mxu0 %v11478_v32  ;;  %10048 = vmatpush3.bf16.msra.mxu1 %v11479_v33  ;;  %v11550_v32 = vld [vmem:[#allocation6 + $0xf4] ss:$20 sps:$4 sm:$0xff]   ;;  %v11553_v33 = vld [vmem:[#allocation6 + $0xfc] ss:$20 sps:$4 sm:$0xff]  }
 0x36e   :  { %10055 = vmatprep.subr.bf16.mxu0 %v11480_v34  ;;  %10077 = vmatprep.subr.bf16.mxu1 %v11481_v35  ;;  %v11548_v34 = vld [vmem:[#allocation6 + $0xf0] ss:$20 sps:$4 sm:$0xff]   ;;  %v11551_v35 = vld [vmem:[#allocation6 + $0xf8] ss:$20 sps:$4 sm:$0xff]  }
 0x370   :  { %6509 = vmatmul.mubr.bf16.vlgmr.msra.gmra.mrb[16].mxu0 %v11846_v40  ;;  %6550 = vmatmul.mubr.bf16.vlgmr.msra.gmra.mrb[16].mxu1 %v11847_v41  ;;  %v11562_v40 = vld [vmem:[#allocation6 + $0x144] ss:$20 sps:$4 sm:$0xff]   ;;  %v11565_v41 = vld [vmem:[#allocation6 + $0x14c] ss:$20 sps:$4 sm:$0xff]  }
 0x371   :  { %10056 = vmatpush3.bf16.msra.mxu0 %v11482_v36  ;;  %10078 = vmatpush3.bf16.msra.mxu1 %v11483_v37  ;;  %v11556_v36 = vld [vmem:[#allocation6 + $0x11c] ss:$20 sps:$4 sm:$0xff]   ;;  %v11559_v37 = vld [vmem:[#allocation6 + $0x124] ss:$20 sps:$4 sm:$0xff]  }
 0x372   :  { %10057 = vmatprep.subr.bf16.mxu0 %v11484_v38  ;;  %10079 = vmatprep.subr.bf16.mxu1 %v11485_v39  ;;  %v11554_v38 = vld [vmem:[#allocation6 + $0x118] ss:$20 sps:$4 sm:$0xff]   ;;  %v11557_v39 = vld [vmem:[#allocation6 + $0x120] ss:$20 sps:$4 sm:$0xff]  }
 0x373   :  { %6590 = vmatprep.mubr.bf16.mxu0 %v11848_v46  ;;  %6631 = vmatprep.mubr.bf16.mxu1 %v11849_v47  ;;  %v11566_v46 = vld [vmem:[#allocation6 + $0x168] ss:$20 sps:$4 sm:$0xff]   ;;  %v11569_v47 = vld [vmem:[#allocation6 + $0x170] ss:$20 sps:$4 sm:$0xff]  }
 0x375   :  { %10058 = vmatpush3.bf16.msra.mxu0 %v11486_v42  ;;  %10080 = vmatpush3.bf16.msra.mxu1 %v11487_v43  ;;  %v11560_v42 = vld [vmem:[#allocation6 + $0x140] ss:$20 sps:$4 sm:$0xff]   ;;  %v11563_v43 = vld [vmem:[#allocation6 + $0x148] ss:$20 sps:$4 sm:$0xff]  }
 0x376   :  { %10059 = vmatprep.subr.bf16.mxu0 %v11488_v44  ;;  %10081 = vmatprep.subr.bf16.mxu1 %v11489_v45  ;;  %v11568_v44 = vld [vmem:[#allocation6 + $0x16c] ss:$20 sps:$4 sm:$0xff]   ;;  %v11571_v45 = vld [vmem:[#allocation6 + $0x174] ss:$20 sps:$4 sm:$0xff]  }
 0x379   :  { %10060 = vmatpush3.bf16.msra.mxu0 %v11490_v48  ;;  %10082 = vmatpush3.bf16.msra.mxu1 %v11491_v49  ;;  %v11574_v48 = vld [vmem:[#allocation6 + $0x194] ss:$20 sps:$4 sm:$0xff]   ;;  %v11577_v49 = vld [vmem:[#allocation6 + $0x19c] ss:$20 sps:$4 sm:$0xff]  }
 0x37a   :  { %10061 = vmatprep.subr.bf16.mxu0 %v11492_v50  ;;  %10083 = vmatprep.subr.bf16.mxu1 %v11493_v51  ;;  %v1085_v50 = vlaneseq  ;;  %v11572_v51 = vld [vmem:[#allocation6 + $0x190] ss:$20 sps:$4 sm:$0xff]  }
 0x37d   :  { %10062 = vmatpush3.bf16.msra.mxu0 %v11494_v52  ;;  %10084 = vmatpush3.bf16.msra.mxu1 %v11495_v53  ;;  %v11575_v52 = vld [vmem:[#allocation6 + $0x198] ss:$20 sps:$4 sm:$0xff]   ;;  %v11580_v53 = vld [vmem:[#allocation6 + $0x1bc] ss:$20 sps:$4 sm:$0xff]  }
 0x37e   :  { %10063 = vmatprep.subr.bf16.mxu0 %v11496_v54  ;;  %10085 = vmatprep.subr.bf16.mxu1 %v11497_v55  ;;  %v11583_v54 = vld [vmem:[#allocation6 + $0x1c4] ss:$20 sps:$4 sm:$0xff]   ;;  %v12237_v55 = vshrl.u32 %v1085_v50, 7  ;;  %v11611_v50 = vld [vmem:[#allocation6 + $0x288] ss:$20 sps:$4 sm:$0xff]  }
 0x381   :  { %10064 = vmatpush3.bf16.msra.mxu0 %v11498_v56  ;;  %10086 = vmatpush3.bf16.msra.mxu1 %v11499_v57  ;;  %v11578_v56 = vld [vmem:[#allocation6 + $0x1b8] ss:$20 sps:$4 sm:$0xff]   ;;  %v11581_v57 = vld [vmem:[#allocation6 + $0x1c0] ss:$20 sps:$4 sm:$0xff]  }
 0x382   :  { %10065 = vmatprep.subr.bf16.mxu0 %v11500_v58  ;;  %10087 = vmatprep.subr.bf16.mxu1 %v11501_v59  ;;  %v11586_v58 = vld [vmem:[#allocation6 + $0x1e4] ss:$20 sps:$4 sm:$0xff]   ;;  %v11589_v59 = vld [vmem:[#allocation6 + $0x1ec] ss:$20 sps:$4 sm:$0xff]  }
 0x385   :  { %10066 = vmatpush3.bf16.msra.mxu0 %v11502_v60  ;;  %10088 = vmatpush3.bf16.msra.mxu1 %v11503_v61  ;;  %v11584_v60 = vld [vmem:[#allocation6 + $0x1e0] ss:$20 sps:$4 sm:$0xff]   ;;  %v1087_v61 = vsub.s32 0, %v12237_v55 }
 0x386   :  { %10067 = vmatprep.subr.bf16.mxu0 %v11504_v62  ;;  %10089 = vmatprep.subr.bf16.mxu1 %v11505_v63  ;;  %v1095_v62 = vsub.s32 2, %v12237_v55  ;;  %v11587_v63 = vld [vmem:[#allocation6 + $0x1e8] ss:$20 sps:$4 sm:$0xff]  }
 0x389   :  { %10068 = vmatpush3.bf16.msra.mxu0 %v11506_v0  ;;  %10090 = vmatpush3.bf16.msra.mxu1 %v11507_v1  ;;  %v12241_v0 = vld [vmem:[#allocation4] sm:$0x1f]  ;;  %v1091_v1 = vsub.s32 1, %v12237_v55 }
 0x38a   :  { %10069 = vmatprep.subr.bf16.mxu0 %v11508_v2  ;;  %10091 = vmatprep.subr.bf16.mxu1 %v11509_v3  ;;  %v1099_v2 = vsub.s32 3, %v12237_v55  ;;  %v11592_v3 = vld [vmem:[#allocation6 + $0x20c] ss:$20 sps:$4 sm:$0xff]  }
 0x38d   :  { %10070 = vmatpush3.bf16.msra.mxu0 %v11510_v4  ;;  %10092 = vmatpush3.bf16.msra.mxu1 %v11511_v5  ;;  %v11595_v4 = vld [vmem:[#allocation6 + $0x214] ss:$20 sps:$4 sm:$0xff]   ;;  %v1088_v5 = vrot.slane %v12241_v0, %v1087_v61 }
 0x38e   :  { %7962 = vmatprep.subr.bf16.mxu0 %v11514_v6  ;;  %8091 = vmatprep.subr.bf16.mxu1 %v11517_v7  ;;  %v1096_v6 = vrot.slane %v12241_v0, %v1095_v62  ;;  %v1092_v7 = vrot.slane %v12241_v0, %v1091_v1 }
 0x390   :  { %6591 = vmatmul.mubr.bf16.vlgmr.msra.gmra.mrb[20].mxu0 %v11850_v12  ;;  %6632 = vmatmul.mubr.bf16.vlgmr.msra.gmra.mrb[20].mxu1 %v11851_v13  ;;  %v11601_v12 = vld [vmem:[#allocation6 + $0x23c] ss:$20 sps:$4 sm:$0xff]  }
 0x391   :  { %7963 = vmatpush1.bf16.msra.mxu0 %v11512_v8  ;;  %8092 = vmatpush1.bf16.msra.mxu1 %v11515_v9  ;;  %v1100_v8 = vrot.slane %v12241_v0, %v1099_v2  ;;  %v11590_v9 = vld [vmem:[#allocation6 + $0x208] ss:$20 sps:$4 sm:$0xff]  }
 0x392   :  { %7964 = vmatprep.subr.bf16.mxu0 %v11520_v10  ;;  %8093 = vmatprep.subr.bf16.mxu1 %v11523_v11  ;;  %v11593_v10 = vld [vmem:[#allocation6 + $0x210] ss:$20 sps:$4 sm:$0xff]   ;;  %v11598_v11 = vld [vmem:[#allocation6 + $0x234] ss:$20 sps:$4 sm:$0xff]  }
 0x395   :  { %7965 = vmatpush1.bf16.msra.mxu0 %v11518_v14  ;;  %8094 = vmatpush1.bf16.msra.mxu1 %v11521_v15 }
 0x396   :  { %7966 = vmatprep.subr.bf16.mxu0 %v11526_v16  ;;  %8095 = vmatprep.subr.bf16.mxu1 %v11529_v17 }
 0x399   :  { %7967 = vmatpush1.bf16.msra.mxu0 %v11524_v18  ;;  %8096 = vmatpush1.bf16.msra.mxu1 %v11527_v19 }
 0x39a   :  { %7968 = vmatprep.subr.bf16.mxu0 %v11532_v20  ;;  %8097 = vmatprep.subr.bf16.mxu1 %v11535_v21 }
 0x39d   :  { %7969 = vmatpush1.bf16.msra.mxu0 %v11530_v22  ;;  %8098 = vmatpush1.bf16.msra.mxu1 %v11533_v23  ;;  %v11596_v23 = vld [vmem:[#allocation6 + $0x230] ss:$20 sps:$4 sm:$0xff]  }
 0x39e   :  { %7970 = vmatprep.subr.bf16.mxu0 %v11538_v24  ;;  %8099 = vmatprep.subr.bf16.mxu1 %v11541_v25  ;;  %v11599_v24 = vld [vmem:[#allocation6 + $0x238] ss:$20 sps:$4 sm:$0xff]  }
 0x3a1   :  { %7971 = vmatpush1.bf16.msra.mxu0 %v11536_v26  ;;  %8100 = vmatpush1.bf16.msra.mxu1 %v11539_v27 }
 0x3a2   :  { %7972 = vmatprep.subr.bf16.mxu0 %v11544_v28  ;;  %8101 = vmatprep.subr.bf16.mxu1 %v11547_v29  ;;  %v11604_v29 = vld [vmem:[#allocation6 + $0x25c] ss:$20 sps:$4 sm:$0xff]  }
 0x3a5   :  { %7973 = vmatpush1.bf16.msra.mxu0 %v11542_v30  ;;  %8102 = vmatpush1.bf16.msra.mxu1 %v11545_v31  ;;  %v11607_v30 = vld [vmem:[#allocation6 + $0x264] ss:$20 sps:$4 sm:$0xff]  }
 0x3a6   :  { %7974 = vmatprep.subr.bf16.mxu0 %v11550_v32  ;;  %8103 = vmatprep.subr.bf16.mxu1 %v11553_v33 }
 0x3a9   :  { %7975 = vmatpush1.bf16.msra.mxu0 %v11548_v34  ;;  %8104 = vmatpush1.bf16.msra.mxu1 %v11551_v35 }
 0x3aa   :  { %7976 = vmatprep.subr.bf16.mxu0 %v11556_v36  ;;  %8105 = vmatprep.subr.bf16.mxu1 %v11559_v37 }
 0x3ad   :  { %7977 = vmatpush1.bf16.msra.mxu0 %v11554_v38  ;;  %8106 = vmatpush1.bf16.msra.mxu1 %v11557_v39 }
 0x3ae   :  { %7978 = vmatprep.subr.bf16.mxu0 %v11562_v40  ;;  %8107 = vmatprep.subr.bf16.mxu1 %v11565_v41  ;;  %v11602_v41 = vld [vmem:[#allocation6 + $0x258] ss:$20 sps:$4 sm:$0xff]  }
 0x3b1   :  { %7979 = vmatpush1.bf16.msra.mxu0 %v11560_v42  ;;  %8108 = vmatpush1.bf16.msra.mxu1 %v11563_v43 }
 0x3b2   :  { %7980 = vmatprep.subr.bf16.mxu0 %v11568_v44  ;;  %8109 = vmatprep.subr.bf16.mxu1 %v11571_v45  ;;  %v11605_v44 = vld [vmem:[#allocation6 + $0x260] ss:$20 sps:$4 sm:$0xff]  }
 0x3b5   :  { %7981 = vmatpush1.bf16.msra.mxu0 %v11566_v46  ;;  %8110 = vmatpush1.bf16.msra.mxu1 %v11569_v47  ;;  %v11610_v47 = vld [vmem:[#allocation6 + $0x284] ss:$20 sps:$4 sm:$0xff]  }
 0x3b6   :  { %7982 = vmatprep.subr.bf16.mxu0 %v11574_v48  ;;  %8111 = vmatprep.subr.bf16.mxu1 %v11577_v49  ;;  %v11613_v48 = vld [vmem:[#allocation6 + $0x28c] ss:$20 sps:$4 sm:$0xff]  }
 0x3b7   :  { %v11608_v49 = vld [vmem:[#allocation6 + $0x280] ss:$20 sps:$4 sm:$0xff]  }
 0x3b9   :  { %7983 = vmatpush1.bf16.msra.mxu0 %v11572_v51  ;;  %8112 = vmatpush1.bf16.msra.mxu1 %v11575_v52  ;;  %v11616_v51 = vld [vmem:[#allocation6 + $0x2ac] ss:$20 sps:$4 sm:$0xff]   ;;  %v11619_v52 = vld [vmem:[#allocation6 + $0x2b4] ss:$20 sps:$4 sm:$0xff]  }
 0x3ba   :  { %7984 = vmatprep.subr.bf16.mxu0 %v11580_v53  ;;  %8113 = vmatprep.subr.bf16.mxu1 %v11583_v54  ;;  %v11614_v53 = vld [vmem:[#allocation6 + $0x2a8] ss:$20 sps:$4 sm:$0xff]   ;;  %v11617_v54 = vld [vmem:[#allocation6 + $0x2b0] ss:$20 sps:$4 sm:$0xff]  }
 0x3bd   :  { %7985 = vmatpush1.bf16.msra.mxu0 %v11578_v56  ;;  %8114 = vmatpush1.bf16.msra.mxu1 %v11581_v57  ;;  %v11622_v56 = vld [vmem:[#allocation6 + $0x2d4] ss:$20 sps:$4 sm:$0xff]   ;;  %v11625_v57 = vld [vmem:[#allocation6 + $0x2dc] ss:$20 sps:$4 sm:$0xff]  }
 0x3be   :  { %7986 = vmatprep.subr.bf16.mxu0 %v11586_v58  ;;  %8115 = vmatprep.subr.bf16.mxu1 %v11589_v59  ;;  %v11620_v58 = vld [vmem:[#allocation6 + $0x2d0] ss:$20 sps:$4 sm:$0xff]   ;;  %v11623_v59 = vld [vmem:[#allocation6 + $0x2d8] ss:$20 sps:$4 sm:$0xff]  }
 0x3c1   :  { %7987 = vmatpush1.bf16.msra.mxu0 %v11584_v60  ;;  %8116 = vmatpush1.bf16.msra.mxu1 %v11587_v63  ;;  %v11628_v60 = vld [vmem:[#allocation6 + $0x2fc] ss:$20 sps:$4 sm:$0xff]   ;;  %v11631_v63 = vld [vmem:[#allocation6 + $0x304] ss:$20 sps:$4 sm:$0xff]  }
 0x3c2   :  { %7988 = vmatprep.subr.bf16.mxu0 %v11592_v3  ;;  %8117 = vmatprep.subr.bf16.mxu1 %v11595_v4  ;;  %v11626_v3 = vld [vmem:[#allocation6 + $0x2f8] ss:$20 sps:$4 sm:$0xff]   ;;  %v11629_v4 = vld [vmem:[#allocation6 + $0x300] ss:$20 sps:$4 sm:$0xff]  }
 0x3c3   :  { %v5791_v13 = vpop.f32.mrb[0].mxu0  ;;  %v6221_v14 = vpop.f32.mrb[0].mxu1 }
 0x3c4   :  { %v10245_v15 = vadd.f32 %v5791_v13, %v1088_v5  ;;  %v10249_v16 = vadd.f32 %v6221_v14, %v1096_v6  ;;  %v5793_v17 = vpop.f32.mrb[1].mxu0  ;;  %v6223_v18 = vpop.f32.mrb[1].mxu1  ;;  %v11641_v13 = vld [vmem:[#allocation6 + $0x350] ss:$20 sps:$4 sm:$0xff]   ;;  %v11646_v14 = vld [vmem:[#allocation6 + $0x374] ss:$20 sps:$4 sm:$0xff]  }
 0x3c5   :  { %v10246_v19 = vadd.f32 %v5793_v17, %v1092_v7  ;;  %v10250_v20 = vadd.f32 %v6223_v18, %v1100_v8  ;;  %v5795_v21 = vpop.f32.mrb[2].mxu0  ;;  %v6225_v22 = vpop.f32.mrb[2].mxu1  ;;  %7989 = vmatpush1.bf16.msra.mxu0 %v11590_v9  ;;  %8118 = vmatpush1.bf16.msra.mxu1 %v11593_v10  ;;  %v11640_v9 = vld [vmem:[#allocation6 + $0x34c] ss:$20 sps:$4 sm:$0xff]   ;;  %v1103_v10 = vsub.s32 4, %v12237_v55 }
 0x3c6   :  { %v10247_v25 = vadd.f32 %v5795_v21, %v1088_v5  ;;  %v10251_v26 = vadd.f32 %v6225_v22, %v1096_v6  ;;  %v5797_v27 = vpop.f32.mrb[3].mxu0  ;;  %v6227_v28 = vpop.f32.mrb[3].mxu1  ;;  %7990 = vmatprep.subr.bf16.mxu0 %v11598_v11  ;;  %8119 = vmatprep.subr.bf16.mxu1 %v11601_v12  ;;  %v6640_v33 = vmax.f32 %v10245_v15, 0.0  ;;  %v6642_v34 = vmax.f32 %v10249_v16, 0.0  ;;  %v11634_v5 = vld [vmem:[#allocation6 + $0x324] ss:$20 sps:$4 sm:$0xff]  }
 0x3c7   :  { %v10248_v31 = vadd.f32 %v5797_v27, %v1092_v7  ;;  %v10252_v32 = vadd.f32 %v6227_v28, %v1100_v8  ;;  %v6641_v37 = vmax.f32 %v10246_v19, 0.0  ;;  %v6643_v38 = vmax.f32 %v10250_v20, 0.0  ;;  %v11637_v6 = vld [vmem:[#allocation6 + $0x32c] ss:$20 sps:$4 sm:$0xff]   ;;  %v11635_v8 = vld [vmem:[#allocation6 + $0x328] ss:$20 sps:$4 sm:$0xff]  }
 0x3c8   :  { %v6645_v35 = vmax.f32 %v10247_v25, 0.0  ;;  %v6647_v36 = vmax.f32 %v10251_v26, 0.0  ;;  %v11632_v7 = vld [vmem:[#allocation6 + $0x320] ss:$20 sps:$4 sm:$0xff]   ;;  %v11638_v12 = vld [vmem:[#allocation6 + $0x348] ss:$20 sps:$4 sm:$0xff]   ;;  %v1104_v17 = vrot.slane %v12241_v0, %v1103_v10 }
 0x3c9   :  { %v6646_v39 = vmax.f32 %v10248_v31, 0.0  ;;  %v6648_v40 = vmax.f32 %v10252_v32, 0.0  ;;  %7991 = vmatpush1.bf16.msra.mxu0 %v11596_v23  ;;  %8120 = vmatpush1.bf16.msra.mxu1 %v11599_v24  ;;  %v11643_v11 = vld [vmem:[#allocation6 + $0x354] ss:$20 sps:$4 sm:$0xff]   ;;  %v11649_v18 = vld [vmem:[#allocation6 + $0x37c] ss:$20 sps:$4 sm:$0xff]  }
 0x3ca   :  { %v12257_v42 = vpack.c.bf16 %v6645_v35, %v6640_v33  ;;  %v12259_v43 = vpack.c.bf16 %v6647_v36, %v6642_v34  ;;  %7992 = vmatprep.subr.bf16.mxu0 %v11604_v29  ;;  %8121 = vmatprep.subr.bf16.mxu1 %v11607_v30  ;;  %v11644_v25 = vld [vmem:[#allocation6 + $0x370] ss:$20 sps:$4 sm:$0xff]   ;;  %v11647_v28 = vld [vmem:[#allocation6 + $0x378] ss:$20 sps:$4 sm:$0xff]   ;;  %v11653_v36 = vld [vmem:[#allocation6 + $0x3a0] ss:$20 sps:$4 sm:$0xff]  }
 0x3cb   :  { %v12261_v45 = vpack.c.bf16 %v6646_v39, %v6641_v37  ;;  %v12263_v46 = vpack.c.bf16 %v6648_v40, %v6643_v38  ;;  %v11652_v29 = vld [vmem:[#allocation6 + $0x39c] ss:$20 sps:$4 sm:$0xff]   ;;  %v11655_v0 = vld [vmem:[#allocation6 + $0x3a4] ss:$20 sps:$4 sm:$0xff]   ;;  %v11661_v39 = vld [vmem:[#allocation6 + $0x3cc] ss:$20 sps:$4 sm:$0xff]  }
 0x3cc   :  { %v11650_v35 = vld [vmem:[#allocation6 + $0x398] ss:$20 sps:$4 sm:$0xff]   ;;  %v11656_v40 = vld [vmem:[#allocation6 + $0x3c0] ss:$20 sps:$4 sm:$0xff]  }
 0x3cd   :  { %7993 = vmatpush1.bf16.msra.mxu0 %v11602_v41  ;;  %7994 = vmatprep.mubr.bf16.mxu0 %v12261_v45  ;;  %v11658_v37 = vld [vmem:[#allocation6 + $0x3c4] ss:$20 sps:$4 sm:$0xff]   ;;  %v11659_v41 = vld [vmem:[#allocation6 + $0x3c8] ss:$20 sps:$4 sm:$0xff]  }
 0x3ce   :  { %8122 = vmatpush1.bf16.msra.mxu1 %v11605_v44  ;;  %8123 = vmatprep.mubr.bf16.mxu1 %v12261_v45  ;;  %v11664_v44 = vld [vmem:[#allocation6 + $0x3ec] ss:$20 sps:$4 sm:$0xff]  }
 0x3cf   :  { %8005 = vmatprep.subr.bf16.mxu0 %v11610_v47  ;;  %8134 = vmatprep.subr.bf16.mxu1 %v11613_v48  ;;  %v11667_v47 = vld [vmem:[#allocation6 + $0x3f4] ss:$20 sps:$4 sm:$0xff]  }
 0x3d0   :  { %7995 = vmatmul.mubr.bf16.vlgmr.msra.gmra.mrb[24].mxu0 %v12257_v42  ;;  %v11662_v48 = vld [vmem:[#allocation6 + $0x3e8] ss:$20 sps:$4 sm:$0xff]  }
 0x3d1   :  { %8124 = vmatmul.mubr.bf16.vlgmr.msra.gmra.mrb[24].mxu1 %v12257_v42  ;;  %8006 = vmatpush1.bf16.msra.mxu0 %v11608_v49  ;;  %v11665_v49 = vld [vmem:[#allocation6 + $0x3f0] ss:$20 sps:$4 sm:$0xff]  }
 0x3d2   :  { %8037 = vmatprep.mubr.bf16.mxu0 %v12263_v46  ;;  %8135 = vmatpush1.bf16.msra.mxu1 %v11611_v50  ;;  %v11670_v50 = vld [vmem:[#allocation6 + $0x414] ss:$20 sps:$4 sm:$0xff]  }
 0x3d3   :  { %8166 = vmatprep.mubr.bf16.mxu1 %v12263_v46  ;;  %8007 = vmatprep.subr.bf16.mxu0 %v11616_v51  ;;  %v11673_v51 = vld [vmem:[#allocation6 + $0x41c] ss:$20 sps:$4 sm:$0xff]  }
 0x3d4   :  { %8136 = vmatprep.subr.bf16.mxu1 %v11619_v52  ;;  %v11668_v52 = vld [vmem:[#allocation6 + $0x410] ss:$20 sps:$4 sm:$0xff]  }
 0x3d5   :  { %8008 = vmatpush1.bf16.msra.mxu0 %v11614_v53  ;;  %v11671_v53 = vld [vmem:[#allocation6 + $0x418] ss:$20 sps:$4 sm:$0xff]  }
 0x3d6   :  { %8137 = vmatpush1.bf16.msra.mxu1 %v11617_v54  ;;  %8009 = vmatprep.subr.bf16.mxu0 %v11622_v56  ;;  %v11676_v54 = vld [vmem:[#allocation6 + $0x43c] ss:$20 sps:$4 sm:$0xff]   ;;  %v11679_v56 = vld [vmem:[#allocation6 + $0x444] ss:$20 sps:$4 sm:$0xff]  }
 0x3d7   :  { %8138 = vmatprep.subr.bf16.mxu1 %v11625_v57  ;;  %v11674_v57 = vld [vmem:[#allocation6 + $0x438] ss:$20 sps:$4 sm:$0xff]  }
 0x3d9   :  { %8010 = vmatpush1.bf16.msra.mxu0 %v11620_v58  ;;  %v11677_v58 = vld [vmem:[#allocation6 + $0x440] ss:$20 sps:$4 sm:$0xff]  }
 0x3da   :  { %8139 = vmatpush1.bf16.msra.mxu1 %v11623_v59  ;;  %8011 = vmatprep.subr.bf16.mxu0 %v11628_v60  ;;  %v11682_v59 = vld [vmem:[#allocation6 + $0x464] ss:$20 sps:$4 sm:$0xff]   ;;  %v11685_v60 = vld [vmem:[#allocation6 + $0x46c] ss:$20 sps:$4 sm:$0xff]  }
 0x3db   :  { %8140 = vmatprep.subr.bf16.mxu1 %v11631_v63  ;;  %v11680_v63 = vld [vmem:[#allocation6 + $0x460] ss:$20 sps:$4 sm:$0xff]  }
 0x3dd   :  { %8012 = vmatpush1.bf16.msra.mxu0 %v11626_v3  ;;  %v11683_v3 = vld [vmem:[#allocation6 + $0x468] ss:$20 sps:$4 sm:$0xff]  }
 0x3de   :  { %8141 = vmatpush1.bf16.msra.mxu1 %v11629_v4  ;;  %8013 = vmatprep.subr.bf16.mxu0 %v11634_v5  ;;  %v11688_v4 = vld [vmem:[#allocation6 + $0x48c] ss:$20 sps:$4 sm:$0xff]   ;;  %v11691_v5 = vld [vmem:[#allocation6 + $0x494] ss:$20 sps:$4 sm:$0xff]  }
 0x3df   :  { %8142 = vmatprep.subr.bf16.mxu1 %v11637_v6  ;;  %v11686_v6 = vld [vmem:[#allocation6 + $0x488] ss:$20 sps:$4 sm:$0xff]  }
 0x3e1   :  { %8014 = vmatpush1.bf16.msra.mxu0 %v11632_v7  ;;  %v11689_v7 = vld [vmem:[#allocation6 + $0x490] ss:$20 sps:$4 sm:$0xff]  }
 0x3e2   :  { %8143 = vmatpush1.bf16.msra.mxu1 %v11635_v8  ;;  %8015 = vmatprep.subr.bf16.mxu0 %v11640_v9  ;;  %v11694_v8 = vld [vmem:[#allocation6 + $0x4b4] ss:$20 sps:$4 sm:$0xff]  }
 0x3e3   :  { %v9895_v15 = vpop.f32.mrb[4].mxu0  ;;  %v9917_v16 = vpop.f32.mrb[4].mxu1  ;;  %8144 = vmatprep.subr.bf16.mxu1 %v11643_v11 }
 0x3e4   :  { %v9896_v19 = vpop.f32.mrb[5].mxu0  ;;  %v9918_v20 = vpop.f32.mrb[5].mxu1 }
 0x3e5   :  { %v9897_v21 = vadd.f32 %v9896_v19, %v9895_v15  ;;  %v9919_v22 = vadd.f32 %v9918_v20, %v9917_v16  ;;  %v9898_v23 = vpop.f32.mrb[6].mxu0  ;;  %v9920_v24 = vpop.f32.mrb[6].mxu1  ;;  %8016 = vmatpush1.bf16.msra.mxu0 %v11638_v12  ;;  %v11697_v12 = vld [vmem:[#allocation6 + $0x4bc] ss:$20 sps:$4 sm:$0xff]  }
 0x3e6   :  { %8145 = vmatpush1.bf16.msra.mxu1 %v11641_v13  ;;  %v9899_v26 = vpop.f32.mrb[7].mxu0  ;;  %v9921_v27 = vpop.f32.mrb[7].mxu1  ;;  %8017 = vmatprep.subr.bf16.mxu0 %v11646_v14  ;;  %v11692_v19 = vld [vmem:[#allocation6 + $0x4b0] ss:$20 sps:$4 sm:$0xff]  }
 0x3e7   :  { %v6265_v30 = vadd.f32 %v9897_v21, %v1104_v17  ;;  %v9900_v31 = vadd.f32 %v9899_v26, %v9898_v23  ;;  %v9922_v32 = vadd.f32 %v9921_v27, %v9920_v24  ;;  %8146 = vmatprep.subr.bf16.mxu1 %v11649_v18  ;;  %v11700_v23 = vld [vmem:[#allocation6 + $0x4dc] ss:$20 sps:$4 sm:$0xff]   ;;  %v11703_v27 = vld [vmem:[#allocation6 + $0x4e4] ss:$20 sps:$4 sm:$0xff]  }
 0x3e9   :  { %v12275_v33 = vadd.f32 %v9919_v22, %v6265_v30  ;;  %v6268_v34 = vadd.f32 %v9900_v31, %v1104_v17  ;;  %8018 = vmatpush1.bf16.msra.mxu0 %v11644_v25  ;;  %v11695_v22 = vld [vmem:[#allocation6 + $0x4b8] ss:$20 sps:$4 sm:$0xff]   ;;  %v11701_v31 = vld [vmem:[#allocation6 + $0x4e0] ss:$20 sps:$4 sm:$0xff]  }
 0x3ea   :  { %8147 = vmatpush1.bf16.msra.mxu1 %v11647_v28  ;;  %8019 = vmatprep.subr.bf16.mxu0 %v11652_v29  ;;  %v11698_v30 = vld [vmem:[#allocation6 + $0x4d8] ss:$20 sps:$4 sm:$0xff]  }
 0x3eb   :  { %v12277_v38 = vadd.f32 %v9922_v32, %v6268_v34  ;;  %8148 = vmatprep.subr.bf16.mxu1 %v11655_v0  ;;  %v11706_v32 = vld [vmem:[#allocation6 + $0x504] ss:$20 sps:$4 sm:$0xff]   ;;  %v11709_v34 = vld [vmem:[#allocation6 + $0x50c] ss:$20 sps:$4 sm:$0xff]  }
 0x3ed   :  { %8020 = vmatpush1.bf16.msra.mxu0 %v11650_v35  ;;  %v11707_v35 = vld [vmem:[#allocation6 + $0x508] ss:$20 sps:$4 sm:$0xff]  }
 0x3ee   :  { %8149 = vmatpush1.bf16.msra.mxu1 %v11653_v36  ;;  %8021 = vmatprep.subr.bf16.mxu0 %v11658_v37  ;;  %v11712_v36 = vld [vmem:[#allocation6 + $0x52c] ss:$20 sps:$4 sm:$0xff]   ;;  %v11715_v37 = vld [vmem:[#allocation6 + $0x534] ss:$20 sps:$4 sm:$0xff]  }
 0x3ef   :  { %8150 = vmatprep.subr.bf16.mxu1 %v11661_v39  ;;  %v11713_v39 = vld [vmem:[#allocation6 + $0x530] ss:$20 sps:$4 sm:$0xff]  }
 0x3f1   :  { %8022 = vmatpush1.bf16.msra.mxu0 %v11656_v40  ;;  %v11718_v40 = vld [vmem:[#allocation6 + $0x554] ss:$20 sps:$4 sm:$0xff]  }
 0x3f2   :  { %8151 = vmatpush1.bf16.msra.mxu1 %v11659_v41  ;;  %8023 = vmatprep.subr.bf16.mxu0 %v11664_v44  ;;  %v11721_v41 = vld [vmem:[#allocation6 + $0x55c] ss:$20 sps:$4 sm:$0xff]   ;;  %v12002_v44 = vmov 0  }
 0x3f3   :  { %8152 = vmatprep.subr.bf16.mxu1 %v11667_v47  ;;  %v11716_v47 = vld [vmem:[#allocation6 + $0x550] ss:$20 sps:$4 sm:$0xff]  }
 0x3f5   :  { %8024 = vmatpush1.bf16.msra.mxu0 %v11662_v48  ;;  %v11719_v48 = vld [vmem:[#allocation6 + $0x558] ss:$20 sps:$4 sm:$0xff]  }
 0x3f6   :  { %8153 = vmatpush1.bf16.msra.mxu1 %v11665_v49  ;;  %8025 = vmatprep.subr.bf16.mxu0 %v11670_v50  ;;  %v11724_v49 = vld [vmem:[#allocation6 + $0x57c] ss:$20 sps:$4 sm:$0xff]   ;;  %v11727_v50 = vld [vmem:[#allocation6 + $0x584] ss:$20 sps:$4 sm:$0xff]  }
 0x3f7   :  { %8154 = vmatprep.subr.bf16.mxu1 %v11673_v51  ;;  %v11722_v51 = vld [vmem:[#allocation6 + $0x578] ss:$20 sps:$4 sm:$0xff]  }
 0x3f9   :  { %8026 = vmatpush1.bf16.msra.mxu0 %v11668_v52  ;;  %v11725_v52 = vld [vmem:[#allocation6 + $0x580] ss:$20 sps:$4 sm:$0xff]  }
 0x3fa   :  { %8155 = vmatpush1.bf16.msra.mxu1 %v11671_v53  ;;  %8027 = vmatprep.subr.bf16.mxu0 %v11676_v54  ;;  %v11730_v53 = vld [vmem:[#allocation6 + $0x5a4] ss:$20 sps:$4 sm:$0xff]   ;;  %v11733_v54 = vld [vmem:[#allocation6 + $0x5ac] ss:$20 sps:$4 sm:$0xff]  }
 0x3fb   :  { %8156 = vmatprep.subr.bf16.mxu1 %v11679_v56  ;;  %v11728_v56 = vld [vmem:[#allocation6 + $0x5a0] ss:$20 sps:$4 sm:$0xff]  }
 0x3fd   :  { %8028 = vmatpush1.bf16.msra.mxu0 %v11674_v57  ;;  %v11731_v57 = vld [vmem:[#allocation6 + $0x5a8] ss:$20 sps:$4 sm:$0xff]  }
 0x3fe   :  { %8157 = vmatpush1.bf16.msra.mxu1 %v11677_v58  ;;  %8029 = vmatprep.subr.bf16.mxu0 %v11682_v59  ;;  %v11736_v58 = vld [vmem:[#allocation6 + $0x5cc] ss:$20 sps:$4 sm:$0xff]   ;;  %v11739_v59 = vld [vmem:[#allocation6 + $0x5d4] ss:$20 sps:$4 sm:$0xff]  }
 0x3ff   :  { %8158 = vmatprep.subr.bf16.mxu1 %v11685_v60  ;;  %v11734_v60 = vld [vmem:[#allocation6 + $0x5c8] ss:$20 sps:$4 sm:$0xff]  }
 0x401   :  { %8030 = vmatpush1.bf16.msra.mxu0 %v11680_v63  ;;  %v11737_v63 = vld [vmem:[#allocation6 + $0x5d0] ss:$20 sps:$4 sm:$0xff]  }
 0x402   :  { %8159 = vmatpush1.bf16.msra.mxu1 %v11683_v3  ;;  %8031 = vmatprep.subr.bf16.mxu0 %v11688_v4  ;;  %v11742_v3 = vld [vmem:[#allocation6 + $0x5f4] ss:$20 sps:$4 sm:$0xff]  }
 0x403   :  { %v9939_v9 = vpop.f32.mrb[8].mxu0  ;;  %v9961_v11 = vpop.f32.mrb[8].mxu1  ;;  %8160 = vmatprep.subr.bf16.mxu1 %v11691_v5 }
 0x404   :  { %v9940_v13 = vpop.f32.mrb[9].mxu0  ;;  %v9962_v14 = vpop.f32.mrb[9].mxu1 }
 0x405   :  { %v9941_v15 = vadd.f32 %v9940_v13, %v9939_v9  ;;  %v9963_v16 = vadd.f32 %v9962_v14, %v9961_v11  ;;  %v9942_v17 = vpop.f32.mrb[10].mxu0  ;;  %v9964_v18 = vpop.f32.mrb[10].mxu1  ;;  %8032 = vmatpush1.bf16.msra.mxu0 %v11686_v6  ;;  %v11745_v6 = vld [vmem:[#allocation6 + $0x5fc] ss:$20 sps:$4 sm:$0xff]  }
 0x406   :  { %8161 = vmatpush1.bf16.msra.mxu1 %v11689_v7  ;;  %v9943_v20 = vpop.f32.mrb[11].mxu0  ;;  %v9965_v21 = vpop.f32.mrb[11].mxu1  ;;  %8033 = vmatprep.subr.bf16.mxu0 %v11694_v8  ;;  %v11740_v14 = vld [vmem:[#allocation6 + $0x5f0] ss:$20 sps:$4 sm:$0xff]  }
 0x407   :  { %v6347_v24 = vadd.f32 %v9941_v15, %v12275_v33  ;;  %v9944_v25 = vadd.f32 %v9943_v20, %v9942_v17  ;;  %v9966_v26 = vadd.f32 %v9965_v21, %v9964_v18  ;;  %8162 = vmatprep.subr.bf16.mxu1 %v11697_v12  ;;  %v11704_v33 = vld [vmem:[#allocation6 + $0x500] ss:$20 sps:$4 sm:$0xff]   ;;  %v11743_v17 = vld [vmem:[#allocation6 + $0x5f8] ss:$20 sps:$4 sm:$0xff]   ;;  %v11748_v18 = vld [vmem:[#allocation6 + $0x61c] ss:$20 sps:$4 sm:$0xff]  }
 0x409   :  { %v12280_v28 = vadd.f32 %v9963_v16, %v6347_v24  ;;  %v6350_v29 = vadd.f32 %v9944_v25, %v12277_v38  ;;  %8034 = vmatpush1.bf16.msra.mxu0 %v11692_v19  ;;  %v11710_v38 = vld [vmem:[#allocation6 + $0x528] ss:$20 sps:$4 sm:$0xff]   ;;  %v11746_v25 = vld [vmem:[#allocation6 + $0x618] ss:$20 sps:$4 sm:$0xff]  }
 0x40a   :  { %8163 = vmatpush1.bf16.msra.mxu1 %v11695_v22  ;;  %8035 = vmatprep.subr.bf16.mxu0 %v11700_v23  ;;  %v11751_v22 = vld [vmem:[#allocation6 + $0x624] ss:$20 sps:$4 sm:$0xff]  }
 0x40b   :  { %v12283_v0 = vadd.f32 %v9966_v26, %v6350_v29  ;;  %8164 = vmatprep.subr.bf16.mxu1 %v11703_v27  ;;  %v11749_v26 = vld [vmem:[#allocation6 + $0x620] ss:$20 sps:$4 sm:$0xff]   ;;  %v11752_v27 = vld [vmem:[#allocation6 + $0x150] ss:$20 sps:$4 sm:$0xff]  }
 0x40d   :  { %8036 = vmatpush1.bf16.msra.mxu0 %v11698_v30  ;;  %v11753_v30 = vld [vmem:[#allocation6 + $0x3d0] ss:$20 sps:$4 sm:$0xff]  }
 0x40e   :  { %8165 = vmatpush1.bf16.msra.mxu1 %v11701_v31  ;;  %8048 = vmatprep.subr.bf16.mxu0 %v11706_v32 }
 0x40f   :  { %8177 = vmatprep.subr.bf16.mxu1 %v11709_v34 }
 0x410   :  { %8038 = vmatmul.mubr.bf16.vlgmr.msra.gmra.mrb[24].mxu0 %v12259_v43 }
 0x411   :  { %8167 = vmatmul.mubr.bf16.vlgmr.msra.gmra.mrb[24].mxu1 %v12259_v43  ;;  %8049 = vmatpush1.bf16.msra.mxu0 %v11704_v33 }
 0x412   :  { %8178 = vmatpush1.bf16.msra.mxu1 %v11707_v35  ;;  %8050 = vmatprep.subr.bf16.mxu0 %v11712_v36 }
 0x413   :  { %8179 = vmatprep.subr.bf16.mxu1 %v11715_v37  ;;  %8080 = vmatprep.mubr.bf16.mxu0 %v12002_v44 }
 0x414   :  { %8209 = vmatprep.mubr.bf16.mxu1 %v12002_v44 }
 0x415   :  { %8051 = vmatpush1.bf16.msra.mxu0 %v11710_v38 }
 0x416   :  { %8180 = vmatpush1.bf16.msra.mxu1 %v11713_v39  ;;  %8052 = vmatprep.subr.bf16.mxu0 %v11718_v40 }
 0x417   :  { %8181 = vmatprep.subr.bf16.mxu1 %v11721_v41 }
 0x419   :  { %8053 = vmatpush1.bf16.msra.mxu0 %v11716_v47 }
 0x41a   :  { %8182 = vmatpush1.bf16.msra.mxu1 %v11719_v48  ;;  %8054 = vmatprep.subr.bf16.mxu0 %v11724_v49 }
 0x41b   :  { %8183 = vmatprep.subr.bf16.mxu1 %v11727_v50 }
 0x41d   :  { %8055 = vmatpush1.bf16.msra.mxu0 %v11722_v51 }
 0x41e   :  { %8184 = vmatpush1.bf16.msra.mxu1 %v11725_v52  ;;  %8056 = vmatprep.subr.bf16.mxu0 %v11730_v53 }
 0x41f   :  { %8185 = vmatprep.subr.bf16.mxu1 %v11733_v54 }
 0x421   :  { %8057 = vmatpush1.bf16.msra.mxu0 %v11728_v56 }
 0x422   :  { %8186 = vmatpush1.bf16.msra.mxu1 %v11731_v57  ;;  %8058 = vmatprep.subr.bf16.mxu0 %v11736_v58 }
 0x423   :  { %v9983_v4 = vpop.f32.mrb[12].mxu0  ;;  %v10005_v5 = vpop.f32.mrb[12].mxu1  ;;  %8187 = vmatprep.subr.bf16.mxu1 %v11739_v59 }
 0x424   :  { %v9984_v7 = vpop.f32.mrb[13].mxu0  ;;  %v10006_v8 = vpop.f32.mrb[13].mxu1 }
 0x425   :  { %v9985_v9 = vadd.f32 %v9984_v7, %v9983_v4  ;;  %v10007_v11 = vadd.f32 %v10006_v8, %v10005_v5  ;;  %v9986_v12 = vpop.f32.mrb[14].mxu0  ;;  %v10008_v13 = vpop.f32.mrb[14].mxu1  ;;  %8059 = vmatpush1.bf16.msra.mxu0 %v11734_v60 }
 0x426   :  { %v9987_v15 = vpop.f32.mrb[15].mxu0  ;;  %v10009_v16 = vpop.f32.mrb[15].mxu1  ;;  %8188 = vmatpush1.bf16.msra.mxu1 %v11737_v63  ;;  %8060 = vmatprep.subr.bf16.mxu0 %v11742_v3 }
 0x427   :  { %v6429_v19 = vadd.f32 %v9985_v9, %v12280_v28  ;;  %v9988_v20 = vadd.f32 %v9987_v15, %v9986_v12  ;;  %v10010_v21 = vadd.f32 %v10009_v16, %v10008_v13  ;;  %8189 = vmatprep.subr.bf16.mxu1 %v11745_v6  ;;  %v11754_v9 = vld [vmem:[#allocation6 + $0x10] ss:$20 sps:$4 sm:$0xff]   ;;  %v11756_v13 = vld [vmem:[#allocation6 + $0x178] ss:$20 sps:$4 sm:$0xff]  }
 0x428   :  { %v11758_v15 = vld [vmem:[#allocation6 + $0x38] ss:$20 sps:$4 sm:$0xff]  }
 0x429   :  { %v6470_v23 = vadd.f32 %v10007_v11, %v6429_v19  ;;  %v6432_v24 = vadd.f32 %v9988_v20, %v12283_v0  ;;  %8061 = vmatpush1.bf16.msra.mxu0 %v11740_v14  ;;  %v11755_v11 = vld [vmem:[#allocation6 + $0x290] ss:$20 sps:$4 sm:$0xff]   ;;  %v11757_v14 = vld [vmem:[#allocation6 + $0x3f8] ss:$20 sps:$4 sm:$0xff]   ;;  %v11762_v19 = vld [vmem:[#allocation6 + $0x60] ss:$20 sps:$4 sm:$0xff]  }
 0x42a   :  { %8190 = vmatpush1.bf16.msra.mxu1 %v11743_v17  ;;  %8062 = vmatprep.subr.bf16.mxu0 %v11748_v18  ;;  %v11759_v16 = vld [vmem:[#allocation6 + $0x2b8] ss:$20 sps:$4 sm:$0xff]   ;;  %v11760_v17 = vld [vmem:[#allocation6 + $0x1a0] ss:$20 sps:$4 sm:$0xff]  }
 0x42b   :  { %v6473_v29 = vadd.f32 %v10010_v21, %v6432_v24  ;;  %8191 = vmatprep.subr.bf16.mxu1 %v11751_v22  ;;  %v11761_v18 = vld [vmem:[#allocation6 + $0x420] ss:$20 sps:$4 sm:$0xff]   ;;  %v11764_v21 = vld [vmem:[#allocation6 + $0x1c8] ss:$20 sps:$4 sm:$0xff]  }
 0x42c   :  { %v11763_v20 = vld [vmem:[#allocation6 + $0x2e0] ss:$20 sps:$4 sm:$0xff]   ;;  %v11765_v22 = vld [vmem:[#allocation6 + $0x448] ss:$20 sps:$4 sm:$0xff]  }
 0x42d   :  { %8063 = vmatpush1.bf16.msra.mxu0 %v11746_v25  ;;  %v11767_v24 = vld [vmem:[#allocation6 + $0x308] ss:$20 sps:$4 sm:$0xff]   ;;  %v11770_v25 = vld [vmem:[#allocation6 + $0xb0] ss:$20 sps:$4 sm:$0xff]  }
 0x42e   :  { %8192 = vmatpush1.bf16.msra.mxu1 %v11749_v26  ;;  %10099 = vmatprep.subr.bf16.mxu0 %v11752_v27  ;;  %v11771_v26 = vld [vmem:[#allocation6 + $0x330] ss:$20 sps:$4 sm:$0xff]   ;;  %v11772_v27 = vld [vmem:[#allocation6 + $0x218] ss:$20 sps:$4 sm:$0xff]  }
 0x42f   :  { %10121 = vmatprep.subr.bf16.mxu1 %v11753_v30  ;;  %v11774_v30 = vld [vmem:[#allocation6 + $0xd8] ss:$20 sps:$4 sm:$0xff]  }
 0x443   :  { %v10027_v28 = vpop.f32.mrb[16].mxu0  ;;  %v10049_v31 = vpop.f32.mrb[16].mxu1 }
 0x444   :  { %v10028_v32 = vpop.f32.mrb[17].mxu0  ;;  %v10050_v34 = vpop.f32.mrb[17].mxu1 }
 0x445   :  { %v10029_v33 = vadd.f32 %v10028_v32, %v10027_v28  ;;  %v10051_v35 = vadd.f32 %v10050_v34, %v10049_v31  ;;  %v10030_v0 = vpop.f32.mrb[18].mxu0  ;;  %v10052_v36 = vpop.f32.mrb[18].mxu1  ;;  %v11775_v28 = vld [vmem:[#allocation6 + $0x358] ss:$20 sps:$4 sm:$0xff]   ;;  %v11776_v31 = vld [vmem:[#allocation6 + $0x240] ss:$20 sps:$4 sm:$0xff]  }
 0x446   :  { %v10031_v37 = vpop.f32.mrb[19].mxu0  ;;  %v10053_v38 = vpop.f32.mrb[19].mxu1  ;;  %v11777_v32 = vld [vmem:[#allocation6 + $0x4c0] ss:$20 sps:$4 sm:$0xff]  }
 0x447   :  { %v6511_v39 = vadd.f32 %v10029_v33, %v6470_v23  ;;  %v10032_v40 = vadd.f32 %v10031_v37, %v10030_v0  ;;  %v10054_v41 = vadd.f32 %v10053_v38, %v10052_v36  ;;  %v11766_v23 = vld [vmem:[#allocation6 + $0x88] ss:$20 sps:$4 sm:$0xff]   ;;  %v11778_v34 = vld [vmem:[#allocation6 + $0x100] ss:$20 sps:$4 sm:$0xff]  }
 0x448   :  { %v11779_v33 = vld [vmem:[#allocation6 + $0x380] ss:$20 sps:$4 sm:$0xff]   ;;  %v11781_v0 = vld [vmem:[#allocation6 + $0x4e8] ss:$20 sps:$4 sm:$0xff]  }
 0x449   :  { %v6552_v44 = vadd.f32 %v10051_v35, %v6511_v39  ;;  %v6514_v47 = vadd.f32 %v10032_v40, %v6473_v29  ;;  %v11773_v29 = vld [vmem:[#allocation6 + $0x498] ss:$20 sps:$4 sm:$0xff]   ;;  %v11780_v35 = vld [vmem:[#allocation6 + $0x268] ss:$20 sps:$4 sm:$0xff]   ;;  %v11784_v39 = vld [vmem:[#allocation6 + $0x510] ss:$20 sps:$4 sm:$0xff]  }
 0x44a   :  { %v11782_v36 = vld [vmem:[#allocation6 + $0x128] ss:$20 sps:$4 sm:$0xff]   ;;  %v12003_v40 = vmov 0.0  }
 0x44b   :  { %v6555_v48 = vadd.f32 %v10054_v41, %v6514_v47  ;;  %v11783_v37 = vld [vmem:[#allocation6 + $0x3a8] ss:$20 sps:$4 sm:$0xff]   ;;  %v11785_v47 = vld [vmem:[#allocation6 + $0x538] ss:$20 sps:$4 sm:$0xff]  }
 0x44c   :  { %v11792_v38 = vld [vmem:[#allocation9 + $0x40] sm:$0xff]  }
 0x44d   :  { %v11794_v41 = vld [vmem:[#allocation9] sm:$0xff]  }
 0x463   :  { %v10071_v49 = vpop.f32.mrb[20].mxu0  ;;  %v10093_v50 = vpop.f32.mrb[20].mxu1 }
 0x464   :  { %v10072_v51 = vpop.f32.mrb[21].mxu0  ;;  %v10094_v52 = vpop.f32.mrb[21].mxu1 }
 0x465   :  { %v10073_v53 = vadd.f32 %v10072_v51, %v10071_v49  ;;  %v10095_v54 = vadd.f32 %v10094_v52, %v10093_v50  ;;  %v10074_v56 = vpop.f32.mrb[22].mxu0  ;;  %v10096_v57 = vpop.f32.mrb[22].mxu1  ;;  %v11800_v49 = vld [vmem:[#allocation9 + $0x50] sm:$0xff]   ;;  %v11806_v52 = vld [vmem:[#allocation9 + $0x18] sm:$0xff]  }
 0x466   :  { %v10075_v58 = vpop.f32.mrb[23].mxu0  ;;  %v10097_v59 = vpop.f32.mrb[23].mxu1  ;;  %v11786_v50 = vld [vmem:[#allocation6 + $0x560] ss:$20 sps:$4 sm:$0xff]   ;;  %v11787_v51 = vld [vmem:[#allocation6 + $0x588] ss:$20 sps:$4 sm:$0xff]  }
 0x467   :  { %v6593_v60 = vadd.f32 %v10073_v53, %v6552_v44  ;;  %v10076_v63 = vadd.f32 %v10075_v58, %v10074_v56  ;;  %v10098_v3 = vadd.f32 %v10097_v59, %v10096_v57  ;;  %v11796_v44 = vld [vmem:[#allocation9 + $0x48] sm:$0xff]   ;;  %v11808_v53 = vld [vmem:[#allocation9 + $0x60] sm:$0xff]  }
 0x468   :  { %v11810_v56 = vld [vmem:[#allocation9 + $0x20] sm:$0xff]   ;;  %v11812_v57 = vld [vmem:[#allocation9 + $0x68] sm:$0xff]  }
 0x469   :  { %v6634_v4 = vadd.f32 %v10095_v54, %v6593_v60  ;;  %v6596_v5 = vadd.f32 %v10076_v63, %v6555_v48  ;;  %v11798_v48 = vld [vmem:[#allocation9 + $0x8] sm:$0xff]   ;;  %v11791_v60 = vld [vmem:[#allocation6 + $0x628] ss:$20 sps:$4 sm:$0xff]  }
 0x46a   :  { %v11788_v54 = vld [vmem:[#allocation6 + $0x5b0] ss:$20 sps:$4 sm:$0xff]   ;;  %v11789_v58 = vld [vmem:[#allocation6 + $0x5d8] ss:$20 sps:$4 sm:$0xff]   ;;  %v11790_v59 = vld [vmem:[#allocation6 + $0x600] ss:$20 sps:$4 sm:$0xff]  }
 0x46b   :  { %v6637_v6 = vadd.f32 %v10098_v3, %v6596_v5  ;;  %v6644_v7 = vmax.f32 %v6634_v4, 0.0  ;;  %v11793_v63 = vld [vmem:[#allocation9 + $0xc0] sm:$0xff]   ;;  %v11797_v4 = vld [vmem:[#allocation9 + $0xc8] sm:$0xff]  }
 0x46c   :  { %v11795_v3 = vld [vmem:[#allocation9 + $0x80] sm:$0xff]   ;;  %v11799_v5 = vld [vmem:[#allocation9 + $0x88] sm:$0xff]  }
 0x46d   :  { %v6649_v8 = vmax.f32 %v6637_v6, 0.0  ;;  %v11801_v6 = vld [vmem:[#allocation9 + $0xd0] sm:$0xff]  }
 0x46f   :  { %v12289_v12 = vpack.c.bf16 %v6649_v8, %v6644_v7  ;;  %v11803_v7 = vld [vmem:[#allocation9 + $0x90] sm:$0xff]   ;;  %v11805_v8 = vld [vmem:[#allocation9 + $0xd8] sm:$0xff]  }
 0x471   :  { %8081 = vmatmul.mubr.bf16.vlgmr.msra.gmra.mrb[24].mxu0 %v12289_v12  ;;  %8210 = vmatmul.mubr.bf16.vlgmr.msra.gmra.mrb[24].mxu1 %v12289_v12 }
 0x472   :  { %10100 = vmatpush3.bf16.msra.mxu0 %v11754_v9  ;;  %10122 = vmatpush3.bf16.msra.mxu1 %v11755_v11  ;;  %v11807_v9 = vld [vmem:[#allocation9 + $0x98] sm:$0xff]   ;;  %v11809_v11 = vld [vmem:[#allocation9 + $0xe0] sm:$0xff]  }
 0x473   :  { %8252 = vmatprep.mubr.bf16.mxu0 %v12261_v45  ;;  %8293 = vmatprep.mubr.bf16.mxu1 %v12263_v46  ;;  %v11768_v45 = vld [vmem:[#allocation6 + $0x1f0] ss:$20 sps:$4 sm:$0xff]  }
 0x474   :  { %10101 = vmatprep.subr.bf16.mxu0 %v11756_v13  ;;  %10123 = vmatprep.subr.bf16.mxu1 %v11757_v14  ;;  %v11769_v46 = vld [vmem:[#allocation6 + $0x470] ss:$20 sps:$4 sm:$0xff]  }
 0x475   :  { %v11811_v13 = vld [vmem:[#allocation9 + $0xa0] sm:$0xff]   ;;  %v11813_v14 = vld [vmem:[#allocation9 + $0xe8] sm:$0xff]  }
 0x476   :  { %10102 = vmatpush3.bf16.msra.mxu0 %v11758_v15  ;;  %10124 = vmatpush3.bf16.msra.mxu1 %v11759_v16  ;;  %v11814_v15 = vld [vmem:[#allocation9 + $0x28] sm:$0xff]   ;;  %v11816_v16 = vld [vmem:[#allocation9 + $0x70] sm:$0xff]  }
 0x477   :  { %10103 = vmatprep.subr.bf16.mxu0 %v11760_v17  ;;  %10125 = vmatprep.subr.bf16.mxu1 %v11761_v18  ;;  %v11817_v17 = vld [vmem:[#allocation9 + $0xf0] sm:$0xff]  }
 0x478   :  { %v11818_v18 = vld [vmem:[#allocation9 + $0x30] sm:$0xff]  }
 0x47a   :  { %10104 = vmatpush3.bf16.msra.mxu0 %v11762_v19  ;;  %10126 = vmatpush3.bf16.msra.mxu1 %v11763_v20  ;;  %v11819_v19 = vld [vmem:[#allocation9 + $0xb0] sm:$0xff]   ;;  %v11820_v20 = vld [vmem:[#allocation9 + $0x78] sm:$0xff]  }
 0x47b   :  { %10105 = vmatprep.subr.bf16.mxu0 %v11764_v21  ;;  %10127 = vmatprep.subr.bf16.mxu1 %v11765_v22  ;;  %v11821_v21 = vld [vmem:[#allocation9 + $0xf8] sm:$0xff]  }
 0x47c   :  { %v11822_v22 = vld [vmem:[#allocation9 + $0x38] sm:$0xff]  }
 0x47e   :  { %10106 = vmatpush3.bf16.msra.mxu0 %v11766_v23  ;;  %10128 = vmatpush3.bf16.msra.mxu1 %v11767_v24  ;;  %v11823_v23 = vld [vmem:[#allocation9 + $0xb8] sm:$0xff]  }
 0x47f   :  { %10107 = vmatprep.subr.bf16.mxu0 %v11768_v45  ;;  %10129 = vmatprep.subr.bf16.mxu1 %v11769_v46  ;;  %v6895_v24 = vld [vmem:[#allocation7] sm:$0x1f] }
 0x480   :  { %v6900_v45 = vrot.slane %v6895_v24, %v1087_v61  ;;  %v6908_v46 = vrot.slane %v6895_v24, %v1095_v62 }
 0x482   :  { %10108 = vmatpush3.bf16.msra.mxu0 %v11770_v25  ;;  %10130 = vmatpush3.bf16.msra.mxu1 %v11771_v26  ;;  %v6904_v25 = vrot.slane %v6895_v24, %v1091_v1  ;;  %v6912_v26 = vrot.slane %v6895_v24, %v1099_v2 }
 0x483   :  { %10109 = vmatprep.subr.bf16.mxu0 %v11772_v27  ;;  %10131 = vmatprep.subr.bf16.mxu1 %v11773_v29 }
 0x486   :  { %10110 = vmatpush3.bf16.msra.mxu0 %v11774_v30  ;;  %10132 = vmatpush3.bf16.msra.mxu1 %v11775_v28 }
 0x487   :  { %10111 = vmatprep.subr.bf16.mxu0 %v11776_v31  ;;  %10133 = vmatprep.subr.bf16.mxu1 %v11777_v32 }
 0x48a   :  { %10112 = vmatpush3.bf16.msra.mxu0 %v11778_v34  ;;  %10134 = vmatpush3.bf16.msra.mxu1 %v11779_v33 }
 0x48b   :  { %10113 = vmatprep.subr.bf16.mxu0 %v11780_v35  ;;  %10135 = vmatprep.subr.bf16.mxu1 %v11781_v0 }
 0x48e   :  { %10114 = vmatpush3.bf16.msra.mxu0 %v11782_v36  ;;  %10136 = vmatpush3.bf16.msra.mxu1 %v11783_v37 }
 0x48f   :  { %10205 = vmatprep.subr.bf16.mxu0 %v12003_v40  ;;  %10152 = vmatprep.subr.bf16.mxu1 %v11792_v38 }
 0x491   :  { %8253 = vmatmul.mubr.bf16.vlgmr.msra.gmra.mrb[28].mxu0 %v12257_v42  ;;  %8294 = vmatmul.mubr.bf16.vlgmr.msra.gmra.mrb[28].mxu1 %v12259_v43  ;;  %v11802_v42 = vld [vmem:[#allocation9 + $0x10] sm:$0xff]   ;;  %v11804_v43 = vld [vmem:[#allocation9 + $0x58] sm:$0xff]  }
 0x492   :  { %10206 = vmatpush3.bf16.msra.mxu0 %v11784_v39  ;;  %10221 = vmatprep.mubr.msk.bf16.mxu0 %vm12004_vm0, %v12003_v40 }
 0x493   :  { %10207 = vmatprep.subr.bf16.mxu0 %v12003_v40  ;;  %10153 = vmatpush3.bf16.msra.mxu1 %v11794_v41 }
 0x494   :  { %10154 = vmatprep.subr.bf16.mxu1 %v11796_v44 }
 0x496   :  { %10208 = vmatpush3.bf16.msra.mxu0 %v11785_v47 }
 0x497   :  { %10209 = vmatprep.subr.bf16.mxu0 %v12003_v40  ;;  %10155 = vmatpush3.bf16.msra.mxu1 %v11798_v48 }
 0x498   :  { %10156 = vmatprep.subr.bf16.mxu1 %v11800_v49 }
 0x49a   :  { %10210 = vmatpush3.bf16.msra.mxu0 %v11786_v50 }
 0x49b   :  { %10211 = vmatprep.subr.bf16.mxu0 %v12003_v40  ;;  %10157 = vmatpush3.bf16.msra.mxu1 %v11802_v42 }
 0x49c   :  { %10158 = vmatprep.subr.bf16.mxu1 %v11804_v43 }
 0x49e   :  { %10212 = vmatpush3.bf16.msra.mxu0 %v11787_v51 }
 0x49f   :  { %10213 = vmatprep.subr.bf16.mxu0 %v12003_v40  ;;  %10159 = vmatpush3.bf16.msra.mxu1 %v11806_v52 }
 0x4a0   :  { %10160 = vmatprep.subr.bf16.mxu1 %v11808_v53  ;;  %v11824_v53 = vld [vmem:[#allocation9 + $0x100] sm:$0xff]  }
 0x4a2   :  { %10214 = vmatpush3.bf16.msra.mxu0 %v11788_v54  ;;  %v11825_v54 = vld [vmem:[#allocation9 + $0x108] sm:$0xff]  }
 0x4a3   :  { %10215 = vmatprep.subr.bf16.mxu0 %v12003_v40  ;;  %10161 = vmatpush3.bf16.msra.mxu1 %v11810_v56  ;;  %v11826_v56 = vld [vmem:[#allocation9 + $0x110] sm:$0xff]  }
 0x4a4   :  { %10162 = vmatprep.subr.bf16.mxu1 %v11812_v57  ;;  %v11827_v57 = vld [vmem:[#allocation9 + $0x118] sm:$0xff]  }
 0x4a6   :  { %10216 = vmatpush3.bf16.msra.mxu0 %v11789_v58  ;;  %v11828_v58 = vld [vmem:[#allocation9 + $0x120] sm:$0xff]  }
 0x4a7   :  { %10217 = vmatprep.subr.bf16.mxu0 %v12003_v40  ;;  %10163 = vmatpush3.bf16.msra.mxu1 %v11814_v15 }
 0x4a8   :  { %10164 = vmatprep.subr.bf16.mxu1 %v11816_v16 }
 0x4aa   :  { %10218 = vmatpush3.bf16.msra.mxu0 %v11790_v59  ;;  %v11829_v59 = vld [vmem:[#allocation9 + $0x128] sm:$0xff]  }
 0x4ab   :  { %10219 = vmatprep.subr.bf16.mxu0 %v12003_v40  ;;  %10165 = vmatpush3.bf16.msra.mxu1 %v11818_v18 }
 0x4ac   :  { %10166 = vmatprep.subr.bf16.mxu1 %v11820_v20 }
 0x4ae   :  { %10220 = vmatpush3.bf16.msra.mxu0 %v11791_v60 }
 0x4af   :  { %10174 = vmatprep.subr.bf16.mxu0 %v11793_v63  ;;  %10167 = vmatpush3.bf16.msra.mxu1 %v11822_v22 }
 0x4b0   :  { %10225 = vmatprep.subr.bf16.mxu1 %v12003_v40 }
 0x4b1   :  { %10222 = vmatmul.mubr.bf16.vlgmr.msra.gmra.mrb[32].mxu0 %v12289_v12  ;;  %v11815_v12 = vld [vmem:[#allocation9 + $0xa8] sm:$0xff]  }
 0x4b2   :  { %10175 = vmatpush3.bf16.msra.mxu0 %v11795_v3  ;;  %v6916_v3 = vrot.slane %v6895_v24, %v1103_v10 }
 0x4b3   :  { %10176 = vmatprep.subr.bf16.mxu0 %v11797_v4  ;;  %v11830_v4 = vld [vmem:[#allocation9 + $0x130] sm:$0xff]  }
 0x4b6   :  { %10177 = vmatpush3.bf16.msra.mxu0 %v11799_v5 }
 0x4b7   :  { %10178 = vmatprep.subr.bf16.mxu0 %v11801_v6 }
 0x4ba   :  { %10179 = vmatpush3.bf16.msra.mxu0 %v11803_v7 }
 0x4bb   :  { %10180 = vmatprep.subr.bf16.mxu0 %v11805_v8 }
 0x4be   :  { %10181 = vmatpush3.bf16.msra.mxu0 %v11807_v9 }
 0x4bf   :  { %10182 = vmatprep.subr.bf16.mxu0 %v11809_v11 }
 0x4c2   :  { %10183 = vmatpush3.bf16.msra.mxu0 %v11811_v13 }
 0x4c3   :  { %10184 = vmatprep.subr.bf16.mxu0 %v11813_v14 }
 0x4c6   :  { %10185 = vmatpush3.bf16.msra.mxu0 %v11815_v12 }
 0x4c7   :  { %10186 = vmatprep.subr.bf16.mxu0 %v11817_v17  ;;  %v11831_v17 = vld [vmem:[#allocation9 + $0x138] sm:$0xff]  }
 0x4ca   :  { %10187 = vmatpush3.bf16.msra.mxu0 %v11819_v19 }
 0x4cb   :  { %10188 = vmatprep.subr.bf16.mxu0 %v11821_v21 }
 0x4ce   :  { %10189 = vmatpush3.bf16.msra.mxu0 %v11823_v23 }
 0x544   :  { %v8082_v27 = vpop.f32.mrb[24].mxu0  ;;  %v8211_v29 = vpop.f32.mrb[24].mxu1 }
 0x545   :  { %v10253_v30 = vadd.f32 %v8082_v27, %v6900_v45  ;;  %v10257_v28 = vadd.f32 %v8211_v29, %v6908_v46  ;;  %v8084_v31 = vpop.f32.mrb[25].mxu0  ;;  %v8213_v32 = vpop.f32.mrb[25].mxu1  ;;  %v9838_v29 = vld [vmem:[#allocation10] ss:$0 sm:$0xff] }
 0x546   :  { %v10254_v34 = vadd.f32 %v8084_v31, %v6904_v25  ;;  %v10258_v33 = vadd.f32 %v8213_v32, %v6912_v26  ;;  %v8086_v35 = vpop.f32.mrb[26].mxu0  ;;  %v8215_v0 = vpop.f32.mrb[26].mxu1 }
 0x547   :  { %v10255_v61 = vadd.f32 %v8086_v35, %v6900_v45  ;;  %v10259_v36 = vadd.f32 %v8215_v0, %v6908_v46  ;;  %v8088_v37 = vpop.f32.mrb[27].mxu0  ;;  %v8217_v62 = vpop.f32.mrb[27].mxu1  ;;  %v8343_v1 = vmax.f32 %v10253_v30, 0.0  ;;  %v8345_v41 = vmax.f32 %v10257_v28, 0.0 }
 0x548   :  { %v10256_v38 = vadd.f32 %v8088_v37, %v6904_v25  ;;  %v10260_v39 = vadd.f32 %v8217_v62, %v6912_v26  ;;  %v8344_v47 = vmax.f32 %v10254_v34, 0.0  ;;  %v8346_v48 = vmax.f32 %v10258_v33, 0.0 }
 0x549   :  { %v8348_v44 = vmax.f32 %v10255_v61, 0.0  ;;  %v8350_v2 = vmax.f32 %v10259_v36, 0.0 }
 0x54a   :  { %v8349_v49 = vmax.f32 %v10256_v38, 0.0  ;;  %v8351_v50 = vmax.f32 %v10260_v39, 0.0 }
 0x54b   :  { %v8353_v42 = vpack.c.bf16 %v8348_v44, %v8343_v1  ;;  %v8355_v43 = vpack.c.bf16 %v8350_v2, %v8345_v41 }
 0x54c   :  { %v8354_v51 = vpack.c.bf16 %v8349_v49, %v8344_v47  ;;  %v8356_v52 = vpack.c.bf16 %v8351_v50, %v8346_v48 }
 0x54e   :  { %8717 = vmatprep.mubr.bf16.mxu1 %v8354_v51  ;;  %8758 = vmatprep.mubr.bf16.mxu0 %v8356_v52 }
 0x54f   :  { %8718 = vmatmul.mubr.bf16.vlgmr.msra.gmra.mrb[32].mxu1 %v8353_v42  ;;  %8759 = vmatmul.mubr.bf16.vlgmr.msra.gmra.mrb[36].mxu0 %v8355_v43 }
 0x550   :  { %10226 = vmatpush3.bf16.msra.mxu1 %v11824_v53  ;;  %10241 = vmatprep.mubr.msk.bf16.mxu1 %vm12004_vm0, %v12003_v40 }
 0x551   :  { %10227 = vmatprep.subr.bf16.mxu1 %v12003_v40 }
 0x554   :  { %10228 = vmatpush3.bf16.msra.mxu1 %v11825_v54 }
 0x555   :  { %10229 = vmatprep.subr.bf16.mxu1 %v12003_v40 }
 0x558   :  { %10230 = vmatpush3.bf16.msra.mxu1 %v11826_v56 }
 0x559   :  { %10231 = vmatprep.subr.bf16.mxu1 %v12003_v40 }
 0x55c   :  { %10232 = vmatpush3.bf16.msra.mxu1 %v11827_v57 }
 0x55d   :  { %10233 = vmatprep.subr.bf16.mxu1 %v12003_v40 }
 0x560   :  { %10234 = vmatpush3.bf16.msra.mxu1 %v11828_v58 }
 0x561   :  { %10235 = vmatprep.subr.bf16.mxu1 %v12003_v40 }
 0x564   :  { %v10115_v60 = vpop.f32.mrb[28].mxu0  ;;  %v10137_v63 = vpop.f32.mrb[28].mxu1  ;;  %10236 = vmatpush3.bf16.msra.mxu1 %v11829_v59 }
 0x565   :  { %v10116_v5 = vpop.f32.mrb[29].mxu0  ;;  %v10138_v6 = vpop.f32.mrb[29].mxu1  ;;  %10237 = vmatprep.subr.bf16.mxu1 %v12003_v40 }
 0x566   :  { %v10117_v7 = vadd.f32 %v10116_v5, %v10115_v60  ;;  %v10139_v8 = vadd.f32 %v10138_v6, %v10137_v63  ;;  %v10118_v9 = vpop.f32.mrb[30].mxu0  ;;  %v10140_v11 = vpop.f32.mrb[30].mxu1 }
 0x567   :  { %v10119_v13 = vpop.f32.mrb[31].mxu0  ;;  %v10141_v14 = vpop.f32.mrb[31].mxu1 }
 0x568   :  { %v8255_v15 = vadd.f32 %v10117_v7, %v6916_v3  ;;  %v10120_v12 = vadd.f32 %v10119_v13, %v10118_v9  ;;  %v10142_v16 = vadd.f32 %v10141_v14, %v10140_v11  ;;  %10238 = vmatpush3.bf16.msra.mxu1 %v11830_v4 }
 0x569   :  { %10239 = vmatprep.subr.bf16.mxu1 %v12003_v40 }
 0x56a   :  { %v8258_v55 = vadd.f32 %v10120_v12, %v6916_v3  ;;  %v8296_v10 = vadd.f32 %v10139_v8, %v8255_v15 }
 0x56c   :  { %v8299_v18 = vadd.f32 %v10142_v16, %v8258_v55  ;;  %10240 = vmatpush3.bf16.msra.mxu1 %v11831_v17 }
 0x584   :  { %v8336_v19 = vpop.f32.mrb[32].mxu0 }
 0x585   :  { %v8337_v20 = vadd.f32 %v8336_v19, %v8296_v10  ;;  %v10223_v21 = vpop.f32.mrb[33].mxu0 }
 0x586   :  { %v8339_v22 = vpop.f32.mrb[34].mxu0 }
 0x587   :  { %v8340_v23 = vadd.f32 %v8339_v22, %v8299_v18  ;;  %v10224_v24 = vpop.f32.mrb[35].mxu0  ;;  %v8347_v45 = vmax.f32 %v8337_v20, 0.0 }
 0x589   :  { %v8352_v46 = vmax.f32 %v8340_v23, 0.0 }
 0x58b   :  { %v8357_v25 = vpack.c.bf16 %v8352_v46, %v8347_v45 }
 0x58d   :  { %10242 = vmatmul.mubr.bf16.vlgmr.msra.gmra.mrb[36].mxu1 %v8357_v25 }
 0x622   :  { %v10168_v26 = vpop.f32.mrb[32].mxu1  ;;  %v10190_v27 = vpop.f32.mrb[36].mxu0 }
 0x623   :  { %v10169_v30 = vpop.f32.mrb[33].mxu1  ;;  %v10191_v28 = vpop.f32.mrb[37].mxu0 }
 0x624   :  { %v10170_v40 = vadd.f32 %v10169_v30, %v10168_v26  ;;  %v10192_v31 = vadd.f32 %v10191_v28, %v10190_v27  ;;  %v10171_v32 = vpop.f32.mrb[34].mxu1  ;;  %v10193_v34 = vpop.f32.mrb[38].mxu0 }
 0x625   :  { %v10172_v33 = vpop.f32.mrb[35].mxu1  ;;  %v10194_v35 = vpop.f32.mrb[39].mxu0 }
 0x626   :  { %v8720_v0 = vadd.f32 %v10170_v40, %v9838_v29  ;;  %v10173_v61 = vadd.f32 %v10172_v33, %v10171_v32  ;;  %v10195_v36 = vadd.f32 %v10194_v35, %v10193_v34 }
 0x628   :  { %v8723_v37 = vadd.f32 %v10173_v61, %v9838_v29  ;;  %v8761_v62 = vadd.f32 %v10192_v31, %v8720_v0 }
 0x62a   :  { %v8764_v38 = vadd.f32 %v10195_v36, %v8723_v37 }
 0x660   :  { %v8801_v39 = vpop.f32.mrb[36].mxu1 }
 0x661   :  { %v8802_v1 = vadd.f32 %v8801_v39, %v8761_v62  ;;  %v10243_v41 = vpop.f32.mrb[37].mxu1 }
 0x662   :  { %v8804_v44 = vpop.f32.mrb[38].mxu1 }
 0x663   :  { %8808 = vst [vmem:[%s12341_s7] sm:$0xff] %v8802_v1  ;;  %v8805_v2 = vadd.f32 %v8804_v44, %v8764_v38  ;;  %v10244_v47 = vpop.f32.mrb[39].mxu1 }
 0x665   :  { %8809 = vst [vmem:[%s12341_s7 + $0x8] sm:$0xff] %v8805_v2 }
 0x666   :  { %8814 = vsyncpa [#allocation3], 1 }
 0x667   :  { %8815 = vsyncpa [#allocation5], 1 }
 0x668   :  { %8816 = vsyncpa [#allocation8], 1 }
 0x669   :  { %8817 = vsyncpa [#allocation11], 1 }

</bundles_post_ra>
